<compile_context>
chip_gen: v7x
topology: tpu7x:2x2x1
jax: 0.10.0
libtpu: 0.0.40
codegen_flags: <defaults>
</compile_context>

<pallas_src>
import functools

import jax
import jax.numpy as jnp
from jax import lax
from jax.experimental import pallas as pl
from jax.experimental.pallas import tpu as pltpu

LANE = 128


# ---------------------------------------------------------------------------
# Fused Pallas kernel: conv3x3+bias+LeakyReLU -> conv3x3+bias -> +residual
# ---------------------------------------------------------------------------
def _fused_resblock_kernel(x_ref, w1_ref, b1_ref, w2_ref, b2_ref, o_ref,
                           xpad_s, ypad_s, *, H, W, C):
    """One batch element per grid step; the intermediate activation never
    leaves VMEM.

    x_ref  : (1, H, W, C)       input block, NHWC (C padded to lane width)
    w*_ref : (3, 3, C, C)       HWIO weights (resident across grid steps)
    b*_ref : (1, C)             bias
    o_ref  : (1, H, W, C)       output block
    xpad_s : (H+2, W+2, C)      VMEM scratch: zero-padded copy of x
    ypad_s : (H+2, W+2, C) f32  VMEM scratch: zero-padded intermediate act.
    """
    # Zero the scratch every step (cheap vs. the 18 matmuls, and safe under
    # megacore "parallel" sharding where program_id(0)==0 may never execute
    # on the second core), then fill the interiors.
    xpad_s[...] = jnp.zeros_like(xpad_s)
    ypad_s[...] = jnp.zeros_like(ypad_s)

    x = x_ref[0]                                     # (H, W, C), in VMEM
    xpad_s[1:H + 1, 1:W + 1, :] = x

    # ---- conv1 + bias + LeakyReLU(0.2), f32 accumulation ----------------
    # Accumulator starts from the broadcast bias (saves one full-tile add).
    acc = jnp.broadcast_to(b1_ref[0].astype(jnp.float32), (H * W, C))
    for dy in range(3):
        for dx in range(3):
            patch = xpad_s[dy:dy + H, dx:dx + W, :].reshape(H * W, C)
            acc = acc + jnp.dot(patch, w1_ref[dy, dx],
                                preferred_element_type=jnp.float32)
    y = jnp.maximum(acc, 0.2 * acc)                  # LeakyReLU(0.2)
    ypad_s[1:H + 1, 1:W + 1, :] = y.reshape(H, W, C)

    # ---- conv2 + bias + residual ----------------------------------------
    # Residual reuses the x block already resident in VMEM (no HBM re-read).
    acc2 = (jnp.broadcast_to(b2_ref[0].astype(jnp.float32), (H * W, C))
            + x.reshape(H * W, C).astype(jnp.float32))
    for dy in range(3):
        for dx in range(3):
            patch = ypad_s[dy:dy + H, dx:dx + W, :].reshape(H * W, C)
            acc2 = acc2 + jnp.dot(patch, w2_ref[dy, dx],
                                  preferred_element_type=jnp.float32)

    o_ref[0] = acc2.reshape(H, W, C).astype(o_ref.dtype)


# ---------------------------------------------------------------------------
# Forward wrapper (NCHW in / NCHW out, like the PyTorch module)
# ---------------------------------------------------------------------------
def resnet_block_forward(x_nchw, params):
    N, C, H, W = x_nchw.shape
    dtype = x_nchw.dtype

    # Pad channels up to a multiple of the 128-lane width so every vreg,
    # matmul operand and output store is lane-dense (exact math: padded
    # weight rows/cols and bias entries are zero, padded channels stay zero).
    Cp = ((C + LANE - 1) // LANE) * LANE
    pc = Cp - C

    x = jnp.transpose(x_nchw, (0, 2, 3, 1))                   # NCHW -> NHWC
    x = jnp.pad(x, ((0, 0), (0, 0), (0, 0), (0, pc)))

    def prep_w(w_oihw):                                       # OIHW -> HWIO
        w = jnp.transpose(w_oihw, (2, 3, 1, 0))
        return jnp.pad(w, ((0, 0), (0, 0), (0, pc), (0, pc)))

    w1 = prep_w(params["w1"])
    w2 = prep_w(params["w2"])
    b1 = jnp.pad(params["b1"], (0, pc)).reshape(1, Cp)
    b2 = jnp.pad(params["b2"], (0, pc)).reshape(1, Cp)

    img_spec = pl.BlockSpec((1, H, W, Cp), lambda n: (n, 0, 0, 0))
    w_spec = pl.BlockSpec((3, 3, Cp, Cp), lambda n: (0, 0, 0, 0))
    b_spec = pl.BlockSpec((1, Cp), lambda n: (0, 0))

    # TODO(synk): for realistic ASFFNet slabs (large H*W*Cp) add a halo'd
    # row-band grid axis so blocks fit v7x's 64 MiB VMEM, the pipeline gets
    # >2 steps, and both v7x TensorCores get work even at N=1.
    out = pl.pallas_call(
        functools.partial(_fused_resblock_kernel, H=H, W=W, C=Cp),
        out_shape=jax.ShapeDtypeStruct((N, H, W, Cp), dtype),
        grid_spec=pltpu.PrefetchScalarGridSpec(
            num_scalar_prefetch=0,
            grid=(N,),
            in_specs=[img_spec, w_spec, b_spec, w_spec, b_spec],
            out_specs=img_spec,
            scratch_shapes=[
                pltpu.VMEM((H + 2, W + 2, Cp), x.dtype),       # padded x
                pltpu.VMEM((H + 2, W + 2, Cp), jnp.float32),   # padded y
            ],
        ),
        compiler_params=pltpu.CompilerParams(
            dimension_semantics=("parallel",)),
    )(x, w1, b1, w2, b2)

    out = out[..., :C]                                        # drop channel pad
    return jnp.transpose(out, (0, 3, 1, 2))                   # NHWC -> NCHW


# ---------------------------------------------------------------------------
# Parameter setup (deterministic, synthetic) + spectral-norm glue
# ---------------------------------------------------------------------------
def _spectral_normalize(w_oihw, key, n_iter=10, eps=1e-12):
    """W / sigma via power iteration, matching torch spectral_norm semantics
    (modulo the persistent u buffer; see note in JSON)."""
    cout = w_oihw.shape[0]
    w_mat = w_oihw.reshape(cout, -1)
    u = jax.random.normal(key, (cout,), dtype=w_mat.dtype)
    u = u / (jnp.linalg.norm(u) + eps)
    for _ in range(n_iter):
        v = w_mat.T @ u
        v = v / (jnp.linalg.norm(v) + eps)
        u = w_mat @ v
        u = u / (jnp.linalg.norm(u) + eps)
    sigma = u @ (w_mat @ v)
    return w_oihw / sigma


def init_resnet_block_params(key, in_channels, kernel_size=3):
    k1, k2, k3, k4, k5, k6 = jax.random.split(key, 6)
    shape_w = (in_channels, in_channels, kernel_size, kernel_size)
    w1 = jax.random.normal(k1, shape_w, jnp.float32) * 0.1
    w2 = jax.random.normal(k2, shape_w, jnp.float32) * 0.1
    b1 = jax.random.normal(k3, (in_channels,), jnp.float32) * 0.1
    b2 = jax.random.normal(k4, (in_channels,), jnp.float32) * 0.1
    w1 = _spectral_normalize(w1, k5)
    w2 = _spectral_normalize(w2, k6)
    return {"w1": w1, "b1": b1, "w2": w2, "b2": b2}


# ---------------------------------------------------------------------------
# Pure-JAX reference for verification
# ---------------------------------------------------------------------------
def resnet_block_reference(x_nchw, params):
    def conv(x, w, b):
        y = lax.conv_general_dilated(
            x, w, window_strides=(1, 1), padding="SAME",
            dimension_numbers=("NCHW", "OIHW", "NCHW"))
        return y + b.reshape(1, -1, 1, 1)

    h = conv(x_nchw, params["w1"], params["b1"])
    h = jnp.where(h > 0, h, 0.2 * h)
    h = conv(h, params["w2"], params["b2"])
    return h + x_nchw


# ---------------------------------------------------------------------------
if __name__ == "__main__":
    key = jax.random.PRNGKey(0)
    k_x, k_p = jax.random.split(key)

    N, C, H, W = 2, 4, 16, 16
    x = jax.random.normal(k_x, (N, C, H, W), jnp.float32)
    params = init_resnet_block_params(k_p, in_channels=C)

    out = resnet_block_forward(x, params)
    out = jax.block_until_ready(out)

    ref = resnet_block_reference(x, params)
    assert out.shape == (N, C, H, W)
    assert jnp.allclose(out, ref, atol=1e-4, rtol=1e-4), \
        f"max err {jnp.max(jnp.abs(out - ref))}"

    print("KERNEL_OK")
</pallas_src>

<mosaic_0001>
module attributes {stable_mosaic.version = 11 : i64} {
  func.func @_fused_resblock_kernel(%arg0: i32, %arg1: memref<1x16x16x128xf32, #tpu.memory_space<vmem>>, %arg2: memref<3x3x128x128xf32, #tpu.memory_space<vmem>>, %arg3: memref<1x128xf32, #tpu.memory_space<vmem>>, %arg4: memref<3x3x128x128xf32, #tpu.memory_space<vmem>>, %arg5: memref<1x128xf32, #tpu.memory_space<vmem>>, %arg6: memref<1x16x16x128xf32, #tpu.memory_space<vmem>>, %arg7: memref<18x18x128xf32, #tpu.memory_space<vmem>>, %arg8: memref<18x18x128xf32, #tpu.memory_space<vmem>>) attributes {dimension_semantics = [#tpu.dimension_semantics<parallel>], iteration_bounds = array<i64: 2>, scalar_prefetch = 0 : i64, scratch_operands = 2 : i64, tpu.core_type = #tpu.core_type<tc>, window_params = [{transform_indices = @transform_0, window_bounds = array<i64: 1, 16, 16, 128>}, {pipeline_mode = #tpu.pipeline_mode<synchronous>, transform_indices = @transform_1, window_bounds = array<i64: 3, 3, 128, 128>}, {pipeline_mode = #tpu.pipeline_mode<synchronous>, transform_indices = @transform_2, window_bounds = array<i64: 1, 128>}, {pipeline_mode = #tpu.pipeline_mode<synchronous>, transform_indices = @transform_3, window_bounds = array<i64: 3, 3, 128, 128>}, {pipeline_mode = #tpu.pipeline_mode<synchronous>, transform_indices = @transform_4, window_bounds = array<i64: 1, 128>}, {transform_indices = @transform_5, window_bounds = array<i64: 1, 16, 16, 128>}]} {
    %cst = arith.constant 0.000000e+00 : f32
    %0 = vector.broadcast %cst : f32 to vector<18x18x128xf32>
    %c0 = arith.constant 0 : index
    %c0_0 = arith.constant 0 : index
    %c0_1 = arith.constant 0 : index
    %1 = vector.load %arg7[%c0, %c0_0, %c0_1] : memref<18x18x128xf32, #tpu.memory_space<vmem>>, vector<18x18x128xf32>
    tpu.vector_store %arg7[%c0, %c0_0, %c0_1], %0 {strides = array<i32>} : memref<18x18x128xf32, #tpu.memory_space<vmem>>, vector<18x18x128xf32>,
    %cst_2 = arith.constant 0.000000e+00 : f32
    %2 = vector.broadcast %cst_2 : f32 to vector<18x18x128xf32>
    %c0_3 = arith.constant 0 : index
    %c0_4 = arith.constant 0 : index
    %c0_5 = arith.constant 0 : index
    %3 = vector.load %arg8[%c0_3, %c0_4, %c0_5] : memref<18x18x128xf32, #tpu.memory_space<vmem>>, vector<18x18x128xf32>
    tpu.vector_store %arg8[%c0_3, %c0_4, %c0_5], %2 {strides = array<i32>} : memref<18x18x128xf32, #tpu.memory_space<vmem>>, vector<18x18x128xf32>,
    %c0_6 = arith.constant 0 : index
    %c0_7 = arith.constant 0 : index
    %c0_8 = arith.constant 0 : index
    %c0_9 = arith.constant 0 : index
    %4 = vector.load %arg1[%c0_6, %c0_7, %c0_8, %c0_9] : memref<1x16x16x128xf32, #tpu.memory_space<vmem>>, vector<1x16x16x128xf32>
    %5 = vector.shape_cast %4 : vector<1x16x16x128xf32> to vector<16x16x128xf32>
    %c1 = arith.constant 1 : index
    %c1_10 = arith.constant 1 : index
    %c0_11 = arith.constant 0 : index
    %6 = vector.load %arg7[%c1, %c1_10, %c0_11] : memref<18x18x128xf32, #tpu.memory_space<vmem>>, vector<16x16x128xf32>
    tpu.vector_store %arg7[%c1, %c1_10, %c0_11], %5 {strides = array<i32>} : memref<18x18x128xf32, #tpu.memory_space<vmem>>, vector<16x16x128xf32>,
    %c0_12 = arith.constant 0 : index
    %c0_13 = arith.constant 0 : index
    %7 = vector.load %arg3[%c0_12, %c0_13] : memref<1x128xf32, #tpu.memory_space<vmem>>, vector<1x128xf32>
    %8 = vector.shape_cast %7 : vector<1x128xf32> to vector<128xf32>
    %9 = vector.shape_cast %8 : vector<128xf32> to vector<1x128xf32>
    %10 = vector.broadcast %9 : vector<1x128xf32> to vector<256x128xf32>
    %c0_14 = arith.constant 0 : index
    %c0_15 = arith.constant 0 : index
    %c0_16 = arith.constant 0 : index
    %11 = vector.load %arg7[%c0_14, %c0_15, %c0_16] : memref<18x18x128xf32, #tpu.memory_space<vmem>>, vector<16x16x128xf32>
    %12 = vector.shape_cast %11 : vector<16x16x128xf32> to vector<256x128xf32>
    %c0_17 = arith.constant 0 : index
    %c0_18 = arith.constant 0 : index
    %c0_19 = arith.constant 0 : index
    %c0_20 = arith.constant 0 : index
    %13 = vector.load %arg2[%c0_17, %c0_18, %c0_19, %c0_20] : memref<3x3x128x128xf32, #tpu.memory_space<vmem>>, vector<1x1x128x128xf32>
    %14 = vector.shape_cast %13 : vector<1x1x128x128xf32> to vector<128x128xf32>
    %cst_21 = arith.constant dense<0.000000e+00> : vector<256x128xf32>
    %15 = tpu.matmul %12, %14, %cst_21 {dimension_numbers = #tpu.dot_dimension_numbers<[1], [0], [0], [1], [0, 0, 1, 1], [], []>} : vector<256x128xf32>, vector<128x128xf32>, vector<256x128xf32> -> vector<256x128xf32>
    %16 = arith.addf %10, %15 : vector<256x128xf32>
    %c0_22 = arith.constant 0 : index
    %c1_23 = arith.constant 1 : index
    %c0_24 = arith.constant 0 : index
    %17 = vector.load %arg7[%c0_22, %c1_23, %c0_24] : memref<18x18x128xf32, #tpu.memory_space<vmem>>, vector<16x16x128xf32>
    %18 = vector.shape_cast %17 : vector<16x16x128xf32> to vector<256x128xf32>
    %c0_25 = arith.constant 0 : index
    %c1_26 = arith.constant 1 : index
    %c0_27 = arith.constant 0 : index
    %c0_28 = arith.constant 0 : index
    %19 = vector.load %arg2[%c0_25, %c1_26, %c0_27, %c0_28] : memref<3x3x128x128xf32, #tpu.memory_space<vmem>>, vector<1x1x128x128xf32>
    %20 = vector.shape_cast %19 : vector<1x1x128x128xf32> to vector<128x128xf32>
    %cst_29 = arith.constant dense<0.000000e+00> : vector<256x128xf32>
    %21 = tpu.matmul %18, %20, %cst_29 {dimension_numbers = #tpu.dot_dimension_numbers<[1], [0], [0], [1], [0, 0, 1, 1], [], []>} : vector<256x128xf32>, vector<128x128xf32>, vector<256x128xf32> -> vector<256x128xf32>
    %22 = arith.addf %16, %21 : vector<256x128xf32>
    %c0_30 = arith.constant 0 : index
    %c2 = arith.constant 2 : index
    %c0_31 = arith.constant 0 : index
    %23 = vector.load %arg7[%c0_30, %c2, %c0_31] : memref<18x18x128xf32, #tpu.memory_space<vmem>>, vector<16x16x128xf32>
    %24 = vector.shape_cast %23 : vector<16x16x128xf32> to vector<256x128xf32>
    %c0_32 = arith.constant 0 : index
    %c2_33 = arith.constant 2 : index
    %c0_34 = arith.constant 0 : index
    %c0_35 = arith.constant 0 : index
    %25 = vector.load %arg2[%c0_32, %c2_33, %c0_34, %c0_35] : memref<3x3x128x128xf32, #tpu.memory_space<vmem>>, vector<1x1x128x128xf32>
    %26 = vector.shape_cast %25 : vector<1x1x128x128xf32> to vector<128x128xf32>
    %cst_36 = arith.constant dense<0.000000e+00> : vector<256x128xf32>
    %27 = tpu.matmul %24, %26, %cst_36 {dimension_numbers = #tpu.dot_dimension_numbers<[1], [0], [0], [1], [0, 0, 1, 1], [], []>} : vector<256x128xf32>, vector<128x128xf32>, vector<256x128xf32> -> vector<256x128xf32>
    %28 = arith.addf %22, %27 : vector<256x128xf32>
    %c1_37 = arith.constant 1 : index
    %c0_38 = arith.constant 0 : index
    %c0_39 = arith.constant 0 : index
    %29 = vector.load %arg7[%c1_37, %c0_38, %c0_39] : memref<18x18x128xf32, #tpu.memory_space<vmem>>, vector<16x16x128xf32>
    %30 = vector.shape_cast %29 : vector<16x16x128xf32> to vector<256x128xf32>
    %c1_40 = arith.constant 1 : index
    %c0_41 = arith.constant 0 : index
    %c0_42 = arith.constant 0 : index
    %c0_43 = arith.constant 0 : index
    %31 = vector.load %arg2[%c1_40, %c0_41, %c0_42, %c0_43] : memref<3x3x128x128xf32, #tpu.memory_space<vmem>>, vector<1x1x128x128xf32>
    %32 = vector.shape_cast %31 : vector<1x1x128x128xf32> to vector<128x128xf32>
    %cst_44 = arith.constant dense<0.000000e+00> : vector<256x128xf32>
    %33 = tpu.matmul %30, %32, %cst_44 {dimension_numbers = #tpu.dot_dimension_numbers<[1], [0], [0], [1], [0, 0, 1, 1], [], []>} : vector<256x128xf32>, vector<128x128xf32>, vector<256x128xf32> -> vector<256x128xf32>
    %34 = arith.addf %28, %33 : vector<256x128xf32>
    %c1_45 = arith.constant 1 : index
    %c1_46 = arith.constant 1 : index
    %c0_47 = arith.constant 0 : index
    %35 = vector.load %arg7[%c1_45, %c1_46, %c0_47] : memref<18x18x128xf32, #tpu.memory_space<vmem>>, vector<16x16x128xf32>
    %36 = vector.shape_cast %35 : vector<16x16x128xf32> to vector<256x128xf32>
    %c1_48 = arith.constant 1 : index
    %c1_49 = arith.constant 1 : index
    %c0_50 = arith.constant 0 : index
    %c0_51 = arith.constant 0 : index
    %37 = vector.load %arg2[%c1_48, %c1_49, %c0_50, %c0_51] : memref<3x3x128x128xf32, #tpu.memory_space<vmem>>, vector<1x1x128x128xf32>
    %38 = vector.shape_cast %37 : vector<1x1x128x128xf32> to vector<128x128xf32>
    %cst_52 = arith.constant dense<0.000000e+00> : vector<256x128xf32>
    %39 = tpu.matmul %36, %38, %cst_52 {dimension_numbers = #tpu.dot_dimension_numbers<[1], [0], [0], [1], [0, 0, 1, 1], [], []>} : vector<256x128xf32>, vector<128x128xf32>, vector<256x128xf32> -> vector<256x128xf32>
    %40 = arith.addf %34, %39 : vector<256x128xf32>
    %c1_53 = arith.constant 1 : index
    %c2_54 = arith.constant 2 : index
    %c0_55 = arith.constant 0 : index
    %41 = vector.load %arg7[%c1_53, %c2_54, %c0_55] : memref<18x18x128xf32, #tpu.memory_space<vmem>>, vector<16x16x128xf32>
    %42 = vector.shape_cast %41 : vector<16x16x128xf32> to vector<256x128xf32>
    %c1_56 = arith.constant 1 : index
    %c2_57 = arith.constant 2 : index
    %c0_58 = arith.constant 0 : index
    %c0_59 = arith.constant 0 : index
    %43 = vector.load %arg2[%c1_56, %c2_57, %c0_58, %c0_59] : memref<3x3x128x128xf32, #tpu.memory_space<vmem>>, vector<1x1x128x128xf32>
    %44 = vector.shape_cast %43 : vector<1x1x128x128xf32> to vector<128x128xf32>
    %cst_60 = arith.constant dense<0.000000e+00> : vector<256x128xf32>
    %45 = tpu.matmul %42, %44, %cst_60 {dimension_numbers = #tpu.dot_dimension_numbers<[1], [0], [0], [1], [0, 0, 1, 1], [], []>} : vector<256x128xf32>, vector<128x128xf32>, vector<256x128xf32> -> vector<256x128xf32>
    %46 = arith.addf %40, %45 : vector<256x128xf32>
    %c2_61 = arith.constant 2 : index
    %c0_62 = arith.constant 0 : index
    %c0_63 = arith.constant 0 : index
    %47 = vector.load %arg7[%c2_61, %c0_62, %c0_63] : memref<18x18x128xf32, #tpu.memory_space<vmem>>, vector<16x16x128xf32>
    %48 = vector.shape_cast %47 : vector<16x16x128xf32> to vector<256x128xf32>
    %c2_64 = arith.constant 2 : index
    %c0_65 = arith.constant 0 : index
    %c0_66 = arith.constant 0 : index
    %c0_67 = arith.constant 0 : index
    %49 = vector.load %arg2[%c2_64, %c0_65, %c0_66, %c0_67] : memref<3x3x128x128xf32, #tpu.memory_space<vmem>>, vector<1x1x128x128xf32>
    %50 = vector.shape_cast %49 : vector<1x1x128x128xf32> to vector<128x128xf32>
    %cst_68 = arith.constant dense<0.000000e+00> : vector<256x128xf32>
    %51 = tpu.matmul %48, %50, %cst_68 {dimension_numbers = #tpu.dot_dimension_numbers<[1], [0], [0], [1], [0, 0, 1, 1], [], []>} : vector<256x128xf32>, vector<128x128xf32>, vector<256x128xf32> -> vector<256x128xf32>
    %52 = arith.addf %46, %51 : vector<256x128xf32>
    %c2_69 = arith.constant 2 : index
    %c1_70 = arith.constant 1 : index
    %c0_71 = arith.constant 0 : index
    %53 = vector.load %arg7[%c2_69, %c1_70, %c0_71] : memref<18x18x128xf32, #tpu.memory_space<vmem>>, vector<16x16x128xf32>
    %54 = vector.shape_cast %53 : vector<16x16x128xf32> to vector<256x128xf32>
    %c2_72 = arith.constant 2 : index
    %c1_73 = arith.constant 1 : index
    %c0_74 = arith.constant 0 : index
    %c0_75 = arith.constant 0 : index
    %55 = vector.load %arg2[%c2_72, %c1_73, %c0_74, %c0_75] : memref<3x3x128x128xf32, #tpu.memory_space<vmem>>, vector<1x1x128x128xf32>
    %56 = vector.shape_cast %55 : vector<1x1x128x128xf32> to vector<128x128xf32>
    %cst_76 = arith.constant dense<0.000000e+00> : vector<256x128xf32>
    %57 = tpu.matmul %54, %56, %cst_76 {dimension_numbers = #tpu.dot_dimension_numbers<[1], [0], [0], [1], [0, 0, 1, 1], [], []>} : vector<256x128xf32>, vector<128x128xf32>, vector<256x128xf32> -> vector<256x128xf32>
    %58 = arith.addf %52, %57 : vector<256x128xf32>
    %c2_77 = arith.constant 2 : index
    %c2_78 = arith.constant 2 : index
    %c0_79 = arith.constant 0 : index
    %59 = vector.load %arg7[%c2_77, %c2_78, %c0_79] : memref<18x18x128xf32, #tpu.memory_space<vmem>>, vector<16x16x128xf32>
    %60 = vector.shape_cast %59 : vector<16x16x128xf32> to vector<256x128xf32>
    %c2_80 = arith.constant 2 : index
    %c2_81 = arith.constant 2 : index
    %c0_82 = arith.constant 0 : index
    %c0_83 = arith.constant 0 : index
    %61 = vector.load %arg2[%c2_80, %c2_81, %c0_82, %c0_83] : memref<3x3x128x128xf32, #tpu.memory_space<vmem>>, vector<1x1x128x128xf32>
    %62 = vector.shape_cast %61 : vector<1x1x128x128xf32> to vector<128x128xf32>
    %cst_84 = arith.constant dense<0.000000e+00> : vector<256x128xf32>
    %63 = tpu.matmul %60, %62, %cst_84 {dimension_numbers = #tpu.dot_dimension_numbers<[1], [0], [0], [1], [0, 0, 1, 1], [], []>} : vector<256x128xf32>, vector<128x128xf32>, vector<256x128xf32> -> vector<256x128xf32>
    %64 = arith.addf %58, %63 : vector<256x128xf32>
    %cst_85 = arith.constant 2.000000e-01 : f32
    %65 = vector.broadcast %cst_85 : f32 to vector<256x128xf32>
    %66 = arith.mulf %65, %64 : vector<256x128xf32>
    %67 = arith.maximumf %64, %66 : vector<256x128xf32>
    %68 = vector.shape_cast %67 : vector<256x128xf32> to vector<16x16x128xf32>
    %c1_86 = arith.constant 1 : index
    %c1_87 = arith.constant 1 : index
    %c0_88 = arith.constant 0 : index
    %69 = vector.load %arg8[%c1_86, %c1_87, %c0_88] : memref<18x18x128xf32, #tpu.memory_space<vmem>>, vector<16x16x128xf32>
    tpu.vector_store %arg8[%c1_86, %c1_87, %c0_88], %68 {strides = array<i32>} : memref<18x18x128xf32, #tpu.memory_space<vmem>>, vector<16x16x128xf32>,
    %c0_89 = arith.constant 0 : index
    %c0_90 = arith.constant 0 : index
    %70 = vector.load %arg5[%c0_89, %c0_90] : memref<1x128xf32, #tpu.memory_space<vmem>>, vector<1x128xf32>
    %71 = vector.shape_cast %70 : vector<1x128xf32> to vector<128xf32>
    %72 = vector.shape_cast %71 : vector<128xf32> to vector<1x128xf32>
    %73 = vector.broadcast %72 : vector<1x128xf32> to vector<256x128xf32>
    %74 = vector.shape_cast %5 : vector<16x16x128xf32> to vector<256x128xf32>
    %75 = arith.addf %73, %74 : vector<256x128xf32>
    %c0_91 = arith.constant 0 : index
    %c0_92 = arith.constant 0 : index
    %c0_93 = arith.constant 0 : index
    %76 = vector.load %arg8[%c0_91, %c0_92, %c0_93] : memref<18x18x128xf32, #tpu.memory_space<vmem>>, vector<16x16x128xf32>
    %77 = vector.shape_cast %76 : vector<16x16x128xf32> to vector<256x128xf32>
    %c0_94 = arith.constant 0 : index
    %c0_95 = arith.constant 0 : index
    %c0_96 = arith.constant 0 : index
    %c0_97 = arith.constant 0 : index
    %78 = vector.load %arg4[%c0_94, %c0_95, %c0_96, %c0_97] : memref<3x3x128x128xf32, #tpu.memory_space<vmem>>, vector<1x1x128x128xf32>
    %79 = vector.shape_cast %78 : vector<1x1x128x128xf32> to vector<128x128xf32>
    %cst_98 = arith.constant dense<0.000000e+00> : vector<256x128xf32>
    %80 = tpu.matmul %77, %79, %cst_98 {dimension_numbers = #tpu.dot_dimension_numbers<[1], [0], [0], [1], [0, 0, 1, 1], [], []>} : vector<256x128xf32>, vector<128x128xf32>, vector<256x128xf32> -> vector<256x128xf32>
    %81 = arith.addf %75, %80 : vector<256x128xf32>
    %c0_99 = arith.constant 0 : index
    %c1_100 = arith.constant 1 : index
    %c0_101 = arith.constant 0 : index
    %82 = vector.load %arg8[%c0_99, %c1_100, %c0_101] : memref<18x18x128xf32, #tpu.memory_space<vmem>>, vector<16x16x128xf32>
    %83 = vector.shape_cast %82 : vector<16x16x128xf32> to vector<256x128xf32>
    %c0_102 = arith.constant 0 : index
    %c1_103 = arith.constant 1 : index
    %c0_104 = arith.constant 0 : index
    %c0_105 = arith.constant 0 : index
    %84 = vector.load %arg4[%c0_102, %c1_103, %c0_104, %c0_105] : memref<3x3x128x128xf32, #tpu.memory_space<vmem>>, vector<1x1x128x128xf32>
    %85 = vector.shape_cast %84 : vector<1x1x128x128xf32> to vector<128x128xf32>
    %cst_106 = arith.constant dense<0.000000e+00> : vector<256x128xf32>
    %86 = tpu.matmul %83, %85, %cst_106 {dimension_numbers = #tpu.dot_dimension_numbers<[1], [0], [0], [1], [0, 0, 1, 1], [], []>} : vector<256x128xf32>, vector<128x128xf32>, vector<256x128xf32> -> vector<256x128xf32>
    %87 = arith.addf %81, %86 : vector<256x128xf32>
    %c0_107 = arith.constant 0 : index
    %c2_108 = arith.constant 2 : index
    %c0_109 = arith.constant 0 : index
    %88 = vector.load %arg8[%c0_107, %c2_108, %c0_109] : memref<18x18x128xf32, #tpu.memory_space<vmem>>, vector<16x16x128xf32>
    %89 = vector.shape_cast %88 : vector<16x16x128xf32> to vector<256x128xf32>
    %c0_110 = arith.constant 0 : index
    %c2_111 = arith.constant 2 : index
    %c0_112 = arith.constant 0 : index
    %c0_113 = arith.constant 0 : index
    %90 = vector.load %arg4[%c0_110, %c2_111, %c0_112, %c0_113] : memref<3x3x128x128xf32, #tpu.memory_space<vmem>>, vector<1x1x128x128xf32>
    %91 = vector.shape_cast %90 : vector<1x1x128x128xf32> to vector<128x128xf32>
    %cst_114 = arith.constant dense<0.000000e+00> : vector<256x128xf32>
    %92 = tpu.matmul %89, %91, %cst_114 {dimension_numbers = #tpu.dot_dimension_numbers<[1], [0], [0], [1], [0, 0, 1, 1], [], []>} : vector<256x128xf32>, vector<128x128xf32>, vector<256x128xf32> -> vector<256x128xf32>
    %93 = arith.addf %87, %92 : vector<256x128xf32>
    %c1_115 = arith.constant 1 : index
    %c0_116 = arith.constant 0 : index
    %c0_117 = arith.constant 0 : index
    %94 = vector.load %arg8[%c1_115, %c0_116, %c0_117] : memref<18x18x128xf32, #tpu.memory_space<vmem>>, vector<16x16x128xf32>
    %95 = vector.shape_cast %94 : vector<16x16x128xf32> to vector<256x128xf32>
    %c1_118 = arith.constant 1 : index
    %c0_119 = arith.constant 0 : index
    %c0_120 = arith.constant 0 : index
    %c0_121 = arith.constant 0 : index
    %96 = vector.load %arg4[%c1_118, %c0_119, %c0_120, %c0_121] : memref<3x3x128x128xf32, #tpu.memory_space<vmem>>, vector<1x1x128x128xf32>
    %97 = vector.shape_cast %96 : vector<1x1x128x128xf32> to vector<128x128xf32>
    %cst_122 = arith.constant dense<0.000000e+00> : vector<256x128xf32>
    %98 = tpu.matmul %95, %97, %cst_122 {dimension_numbers = #tpu.dot_dimension_numbers<[1], [0], [0], [1], [0, 0, 1, 1], [], []>} : vector<256x128xf32>, vector<128x128xf32>, vector<256x128xf32> -> vector<256x128xf32>
    %99 = arith.addf %93, %98 : vector<256x128xf32>
    %c1_123 = arith.constant 1 : index
    %c1_124 = arith.constant 1 : index
    %c0_125 = arith.constant 0 : index
    %100 = vector.load %arg8[%c1_123, %c1_124, %c0_125] : memref<18x18x128xf32, #tpu.memory_space<vmem>>, vector<16x16x128xf32>
    %101 = vector.shape_cast %100 : vector<16x16x128xf32> to vector<256x128xf32>
    %c1_126 = arith.constant 1 : index
    %c1_127 = arith.constant 1 : index
    %c0_128 = arith.constant 0 : index
    %c0_129 = arith.constant 0 : index
    %102 = vector.load %arg4[%c1_126, %c1_127, %c0_128, %c0_129] : memref<3x3x128x128xf32, #tpu.memory_space<vmem>>, vector<1x1x128x128xf32>
    %103 = vector.shape_cast %102 : vector<1x1x128x128xf32> to vector<128x128xf32>
    %cst_130 = arith.constant dense<0.000000e+00> : vector<256x128xf32>
    %104 = tpu.matmul %101, %103, %cst_130 {dimension_numbers = #tpu.dot_dimension_numbers<[1], [0], [0], [1], [0, 0, 1, 1], [], []>} : vector<256x128xf32>, vector<128x128xf32>, vector<256x128xf32> -> vector<256x128xf32>
    %105 = arith.addf %99, %104 : vector<256x128xf32>
    %c1_131 = arith.constant 1 : index
    %c2_132 = arith.constant 2 : index
    %c0_133 = arith.constant 0 : index
    %106 = vector.load %arg8[%c1_131, %c2_132, %c0_133] : memref<18x18x128xf32, #tpu.memory_space<vmem>>, vector<16x16x128xf32>
    %107 = vector.shape_cast %106 : vector<16x16x128xf32> to vector<256x128xf32>
    %c1_134 = arith.constant 1 : index
    %c2_135 = arith.constant 2 : index
    %c0_136 = arith.constant 0 : index
    %c0_137 = arith.constant 0 : index
    %108 = vector.load %arg4[%c1_134, %c2_135, %c0_136, %c0_137] : memref<3x3x128x128xf32, #tpu.memory_space<vmem>>, vector<1x1x128x128xf32>
    %109 = vector.shape_cast %108 : vector<1x1x128x128xf32> to vector<128x128xf32>
    %cst_138 = arith.constant dense<0.000000e+00> : vector<256x128xf32>
    %110 = tpu.matmul %107, %109, %cst_138 {dimension_numbers = #tpu.dot_dimension_numbers<[1], [0], [0], [1], [0, 0, 1, 1], [], []>} : vector<256x128xf32>, vector<128x128xf32>, vector<256x128xf32> -> vector<256x128xf32>
    %111 = arith.addf %105, %110 : vector<256x128xf32>
    %c2_139 = arith.constant 2 : index
    %c0_140 = arith.constant 0 : index
    %c0_141 = arith.constant 0 : index
    %112 = vector.load %arg8[%c2_139, %c0_140, %c0_141] : memref<18x18x128xf32, #tpu.memory_space<vmem>>, vector<16x16x128xf32>
    %113 = vector.shape_cast %112 : vector<16x16x128xf32> to vector<256x128xf32>
    %c2_142 = arith.constant 2 : index
    %c0_143 = arith.constant 0 : index
    %c0_144 = arith.constant 0 : index
    %c0_145 = arith.constant 0 : index
    %114 = vector.load %arg4[%c2_142, %c0_143, %c0_144, %c0_145] : memref<3x3x128x128xf32, #tpu.memory_space<vmem>>, vector<1x1x128x128xf32>
    %115 = vector.shape_cast %114 : vector<1x1x128x128xf32> to vector<128x128xf32>
    %cst_146 = arith.constant dense<0.000000e+00> : vector<256x128xf32>
    %116 = tpu.matmul %113, %115, %cst_146 {dimension_numbers = #tpu.dot_dimension_numbers<[1], [0], [0], [1], [0, 0, 1, 1], [], []>} : vector<256x128xf32>, vector<128x128xf32>, vector<256x128xf32> -> vector<256x128xf32>
    %117 = arith.addf %111, %116 : vector<256x128xf32>
    %c2_147 = arith.constant 2 : index
    %c1_148 = arith.constant 1 : index
    %c0_149 = arith.constant 0 : index
    %118 = vector.load %arg8[%c2_147, %c1_148, %c0_149] : memref<18x18x128xf32, #tpu.memory_space<vmem>>, vector<16x16x128xf32>
    %119 = vector.shape_cast %118 : vector<16x16x128xf32> to vector<256x128xf32>
    %c2_150 = arith.constant 2 : index
    %c1_151 = arith.constant 1 : index
    %c0_152 = arith.constant 0 : index
    %c0_153 = arith.constant 0 : index
    %120 = vector.load %arg4[%c2_150, %c1_151, %c0_152, %c0_153] : memref<3x3x128x128xf32, #tpu.memory_space<vmem>>, vector<1x1x128x128xf32>
    %121 = vector.shape_cast %120 : vector<1x1x128x128xf32> to vector<128x128xf32>
    %cst_154 = arith.constant dense<0.000000e+00> : vector<256x128xf32>
    %122 = tpu.matmul %119, %121, %cst_154 {dimension_numbers = #tpu.dot_dimension_numbers<[1], [0], [0], [1], [0, 0, 1, 1], [], []>} : vector<256x128xf32>, vector<128x128xf32>, vector<256x128xf32> -> vector<256x128xf32>
    %123 = arith.addf %117, %122 : vector<256x128xf32>
    %c2_155 = arith.constant 2 : index
    %c2_156 = arith.constant 2 : index
    %c0_157 = arith.constant 0 : index
    %124 = vector.load %arg8[%c2_155, %c2_156, %c0_157] : memref<18x18x128xf32, #tpu.memory_space<vmem>>, vector<16x16x128xf32>
    %125 = vector.shape_cast %124 : vector<16x16x128xf32> to vector<256x128xf32>
    %c2_158 = arith.constant 2 : index
    %c2_159 = arith.constant 2 : index
    %c0_160 = arith.constant 0 : index
    %c0_161 = arith.constant 0 : index
    %126 = vector.load %arg4[%c2_158, %c2_159, %c0_160, %c0_161] : memref<3x3x128x128xf32, #tpu.memory_space<vmem>>, vector<1x1x128x128xf32>
    %127 = vector.shape_cast %126 : vector<1x1x128x128xf32> to vector<128x128xf32>
    %cst_162 = arith.constant dense<0.000000e+00> : vector<256x128xf32>
    %128 = tpu.matmul %125, %127, %cst_162 {dimension_numbers = #tpu.dot_dimension_numbers<[1], [0], [0], [1], [0, 0, 1, 1], [], []>} : vector<256x128xf32>, vector<128x128xf32>, vector<256x128xf32> -> vector<256x128xf32>
    %129 = arith.addf %123, %128 : vector<256x128xf32>
    %130 = vector.shape_cast %129 : vector<256x128xf32> to vector<16x16x128xf32>
    %c0_163 = arith.constant 0 : index
    %c0_164 = arith.constant 0 : index
    %c0_165 = arith.constant 0 : index
    %c0_166 = arith.constant 0 : index
    %131 = vector.load %arg6[%c0_163, %c0_164, %c0_165, %c0_166] : memref<1x16x16x128xf32, #tpu.memory_space<vmem>>, vector<1x16x16x128xf32>
    %132 = vector.shape_cast %131 : vector<1x16x16x128xf32> to vector<16x16x128xf32>
    %133 = vector.shape_cast %130 : vector<16x16x128xf32> to vector<1x16x16x128xf32>
    tpu.vector_store %arg6[%c0_163, %c0_164, %c0_165, %c0_166], %133 {strides = array<i32>} : memref<1x16x16x128xf32, #tpu.memory_space<vmem>>, vector<1x16x16x128xf32>,
    return
  }
  func.func @transform_0(%arg0: i32) -> (i32, i32, i32, i32) {
    %c0_i32 = arith.constant 0 : i32
    %c0_i32_0 = arith.constant 0 : i32
    %c0_i32_1 = arith.constant 0 : i32
    %c0_i32_2 = arith.constant 0 : i32
    return %arg0, %c0_i32, %c0_i32_0, %c0_i32_1 : i32, i32, i32, i32
  }
  func.func @transform_1(%arg0: i32) -> (i32, i32, i32, i32) {
    %c0_i32 = arith.constant 0 : i32
    %c0_i32_0 = arith.constant 0 : i32
    %c0_i32_1 = arith.constant 0 : i32
    %c0_i32_2 = arith.constant 0 : i32
    %c0_i32_3 = arith.constant 0 : i32
    return %c0_i32, %c0_i32_0, %c0_i32_1, %c0_i32_2 : i32, i32, i32, i32
  }
  func.func @transform_2(%arg0: i32) -> (i32, i32) {
    %c0_i32 = arith.constant 0 : i32
    %c0_i32_0 = arith.constant 0 : i32
    %c0_i32_1 = arith.constant 0 : i32
    return %c0_i32, %c0_i32_0 : i32, i32
  }
  func.func @transform_3(%arg0: i32) -> (i32, i32, i32, i32) {
    %c0_i32 = arith.constant 0 : i32
    %c0_i32_0 = arith.constant 0 : i32
    %c0_i32_1 = arith.constant 0 : i32
    %c0_i32_2 = arith.constant 0 : i32
    %c0_i32_3 = arith.constant 0 : i32
    return %c0_i32, %c0_i32_0, %c0_i32_1, %c0_i32_2 : i32, i32, i32, i32
  }
  func.func @transform_4(%arg0: i32) -> (i32, i32) {
    %c0_i32 = arith.constant 0 : i32
    %c0_i32_0 = arith.constant 0 : i32
    %c0_i32_1 = arith.constant 0 : i32
    return %c0_i32, %c0_i32_0 : i32, i32
  }
  func.func @transform_5(%arg0: i32) -> (i32, i32, i32, i32) {
    %c0_i32 = arith.constant 0 : i32
    %c0_i32_0 = arith.constant 0 : i32
    %c0_i32_1 = arith.constant 0 : i32
    %c0_i32_2 = arith.constant 0 : i32
    return %arg0, %c0_i32, %c0_i32_0, %c0_i32_1 : i32, i32, i32, i32
  }
}

</mosaic_0001>

<bundles_post_ra>
// kernel: tpu_custom_call.1
= control target key start
LH: loop header
LB: loop body
LE: loop exit
PB: predicated region body
PF: predicated region fallthrough
CT: control target
= control target key end

     0   :  { %10 = vsyncpa [#allocation5], 0  ;;  %s11395_s0 = inlined_call_operand.hbm [shape: f32[2,16,16,128], index: 0, kind: input, shape index: {}]   ;;  %s11396_s1 = inlined_call_operand.hbm [shape: f32[3,3,128,128], index: 1, kind: input, shape index: {}]   ;;  %s11397_s2 = inlined_call_operand.vmem [shape: f32[1,128], index: 2, kind: input, shape index: {}]   ;;  %s11398_s3 = inlined_call_operand.hbm [shape: f32[3,3,128,128], index: 3, kind: input, shape index: {}]   ;;  %s11399_s4 = inlined_call_operand.vmem [shape: f32[1,128], index: 4, kind: input, shape index: {}]   ;;  %s11400_s5 = inlined_call_operand.hbm [shape: f32[2,16,16,128], index: 5, kind: output, shape index: {}]  }
   0x1   :  { %12 = vsyncpa [#allocation5 + $0x1], 0 }
   0x2   :  { %13 = vsyncpa [#allocation8], 0 }
   0x3   :  { %14 = vsyncpa [#allocation6], 0 }
   0x4   :  { %16 = vsyncpa [#allocation6 + $0x1], 0  ;;  %s10017_s18 = smov 0   ;;  %s10019_s19 = smov 0  }
   0x5   :  { %s10021_s20 = smov 0   ;;  %s10023_s21 = smov 0  }
   0x6 LB: > { %s10038_s22 = sadd.s32 4294967295, %s9976_s21   ;;  %s6234_s23 = sadd.s32 4294967294, %s9976_s21   ;;  %s9976_s21 = sphi %s10023_s21, %s11600_s21   ;;  %s9972_s20 = sphi %s10021_s20, %s11599_s20   ;;  %s9968_s19 = sphi %s10019_s19, %s11598_s19   ;;  %s9964_s18 = sphi %s10017_s18, %s11597_s18  }
   0x7   : > { %p42_p0 = scmp.ne.s32.totalorder %s9968_s19, %s9964_s18  ;;  %p11401_p1 = scmp.eq.s32.totalorder %s10038_s22, 0 }
   0x8   : > { %p156_p3 = scmp.eq.s32.totalorder %s6234_s23, 1  ;;  %p6235_p5 = scmp.ge.s32.totalorder %s9976_s21, 1 }
   0x9   : > { %p10047_p4 = por %p11401_p1, %p42_p0  ;;  %p163_p7 = scmp.lt.s32.totalorder %s9976_s21, 3 }
   0xa   : > { %p10052_p6 = por %p156_p3, %p42_p0  ;;  %s9978_s27 = smov [#allocation7]  }
   0xb   : > { %s11464_s24 = scalar_select %p10047_p4, 1, 0 }
   0xc   : > { %s11465_s25 = scalar_select %p10052_p6, 1, 0 }
   0xd   : > { %p10057_p8 = pnand %p6235_p5, %p163_p7  ;;  %s175_s28 = sshll.u32 %s9978_s27, 4  ;;  %s10061_s28 = int_to_ptr.vmem [resolvable:$true] %s175_s28 }
   0xe   : > { %s9979_s30 = smov [#allocation9]   ;;  %s9820_s9 = scalar_lea.hbm %s11396_s1, 18432 }
   0xf   : > { %p9724_p9 = pneg %p10057_p8  ;;  %s191_s6 = sshll.u32 %s9979_s30, 4  ;;  %s10072_s6 = int_to_ptr.vmem [resolvable:$true] %s191_s6 }
  0x10   : > { %p9821_p12 = scmp.ne.s32.totalorder %s11396_s1, %s9820_s9  ;;  %p9827_p5 = scmp.lt.u32.totalorder %s9820_s9, %s11396_s1 }
  0x11   : > { %p10068_p11 = pnand %p9724_p9, %p11401_p1 }
  0x13   : > { %p9822_p13 = pneg %p10068_p11 }
  0x15   : > { %p9823_p0 = pnand %p9822_p13, %p9821_p12 }
  0x17   : > { %p9824_p3 = pneg %p9823_p0 }
  0x19   : > { %p9829_p7 = pnand %p9827_p5, %p9824_p3 }
  0x1b   : > { %9832 = shalt.err (!%p9829_p7)
}
  0x1c   : > { %s9833_s14 = scalar_lea.vmem %s10061_s28, 18432  ;;  %p9841_p2 = scmp.lt.s32.totalorder %s10061_s28, %s10061_s28 }
  0x1d   : > { %p9834_p9 = scmp.ne.s32.totalorder %s10061_s28, %s9833_s14  ;;  %p9842_p12 = scmp.lt.s32.totalorder %s9833_s14, %s9833_s14 }
  0x1f   : > { %p9836_p10 = pnand %p9834_p9, %p9822_p13  ;;  %p9843_p0 = por %p9842_p12, %p9841_p2 }
  0x21   : > { %p9837_p1 = pneg %p9836_p10 }
  0x23   : > { %p9844_p6 = pnand %p9843_p0, %p9837_p1 }
  0x25   : > { %9847 = shalt.err (!%p9844_p6)
}
  0x26   : > { %s9980_s15 = smov 128   ;;  %s9981_s16 = smov 8  }
  0x27   : > { %9727 = dma.hbm_to_vmem [thread:$0]  (!%p10068_p11), %s11396_s1, 18432, %s10061_s28, [#allocation8], %s9980_s15, %s9980_s15, %s9981_s16  }
  0x28   : > { %s9848_s7 = scalar_lea.hbm %s11398_s3, 18432 }
  0x29   : > { %p9849_p1 = scmp.ne.s32.totalorder %s11398_s3, %s9848_s7  ;;  %p9855_p10 = scmp.lt.u32.totalorder %s9848_s7, %s11398_s3 }
  0x2b   : > { %p9851_p2 = pnand %p9849_p1, %p9822_p13 }
  0x2d   : > { %p9852_p6 = pneg %p9851_p2 }
  0x2f   : > { %p9857_p3 = pnand %p9855_p10, %p9852_p6 }
  0x31   : > { %9860 = shalt.err (!%p9857_p3)
}
  0x32   : > { %s9861_s28 = scalar_lea.vmem %s10072_s6, 18432  ;;  %p9869_p12 = scmp.lt.s32.totalorder %s10072_s6, %s10072_s6 }
  0x33   : > { %p9862_p5 = scmp.ne.s32.totalorder %s10072_s6, %s9861_s28  ;;  %p9870_p0 = scmp.lt.s32.totalorder %s9861_s28, %s9861_s28 }
  0x35   : > { %p9864_p7 = pnand %p9862_p5, %p9822_p13  ;;  %p9871_p1 = por %p9870_p0, %p9869_p12 }
  0x37   : > { %p9865_p9 = pneg %p9864_p7 }
  0x39   : > { %p9872_p2 = pnand %p9871_p1, %p9865_p9 }
  0x3b   : > { %9875 = shalt.err (!%p9872_p2)
}
  0x3c   : > { %9730 = dma.hbm_to_vmem [thread:$0]  (!%p10068_p11), %s11398_s3, 18432, %s10072_s6, [#allocation8], %s9980_s15, %s9980_s15, %s9981_s16  }
  0x3d   : > { %s10133_s29 = sadd.s32 1, %s9976_s21   ;;  %s29_s14 = sadd.s32 1, %s9972_s20 }
  0x3e   : > { %s26_s17 = ssub.s32 %s9976_s21, %s10133_s29  ;;  %p36_p13 = scmp.ne.s32.totalorder %s9972_s20, %s9968_s19 }
  0x3f   : > { %p27_p6 = scmp.eq.s32.totalorder %s26_s17, 0  ;;  %p37_p10 = scmp.eq.s32.totalorder %s9976_s21, 0 }
  0x40   : > { %p11468_p3 = scmp.eq.s32.totalorder %s10038_s22, 1  ;;  %p9741_p7 = scmp.lt.s32.totalorder %s9976_s21, 2 }
  0x41   : > { %s10149_s27 = scalar_select %p27_p6, %s9972_s20, %s29_s14  }
  0x42   : > { %p10143_p5 = por %p11468_p3, %p36_p13  ;;  %p38_p9 = por %p37_p10, %p36_p13 }
  0x43   : > { %s208_s30 = sand.u32 1, %s9972_s20   ;;  %s6254_s6 = sshll.u32 %s9976_s21, 12 }
  0x44   : > { %s11469_s23 = scalar_select %p10143_p5, 1, 0 }
  0x45   : > { %s6239_s7 = sshll.u32 %s208_s30, 8  ;;  %s10156_s10 = scalar_lea.hbm %s11395_s0, %s6254_s6 }
  0x46   : > { %s212_s11 = scalar_lea.vmem [#allocation4], %s6239_s7  ;;  %p10160_p11 = pnand %p9741_p7, %p38_p9 }
  0x47   : > { %s219_s28 = sshll.u32 %s212_s11, 4  ;;  %s10164_s13 = scalar_lea.sflag [#allocation5], %s208_s30  ;;  %s10158_s28 = int_to_ptr.vmem [resolvable:$true] %s219_s28 }
  0x48   : > { %s9876_s14 = scalar_lea.hbm %s10156_s10, 4096  ;;  %p9878_p0 = pneg %p10160_p11 }
  0x49   : > { %p9877_p12 = scmp.ne.s32.totalorder %s10156_s10, %s9876_s14  ;;  %s9881_s6 = scalar_lea.hbm %s11395_s0, 8192 }
  0x4a   : > { %p9882_p13 = scmp.lt.u32.totalorder %s10156_s10, %s11395_s0  ;;  %p9883_p6 = scmp.lt.u32.totalorder %s9881_s6, %s9876_s14 }
  0x4b   : > { %p9879_p1 = pnand %p9878_p0, %p9877_p12  ;;  %p9885_p3 = scmp.lt.u32.totalorder %s9876_s14, %s10156_s10 }
  0x4c   : > { %p9884_p10 = por %p9883_p6, %p9882_p13 }
  0x4d   : > { %p9880_p2 = pneg %p9879_p1 }
  0x4e   : > { %p9886_p7 = por %p9885_p3, %p9884_p10 }
  0x50   : > { %p9887_p9 = pnand %p9886_p7, %p9880_p2 }
  0x52   : > { %9890 = shalt.err (!%p9887_p9)
}
  0x53   : > { %s9891_s30 = scalar_lea.vmem %s10158_s28, 4096  ;;  %s9982_s11 = smov [#allocation4]  }
  0x54   : > { %p9892_p12 = scmp.ne.s32.totalorder %s10158_s28, %s9891_s30  ;;  %s9896_s17 = sshll.u32 %s9982_s11, 4  ;;  %s9897_s17 = int_to_ptr.vmem [resolvable:$false] %s9896_s17 }
  0x55   : > { %s9898_s7 = scalar_lea.vmem %s9897_s17, 8192  ;;  %p9899_p4 = scmp.lt.s32.totalorder %s10158_s28, %s9897_s17 }
  0x56   : > { %p9894_p1 = pnand %p9892_p12, %p9878_p0  ;;  %p9900_p13 = scmp.lt.s32.totalorder %s9898_s7, %s9891_s30 }
  0x58   : > { %p9895_p5 = pneg %p9894_p1  ;;  %p9901_p6 = por %p9900_p13, %p9899_p4 }
  0x5a   : > { %p9902_p10 = pnand %p9901_p6, %p9895_p5 }
  0x5c   : > { %9905 = shalt.err (!%p9902_p10)
}
  0x5d   : > { %9734 = dma.hbm_to_vmem [thread:$0]  (!%p10160_p11), %s10156_s10, 4096, %s10158_s28, %s10164_s13, %s9980_s15, %s9980_s15, %s9981_s16  }
  0x5e   : > { %231 = sbr.rel (%p10057_p8) target bundleno = 1707 (0x6ab), region = 40 }
  0x65   : > { %s10198_s14 = sand.u32 1, %s9968_s19   ;;  %p11471_p4 = scmp.ne.s32.totalorder %s11464_s24, 0 }
  0x66   : > { %s6243_s6 = sshll.u32 %s10198_s14, 8  ;;  %s234_s8 = scalar_lea.sflag [#allocation5], %s10198_s14 }
  0x67   : > { %s10204_s12 = scalar_lea.vmem [#allocation4], %s6243_s6 }
  0x68   : > { %9951 = dma.done.wait (%p11471_p4), %s234_s8, 4096  }
  0x69   : > { %9953 = vsyncadd (%p11471_p4), %s234_s8, 4294963200  ;;  %p11472_p5 = scmp.eq.s32.totalorder %s10038_s22, 0 }
  0x6b   : > { %9955 = dma.done.wait (%p11472_p5), [#allocation8], 36864   ;;  %p11473_p8 = pmov %p11472_p5 }
  0x6c   : > { %v9983_v0 = vmov 0.0   ;;  %v484_v1 = vld [vmem:[#allocation7] sm:$0xff]  ;;  %v485_v2 = vld [vmem:[#allocation7 + $0x8] sm:$0xff]  ;;  %v486_v3 = vld [vmem:[#allocation7 + $0x10] sm:$0xff]  ;;  %s11282_s10 = scalar_lea.vmem [#allocation10], %s6243_s6  ;;  %s6255_s28 = sshll.u32 %s10038_s22, 12 }
  0x6d   : > { %9957 = vsyncadd (%p11473_p8), [#allocation8], 4294930432  ;;  %272 = vst [vmem:[#allocation2] sm:$0xff] %v9983_v0  ;;  %7152 = vmatprep.mubr.f32.mxu0 %v9983_v0  ;;  %7872 = vmatprep.mubr.f32.mxu1 %v9983_v0  ;;  %v8560_v4 = vpack.c.bf16 %v485_v2, %v484_v1  ;;  %v487_v5 = vld [vmem:[#allocation7 + $0x18] sm:$0xff]  ;;  %v488_v7 = vld [vmem:[#allocation7 + $0x20] sm:$0xff]  ;;  %s6142_s13 = sshll.u32 %s11282_s10, 4  ;;  %s11347_s11 = scalar_lea.hbm %s11400_s5, %s6255_s28  ;;  %s11349_s13 = int_to_ptr.vmem [resolvable:$true] %s6142_s13 }
  0x6e   : > { %273 = vst [vmem:[#allocation2 + $0x8] sm:$0xff] %v9983_v0  ;;  %274 = vst [vmem:[#allocation2 + $0x10] sm:$0x3] %v9983_v0  ;;  %v8564_v6 = vpack.c.bf16 %v487_v5, %v486_v3  ;;  %v489_v8 = vld [vmem:[#allocation7 + $0x28] sm:$0xff]  ;;  %v490_v10 = vld [vmem:[#allocation7 + $0x30] sm:$0xff]  ;;  %s6129_s22 = scalar_lea.sflag [#allocation6], %s10198_s14 }
  0x6f   : > { %275 = vst [vmem:[#allocation2 + $0x18] sm:$0xff] %v9983_v0  ;;  %276 = vst [vmem:[#allocation2 + $0x20] sm:$0xff] %v9983_v0  ;;  %8561 = vmatprep.subr.bf16.mxu0 %v8560_v4  ;;  %v8568_v9 = vpack.c.bf16 %v489_v8, %v488_v7  ;;  %v491_v11 = vld [vmem:[#allocation7 + $0x38] sm:$0xff]  ;;  %v10325_v12 = vld [vmem:[%s10204_s12] sm:$0xff]  ;;  %s9906_s17 = scalar_lea.vmem %s11349_s13, 4096  ;;  %p11594_p0 = scmp.ne.s32.totalorder %s11469_s23, 0 }
  0x70   : > { %277 = vst [vmem:[#allocation2 + $0x28] sm:$0x3] %v9983_v0  ;;  %278 = vst [vmem:[#allocation2 + $0x30] sm:$0xff] %v9983_v0  ;;  %8563 = vmatpush3.bf16.msra.mxu0 %v8560_v4  ;;  %v10328_v13 = vld [vmem:[%s10204_s12 + $0x8] sm:$0xff]  ;;  %v10331_v14 = vld [vmem:[%s10204_s12 + $0x10] sm:$0xff]  ;;  %v8572_v19 = vpack.c.bf16 %v491_v11, %v490_v10  ;;  %p9907_p11 = scmp.ne.s32.totalorder %s11349_s13, %s9906_s17  ;;  %s9984_s7 = smov [#allocation10]  }
  0x71   : > { %279 = vst [vmem:[#allocation2 + $0x38] sm:$0xff] %v9983_v0  ;;  %280 = vst [vmem:[#allocation2 + $0x40] sm:$0x3] %v9983_v0  ;;  %8565 = vmatprep.subr.bf16.mxu0 %v8564_v6  ;;  %v10337_v15 = vld [vmem:[%s10204_s12 + $0x18] sm:$0xff]  ;;  %v10341_v16 = vld [vmem:[%s10204_s12 + $0x20] sm:$0xff]  ;;  %s9910_s6 = sshll.u32 %s9984_s7, 4  ;;  %s9911_s6 = int_to_ptr.vmem [resolvable:$false] %s9910_s6 }
  0x72   : > { %281 = vst [vmem:[#allocation2 + $0x48] sm:$0xff] %v9983_v0  ;;  %282 = vst [vmem:[#allocation2 + $0x50] sm:$0xff] %v9983_v0  ;;  %v10344_v17 = vld [vmem:[%s10204_s12 + $0x28] sm:$0xff]  ;;  %v10347_v18 = vld [vmem:[%s10204_s12 + $0x30] sm:$0xff]  ;;  %p9908_p2 = pnand %p9907_p11, %p11594_p0  ;;  %s9912_s8 = scalar_lea.vmem %s9911_s6, 8192 }
  0x73   : > { %283 = vst [vmem:[#allocation2 + $0x58] sm:$0x3] %v9983_v0  ;;  %284 = vst [vmem:[#allocation2 + $0x60] sm:$0xff] %v9983_v0  ;;  %v492_v20 = vld [vmem:[#allocation7 + $0x40] sm:$0xff]  ;;  %v493_v21 = vld [vmem:[#allocation7 + $0x48] sm:$0xff]  ;;  %p9913_p7 = scmp.lt.s32.totalorder %s11349_s13, %s9911_s6  ;;  %p9914_p9 = scmp.lt.s32.totalorder %s9912_s8, %s9906_s17 }
  0x74   : > { %285 = vst [vmem:[#allocation2 + $0x68] sm:$0xff] %v9983_v0  ;;  %286 = vst [vmem:[#allocation2 + $0x70] sm:$0x3] %v9983_v0  ;;  %8567 = vmatpush3.bf16.msra.mxu0 %v8564_v6  ;;  %v10353_v22 = vld [vmem:[%s10204_s12 + $0x38] sm:$0xff]  ;;  %v10357_v23 = vld [vmem:[%s10204_s12 + $0x40] sm:$0xff]  ;;  %v8576_v30 = vpack.c.bf16 %v493_v21, %v492_v20  ;;  %p9909_p3 = pneg %p9908_p2 }
  0x75   : > { %287 = vst [vmem:[#allocation2 + $0x78] sm:$0xff] %v9983_v0  ;;  %288 = vst [vmem:[#allocation2 + $0x80] sm:$0xff] %v9983_v0  ;;  %8569 = vmatprep.subr.bf16.mxu0 %v8568_v9  ;;  %v10360_v24 = vld [vmem:[%s10204_s12 + $0x48] sm:$0xff]  ;;  %v10363_v25 = vld [vmem:[%s10204_s12 + $0x50] sm:$0xff]  ;;  %p9915_p12 = por %p9914_p9, %p9913_p7 }
  0x76   : > { %289 = vst [vmem:[#allocation2 + $0x88] sm:$0x3] %v9983_v0  ;;  %290 = vst [vmem:[#allocation2 + $0x90] sm:$0xff] %v9983_v0  ;;  %v10369_v26 = vld [vmem:[%s10204_s12 + $0x58] sm:$0xff]  ;;  %v10373_v27 = vld [vmem:[%s10204_s12 + $0x60] sm:$0xff] }
  0x77   : > { %291 = vst [vmem:[#allocation2 + $0x98] sm:$0xff] %v9983_v0  ;;  %292 = vst [vmem:[#allocation2 + $0xa0] sm:$0x3] %v9983_v0  ;;  %v10376_v28 = vld [vmem:[%s10204_s12 + $0x68] sm:$0xff]  ;;  %v10379_v29 = vld [vmem:[%s10204_s12 + $0x70] sm:$0xff]  ;;  %p9916_p1 = pnand %p9915_p12, %p9909_p3 }
  0x78   : > { %293 = vst [vmem:[#allocation2 + $0xa8] sm:$0xff] %v9983_v0  ;;  %294 = vst [vmem:[#allocation2 + $0xb0] sm:$0xff] %v9983_v0  ;;  %8571 = vmatpush3.bf16.msra.mxu0 %v8568_v9  ;;  %v10385_v31 = vld [vmem:[%s10204_s12 + $0x78] sm:$0xff]  ;;  %v494_v32 = vld [vmem:[#allocation7 + $0x50] sm:$0xff] }
  0x79   : > { %295 = vst [vmem:[#allocation2 + $0xb8] sm:$0x3] %v9983_v0  ;;  %296 = vst [vmem:[#allocation2 + $0xc0] sm:$0xff] %v9983_v0  ;;  %8573 = vmatprep.subr.bf16.mxu0 %v8572_v19  ;;  %v495_v33 = vld [vmem:[#allocation7 + $0x58] sm:$0xff]  ;;  %v10389_v34 = vld [vmem:[%s10204_s12 + $0x80] sm:$0xff] }
  0x7a   : > { %297 = vst [vmem:[#allocation2 + $0xc8] sm:$0xff] %v9983_v0  ;;  %298 = vst [vmem:[#allocation2 + $0xd0] sm:$0x3] %v9983_v0  ;;  %v10392_v35 = vld [vmem:[%s10204_s12 + $0x88] sm:$0xff]  ;;  %v8580_v36 = vpack.c.bf16 %v495_v33, %v494_v32  ;;  %v10397_v37 = vld [vmem:[%s10204_s12 + $0x90] sm:$0xff] }
  0x7b   : > { %299 = vst [vmem:[#allocation2 + $0xd8] sm:$0xff] %v9983_v0  ;;  %300 = vst [vmem:[#allocation2 + $0xe0] sm:$0xff] %v9983_v0  ;;  %v10400_v38 = vld [vmem:[%s10204_s12 + $0x98] sm:$0xff]  ;;  %v496_v39 = vld [vmem:[#allocation7 + $0x60] sm:$0xff] }
  0x7c   : > { %301 = vst [vmem:[#allocation2 + $0xe8] sm:$0x3] %v9983_v0  ;;  %302 = vst [vmem:[#allocation2 + $0xf0] sm:$0xff] %v9983_v0  ;;  %8575 = vmatpush3.bf16.msra.mxu0 %v8572_v19  ;;  %v497_v40 = vld [vmem:[#allocation7 + $0x68] sm:$0xff]  ;;  %v498_v42 = vld [vmem:[#allocation7 + $0x70] sm:$0xff] }
  0x7d   : > { %303 = vst [vmem:[#allocation2 + $0xf8] sm:$0xff] %v9983_v0  ;;  %304 = vst [vmem:[#allocation2 + $0x100] sm:$0x3] %v9983_v0  ;;  %8577 = vmatprep.subr.bf16.mxu0 %v8576_v30  ;;  %v8584_v41 = vpack.c.bf16 %v497_v40, %v496_v39  ;;  %v10405_v43 = vld [vmem:[%s10204_s12 + $0xa0] sm:$0xff]  ;;  %v10408_v44 = vld [vmem:[%s10204_s12 + $0xa8] sm:$0xff] }
  0x7e   : > { %305 = vst [vmem:[#allocation2 + $0x108] sm:$0xff] %v9983_v0  ;;  %306 = vst [vmem:[#allocation2 + $0x110] sm:$0xff] %v9983_v0  ;;  %v499_v45 = vld [vmem:[#allocation7 + $0x78] sm:$0xff]  ;;  %v10413_v46 = vld [vmem:[%s10204_s12 + $0xb0] sm:$0xff] }
  0x7f   : > { %307 = vst [vmem:[#allocation2 + $0x118] sm:$0x3] %v9983_v0  ;;  %308 = vst [vmem:[#allocation2 + $0x120] sm:$0xff] %v9983_v0  ;;  %v10416_v47 = vld [vmem:[%s10204_s12 + $0xb8] sm:$0xff]  ;;  %v10421_v48 = vld [vmem:[%s10204_s12 + $0xc0] sm:$0xff]  ;;  %v8588_v51 = vpack.c.bf16 %v499_v45, %v498_v42 }
  0x80   : > { %309 = vst [vmem:[#allocation2 + $0x128] sm:$0xff] %v9983_v0  ;;  %310 = vst [vmem:[#allocation2 + $0x130] sm:$0x3] %v9983_v0  ;;  %8579 = vmatpush3.bf16.msra.mxu0 %v8576_v30  ;;  %v10424_v49 = vld [vmem:[%s10204_s12 + $0xc8] sm:$0xff]  ;;  %v10427_v50 = vld [vmem:[%s10204_s12 + $0xd0] sm:$0xff] }
  0x81   : > { %311 = vst [vmem:[#allocation2 + $0x138] sm:$0xff] %v9983_v0  ;;  %312 = vst [vmem:[#allocation2 + $0x140] sm:$0xff] %v9983_v0  ;;  %8581 = vmatprep.subr.bf16.mxu0 %v8580_v36  ;;  %v10433_v52 = vld [vmem:[%s10204_s12 + $0xd8] sm:$0xff]  ;;  %v790_v53 = vld [vmem:[#allocation7 + $0x80] sm:$0xff] }
  0x82   : > { %313 = vst [vmem:[#allocation2 + $0x148] sm:$0x3] %v9983_v0  ;;  %314 = vst [vmem:[#allocation2 + $0x150] sm:$0xff] %v9983_v0  ;;  %v791_v54 = vld [vmem:[#allocation7 + $0x88] sm:$0xff]  ;;  %v10437_v55 = vld [vmem:[%s10204_s12 + $0xe0] sm:$0xff] }
  0x83   : > { %315 = vst [vmem:[#allocation2 + $0x158] sm:$0xff] %v9983_v0  ;;  %316 = vst [vmem:[#allocation2 + $0x160] sm:$0x3] %v9983_v0  ;;  %v10441_v56 = vld [vmem:[%s10204_s12 + $0xe8] sm:$0xff]  ;;  %v8592_v57 = vpack.c.bf16 %v791_v54, %v790_v53  ;;  %v792_v58 = vld [vmem:[#allocation7 + $0x90] sm:$0xff] }
  0x84   : > { %317 = vst [vmem:[#allocation2 + $0x168] sm:$0xff] %v9983_v0  ;;  %318 = vst [vmem:[#allocation2 + $0x170] sm:$0xff] %v9983_v0  ;;  %8583 = vmatpush3.bf16.msra.mxu0 %v8580_v36  ;;  %v793_v59 = vld [vmem:[#allocation7 + $0x98] sm:$0xff]  ;;  %v794_v62 = vld [vmem:[#allocation7 + $0xa0] sm:$0xff] }
  0x85   : > { %319 = vst [vmem:[#allocation2 + $0x178] sm:$0x3] %v9983_v0  ;;  %320 = vst [vmem:[#allocation2 + $0x180] sm:$0xff] %v9983_v0  ;;  %8585 = vmatprep.subr.bf16.mxu0 %v8584_v41  ;;  %v8596_v61 = vpack.c.bf16 %v793_v59, %v792_v58  ;;  %v795_v63 = vld [vmem:[#allocation7 + $0xa8] sm:$0xff]  ;;  %v796_v4 = vld [vmem:[#allocation7 + $0xb0] sm:$0xff] }
  0x86   : > { %321 = vst [vmem:[#allocation2 + $0x188] sm:$0xff] %v9983_v0  ;;  %322 = vst [vmem:[#allocation2 + $0x190] sm:$0x3] %v9983_v0  ;;  %v8600_v3 = vpack.c.bf16 %v795_v63, %v794_v62  ;;  %v797_v5 = vld [vmem:[#allocation7 + $0xb8] sm:$0xff]  ;;  %v798_v8 = vld [vmem:[#allocation7 + $0xc0] sm:$0xff] }
  0x87   : > { %323 = vst [vmem:[#allocation2 + $0x198] sm:$0xff] %v9983_v0  ;;  %324 = vst [vmem:[#allocation2 + $0x1a0] sm:$0xff] %v9983_v0  ;;  %v799_v9 = vld [vmem:[#allocation7 + $0xc8] sm:$0xff]  ;;  %v800_v20 = vld [vmem:[#allocation7 + $0xd0] sm:$0xff] }
  0x88   : > { %325 = vst [vmem:[#allocation2 + $0x1a8] sm:$0x3] %v9983_v0  ;;  %326 = vst [vmem:[#allocation3] sm:$0xff] %v9983_v0  ;;  %8587 = vmatpush3.bf16.msra.mxu0 %v8584_v41  ;;  %v8608_v19 = vpack.c.bf16 %v799_v9, %v798_v8  ;;  %v801_v21 = vld [vmem:[#allocation7 + $0xd8] sm:$0xff]  ;;  %v802_v36 = vld [vmem:[#allocation7 + $0xe0] sm:$0xff] }
  0x89   : > { %327 = vst [vmem:[#allocation3 + $0x8] sm:$0xff] %v9983_v0  ;;  %328 = vst [vmem:[#allocation3 + $0x10] sm:$0x3] %v9983_v0  ;;  %8589 = vmatprep.subr.bf16.mxu0 %v8588_v51  ;;  %v8612_v33 = vpack.c.bf16 %v801_v21, %v800_v20  ;;  %v803_v39 = vld [vmem:[#allocation7 + $0xe8] sm:$0xff]  ;;  %v804_v45 = vld [vmem:[#allocation7 + $0xf0] sm:$0xff] }
  0x8a   : > { %329 = vst [vmem:[#allocation3 + $0x18] sm:$0xff] %v9983_v0  ;;  %330 = vst [vmem:[#allocation3 + $0x20] sm:$0xff] %v9983_v0  ;;  %v8616_v42 = vpack.c.bf16 %v803_v39, %v802_v36  ;;  %v1096_v58 = vld [vmem:[#allocation7 + $0x100] sm:$0xff]  ;;  %v1097_v59 = vld [vmem:[#allocation7 + $0x108] sm:$0xff] }
  0x8b   : > { %331 = vst [vmem:[#allocation3 + $0x28] sm:$0x3] %v9983_v0  ;;  %332 = vst [vmem:[#allocation3 + $0x30] sm:$0xff] %v9983_v0  ;;  %v8624_v63 = vpack.c.bf16 %v1097_v59, %v1096_v58  ;;  %v1098_v58 = vld [vmem:[#allocation7 + $0x110] sm:$0xff]  ;;  %v1099_v59 = vld [vmem:[#allocation7 + $0x118] sm:$0xff] }
  0x8c   : > { %333 = vst [vmem:[#allocation3 + $0x38] sm:$0xff] %v9983_v0  ;;  %334 = vst [vmem:[#allocation3 + $0x40] sm:$0x3] %v9983_v0  ;;  %8591 = vmatpush3.bf16.msra.mxu0 %v8588_v51  ;;  %v805_v51 = vld [vmem:[#allocation7 + $0xf8] sm:$0xff] }
  0x8d   : > { %335 = vst [vmem:[#allocation3 + $0x48] sm:$0xff] %v9983_v0  ;;  %336 = vst [vmem:[#allocation3 + $0x50] sm:$0xff] %v9983_v0  ;;  %8593 = vmatprep.subr.bf16.mxu0 %v8592_v57 }
  0x8e   : > { %337 = vst [vmem:[#allocation3 + $0x58] sm:$0x3] %v9983_v0  ;;  %338 = vst [vmem:[#allocation3 + $0x60] sm:$0xff] %v9983_v0 }
  0x8f   : > { %339 = vst [vmem:[#allocation3 + $0x68] sm:$0xff] %v9983_v0  ;;  %340 = vst [vmem:[#allocation3 + $0x70] sm:$0x3] %v9983_v0  ;;  %7153 = vmatmul.mubr.f32.vlgmr.msra.gmra.mrb[0].mxu0 %v9983_v0 }
  0x90   : > { %341 = vst [vmem:[#allocation3 + $0x78] sm:$0xff] %v9983_v0  ;;  %342 = vst [vmem:[#allocation3 + $0x80] sm:$0xff] %v9983_v0  ;;  %8595 = vmatpush3.bf16.msra.mxu0 %v8592_v57  ;;  %v8620_v57 = vpack.c.bf16 %v805_v51, %v804_v45 }
  0x91   : > { %343 = vst [vmem:[#allocation3 + $0x88] sm:$0x3] %v9983_v0  ;;  %344 = vst [vmem:[#allocation3 + $0x90] sm:$0xff] %v9983_v0  ;;  %8597 = vmatprep.subr.bf16.mxu0 %v8596_v61 }
  0x92   : > { %345 = vst [vmem:[#allocation3 + $0x98] sm:$0xff] %v9983_v0  ;;  %346 = vst [vmem:[#allocation3 + $0xa0] sm:$0x3] %v9983_v0 }
  0x93   : > { %347 = vst [vmem:[#allocation3 + $0xa8] sm:$0xff] %v9983_v0  ;;  %348 = vst [vmem:[#allocation3 + $0xb0] sm:$0xff] %v9983_v0 }
  0x94   : > { %349 = vst [vmem:[#allocation3 + $0xb8] sm:$0x3] %v9983_v0  ;;  %350 = vst [vmem:[#allocation3 + $0xc0] sm:$0xff] %v9983_v0  ;;  %8599 = vmatpush3.bf16.msra.mxu0 %v8596_v61 }
  0x95   : > { %351 = vst [vmem:[#allocation3 + $0xc8] sm:$0xff] %v9983_v0  ;;  %352 = vst [vmem:[#allocation3 + $0xd0] sm:$0x3] %v9983_v0  ;;  %8601 = vmatprep.subr.bf16.mxu0 %v8600_v3 }
  0x96   : > { %353 = vst [vmem:[#allocation3 + $0xd8] sm:$0xff] %v9983_v0  ;;  %354 = vst [vmem:[#allocation3 + $0xe0] sm:$0xff] %v9983_v0 }
  0x97   : > { %355 = vst [vmem:[#allocation3 + $0xe8] sm:$0x3] %v9983_v0  ;;  %356 = vst [vmem:[#allocation3 + $0xf0] sm:$0xff] %v9983_v0 }
  0x98   : > { %357 = vst [vmem:[#allocation3 + $0xf8] sm:$0xff] %v9983_v0  ;;  %358 = vst [vmem:[#allocation3 + $0x100] sm:$0x3] %v9983_v0  ;;  %8603 = vmatpush3.bf16.msra.mxu0 %v8600_v3 }
  0x99   : > { %359 = vst [vmem:[#allocation3 + $0x108] sm:$0xff] %v9983_v0  ;;  %360 = vst [vmem:[#allocation3 + $0x110] sm:$0xff] %v9983_v0 }
  0x9a   : > { %361 = vst [vmem:[#allocation3 + $0x118] sm:$0x3] %v9983_v0  ;;  %362 = vst [vmem:[#allocation3 + $0x120] sm:$0xff] %v9983_v0 }
  0x9b   : > { %363 = vst [vmem:[#allocation3 + $0x128] sm:$0xff] %v9983_v0  ;;  %364 = vst [vmem:[#allocation3 + $0x130] sm:$0x3] %v9983_v0 }
  0x9c   : > { %365 = vst [vmem:[#allocation3 + $0x138] sm:$0xff] %v9983_v0  ;;  %366 = vst [vmem:[#allocation3 + $0x140] sm:$0xff] %v9983_v0 }
  0x9d   : > { %367 = vst [vmem:[#allocation3 + $0x148] sm:$0x3] %v9983_v0  ;;  %368 = vst [vmem:[#allocation3 + $0x150] sm:$0xff] %v9983_v0 }
  0x9e   : > { %369 = vst [vmem:[#allocation3 + $0x158] sm:$0xff] %v9983_v0  ;;  %370 = vst [vmem:[#allocation3 + $0x160] sm:$0x3] %v9983_v0 }
  0x9f   : > { %371 = vst [vmem:[#allocation3 + $0x168] sm:$0xff] %v9983_v0  ;;  %372 = vst [vmem:[#allocation3 + $0x170] sm:$0xff] %v9983_v0 }
  0xa0   : > { %373 = vst [vmem:[#allocation3 + $0x178] sm:$0x3] %v9983_v0  ;;  %374 = vst [vmem:[#allocation3 + $0x180] sm:$0xff] %v9983_v0 }
  0xa1   : > { %375 = vst [vmem:[#allocation3 + $0x188] sm:$0xff] %v9983_v0  ;;  %376 = vst [vmem:[#allocation3 + $0x190] sm:$0x3] %v9983_v0 }
  0xa2   : > { %377 = vst [vmem:[#allocation3 + $0x198] sm:$0xff] %v9983_v0  ;;  %378 = vst [vmem:[#allocation3 + $0x1a0] sm:$0xff] %v9983_v0 }
  0xa3   : > { %379 = vst [vmem:[#allocation3 + $0x1a8] sm:$0x3] %v9983_v0  ;;  %413 = vst [vmem:[#allocation2 + $0x19] sm:$0xff] %v10325_v12  ;;  %v8604_v0 = vpack.c.bf16 %v797_v5, %v796_v4 }
  0xa4   : > { %414 = vst [vmem:[#allocation2 + $0x21] sm:$0xff] %v10328_v13  ;;  %415 = vst [vmem:[#allocation2 + $0x31] sm:$0xff] %v10331_v14 }
  0xa5   : > { %416 = vst [vmem:[#allocation2 + $0x39] sm:$0xff] %v10337_v15  ;;  %417 = vst [vmem:[#allocation2 + $0x49] sm:$0xff] %v10341_v16  ;;  %8605 = vmatprep.subr.bf16.mxu0 %v8604_v0 }
  0xa6   : > { %418 = vst [vmem:[#allocation2 + $0x51] sm:$0xff] %v10344_v17  ;;  %419 = vst [vmem:[#allocation2 + $0x61] sm:$0xff] %v10347_v18  ;;  %8607 = vmatpush3.bf16.msra.mxu0 %v8604_v0 }
  0xa7   : > { %420 = vst [vmem:[#allocation2 + $0x69] sm:$0xff] %v10353_v22  ;;  %421 = vst [vmem:[#allocation2 + $0x79] sm:$0xff] %v10357_v23  ;;  %8609 = vmatprep.subr.bf16.mxu0 %v8608_v19 }
  0xa8   : > { %422 = vst [vmem:[#allocation2 + $0x81] sm:$0xff] %v10360_v24  ;;  %423 = vst [vmem:[#allocation2 + $0x91] sm:$0xff] %v10363_v25 }
  0xa9   : > { %424 = vst [vmem:[#allocation2 + $0x99] sm:$0xff] %v10369_v26  ;;  %425 = vst [vmem:[#allocation2 + $0xa9] sm:$0xff] %v10373_v27 }
  0xaa   : > { %426 = vst [vmem:[#allocation2 + $0xb1] sm:$0xff] %v10376_v28  ;;  %427 = vst [vmem:[#allocation2 + $0xc1] sm:$0xff] %v10379_v29  ;;  %v10444_v60 = vld [vmem:[#allocation2 + $0x18] sm:$0xff]  ;;  %8611 = vmatpush3.bf16.msra.mxu0 %v8608_v19 }
  0xab   : > { %428 = vst [vmem:[#allocation2 + $0xc9] sm:$0xff] %v10385_v31  ;;  %429 = vst [vmem:[#allocation2 + $0xd9] sm:$0xff] %v10389_v34  ;;  %7155 = vmatprep.mubr.f32.mxu0 %v10444_v60  ;;  %v10448_v1 = vld [vmem:[#allocation2 + $0x20] sm:$0xff]  ;;  %v10450_v2 = vld [vmem:[#allocation2 + $0x30] sm:$0xff]  ;;  %8613 = vmatprep.subr.bf16.mxu0 %v8612_v33 }
  0xac   : > { %430 = vst [vmem:[#allocation2 + $0xe1] sm:$0xff] %v10392_v35  ;;  %431 = vst [vmem:[#allocation2 + $0xf1] sm:$0xff] %v10397_v37  ;;  %7156 = vmatmul.mubr.f32.gmra.mrb[2].mxu0 %v10448_v1  ;;  %v10454_v6 = vld [vmem:[#allocation2 + $0x38] sm:$0xff]  ;;  %v10456_v7 = vld [vmem:[#allocation2 + $0x48] sm:$0xff] }
  0xad   : > { %432 = vst [vmem:[#allocation2 + $0xf9] sm:$0xff] %v10400_v38  ;;  %433 = vst [vmem:[#allocation2 + $0x109] sm:$0xff] %v10405_v43  ;;  %7158 = vmatprep.mubr.f32.mxu0 %v10450_v2  ;;  %v10460_v10 = vld [vmem:[#allocation2 + $0x50] sm:$0xff]  ;;  %v10462_v11 = vld [vmem:[#allocation2 + $0x60] sm:$0xff] }
  0xae   : > { %434 = vst [vmem:[#allocation2 + $0x111] sm:$0xff] %v10408_v44  ;;  %435 = vst [vmem:[#allocation2 + $0x121] sm:$0xff] %v10413_v46  ;;  %v10466_v30 = vld [vmem:[#allocation2 + $0x68] sm:$0xff]  ;;  %v10468_v32 = vld [vmem:[#allocation2 + $0x78] sm:$0xff]  ;;  %8615 = vmatpush3.bf16.msra.mxu0 %v8612_v33 }
  0xaf   : > { %436 = vst [vmem:[#allocation2 + $0x129] sm:$0xff] %v10416_v47  ;;  %437 = vst [vmem:[#allocation2 + $0x139] sm:$0xff] %v10421_v48  ;;  %v10472_v40 = vld [vmem:[#allocation2 + $0x80] sm:$0xff]  ;;  %v10474_v41 = vld [vmem:[#allocation2 + $0x90] sm:$0xff]  ;;  %8617 = vmatprep.subr.bf16.mxu0 %v8616_v42 }
  0xb0   : > { %438 = vst [vmem:[#allocation2 + $0x141] sm:$0xff] %v10424_v49  ;;  %439 = vst [vmem:[#allocation2 + $0x151] sm:$0xff] %v10427_v50  ;;  %7159 = vmatmul.mubr.f32.gmra.mrb[4].mxu0 %v10454_v6  ;;  %v10478_v53 = vld [vmem:[#allocation2 + $0x98] sm:$0xff]  ;;  %v10480_v54 = vld [vmem:[#allocation2 + $0xa8] sm:$0xff] }
  0xb1   : > { %440 = vst [vmem:[#allocation2 + $0x159] sm:$0xff] %v10433_v52  ;;  %11474 = vst [vmem:[#allocation14_spill] sm:$0xff] %v10437_v55  ;;  %7161 = vmatprep.mubr.f32.mxu0 %v10456_v7  ;;  %v10484_v61 = vld [vmem:[#allocation2 + $0xb0] sm:$0xff]  ;;  %v10486_v62 = vld [vmem:[#allocation2 + $0xc0] sm:$0xff] }
  0xb2   : > { %441 = vst [vmem:[#allocation2 + $0x169] sm:$0xff] %v10437_v55  ;;  %442 = vst [vmem:[#allocation2 + $0x171] sm:$0xff] %v10441_v56  ;;  %8619 = vmatpush3.bf16.msra.mxu0 %v8616_v42  ;;  %v10490_v3 = vld [vmem:[#allocation2 + $0xc8] sm:$0xff]  ;;  %v10492_v4 = vld [vmem:[#allocation2 + $0xd8] sm:$0xff] }
  0xb3   : > { %8621 = vmatprep.subr.bf16.mxu0 %v8620_v57  ;;  %v10496_v5 = vld [vmem:[#allocation2 + $0xe0] sm:$0xff]  ;;  %v10498_v0 = vld [vmem:[#allocation2 + $0xf0] sm:$0xff] }
  0xb4   : > { %7162 = vmatmul.mubr.f32.gmra.mrb[6].mxu0 %v10460_v10  ;;  %v10502_v8 = vld [vmem:[#allocation2 + $0xf8] sm:$0xff]  ;;  %v10504_v9 = vld [vmem:[#allocation2 + $0x108] sm:$0xff] }
  0xb5   : > { %7164 = vmatprep.mubr.f32.mxu0 %v10462_v11  ;;  %v10508_v19 = vld [vmem:[#allocation2 + $0x110] sm:$0xff]  ;;  %v10510_v20 = vld [vmem:[#allocation2 + $0x120] sm:$0xff] }
  0xb6   : > { %8623 = vmatpush3.bf16.msra.mxu0 %v8620_v57  ;;  %11475 = vst [vmem:[#allocation15_spill] sm:$0xff] %v10508_v19  ;;  %11476 = vst [vmem:[#allocation16_spill] sm:$0xff] %v10510_v20  ;;  %v10514_v21 = vld [vmem:[#allocation2 + $0x128] sm:$0xff]  ;;  %v10516_v33 = vld [vmem:[#allocation2 + $0x138] sm:$0xff] }
  0xb7   : > { %8625 = vmatprep.subr.bf16.mxu0 %v8624_v63  ;;  %11477 = vst [vmem:[#allocation17_spill] sm:$0xff] %v10514_v21  ;;  %11478 = vst [vmem:[#allocation18_spill] sm:$0xff] %v10516_v33  ;;  %v10520_v36 = vld [vmem:[#allocation2 + $0x140] sm:$0xff]  ;;  %v10522_v39 = vld [vmem:[#allocation2 + $0x150] sm:$0xff] }
  0xb8   : > { %7165 = vmatmul.mubr.f32.gmra.mrb[8].mxu0 %v10466_v30  ;;  %11479 = vst [vmem:[#allocation19_spill] sm:$0xff] %v10520_v36  ;;  %11480 = vst [vmem:[#allocation20_spill] sm:$0xff] %v10522_v39  ;;  %v10526_v42 = vld [vmem:[#allocation2 + $0x158] sm:$0xff]  ;;  %v757_v57 = vld [vmem:[#allocation2 + $0x1] sm:$0xff] }
  0xb9   : > { %7167 = vmatprep.mubr.f32.mxu0 %v10468_v32  ;;  %11481 = vst [vmem:[#allocation21_spill] sm:$0xff] %v10526_v42  ;;  %v10528_v45 = vld [vmem:[#allocation2 + $0x168] sm:$0xff]  ;;  %v10532_v51 = vld [vmem:[#allocation2 + $0x170] sm:$0xff] }
  0xba   : > { %11482 = vst [vmem:[#allocation22_spill] sm:$0xff] %v10528_v45  ;;  %11483 = vst [vmem:[#allocation23_spill] sm:$0xff] %v10532_v51 }
  0xbc   : > { %7168 = vmatmul.mubr.f32.gmra.mrb[10].mxu0 %v10472_v40 }
  0xbd   : > { %7170 = vmatprep.mubr.f32.mxu0 %v10474_v41 }
  0xc0   : > { %7171 = vmatmul.mubr.f32.gmra.mrb[12].mxu0 %v10478_v53 }
  0xc1   : > { %7173 = vmatprep.mubr.f32.mxu0 %v10480_v54 }
  0xc4   : > { %7174 = vmatmul.mubr.f32.gmra.mrb[14].mxu0 %v10484_v61 }
  0xc5   : > { %7176 = vmatprep.mubr.f32.mxu0 %v10486_v62 }
  0xc8   : > { %7177 = vmatmul.mubr.f32.gmra.mrb[16].mxu0 %v10490_v3 }
  0xc9   : > { %7179 = vmatprep.mubr.f32.mxu0 %v10492_v4 }
  0xcc   : > { %7180 = vmatmul.mubr.f32.gmra.mrb[18].mxu0 %v10496_v5 }
  0xcd   : > { %7182 = vmatprep.mubr.f32.mxu0 %v10498_v0 }
  0xd0   : > { %7183 = vmatmul.mubr.f32.gmra.mrb[20].mxu0 %v10502_v8 }
  0xd1   : > { %7185 = vmatprep.mubr.f32.mxu0 %v10504_v9 }
  0xd4   : > { %7186 = vmatmul.mubr.f32.gmra.mrb[22].mxu0 %v10508_v19  ;;  %v1105_v19 = vld [vmem:[#allocation7 + $0x148] sm:$0xff] }
  0xd5   : > { %7188 = vmatprep.mubr.f32.mxu0 %v10510_v20  ;;  %v1102_v20 = vld [vmem:[#allocation7 + $0x130] sm:$0xff] }
  0xd8   : > { %7189 = vmatmul.mubr.f32.gmra.mrb[24].mxu0 %v10514_v21  ;;  %v1100_v21 = vld [vmem:[#allocation7 + $0x120] sm:$0xff] }
  0xd9   : > { %7191 = vmatprep.mubr.f32.mxu0 %v10516_v33  ;;  %v758_v33 = vld [vmem:[#allocation2 + $0x9] sm:$0xff] }
  0xdc   : > { %7192 = vmatmul.mubr.f32.gmra.mrb[26].mxu0 %v10520_v36  ;;  %v8628_v36 = vpack.c.bf16 %v1099_v59, %v1098_v58  ;;  %v1402_v58 = vld [vmem:[#allocation7 + $0x180] sm:$0xff]  ;;  %v1403_v59 = vld [vmem:[#allocation7 + $0x188] sm:$0xff] }
  0xdd   : > { %7194 = vmatprep.mubr.f32.mxu0 %v10522_v39  ;;  %v1101_v39 = vld [vmem:[#allocation7 + $0x128] sm:$0xff] }
  0xe0   : > { %7195 = vmatmul.mubr.f32.gmra.mrb[28].mxu0 %v10526_v42  ;;  %v8632_v42 = vpack.c.bf16 %v1101_v39, %v1100_v21  ;;  %v1107_v21 = vld [vmem:[#allocation7 + $0x158] sm:$0xff]  ;;  %v1108_v39 = vld [vmem:[#allocation7 + $0x160] sm:$0xff] }
  0xe1   : > { %7197 = vmatprep.mubr.f32.mxu0 %v10528_v45  ;;  %v1103_v45 = vld [vmem:[#allocation7 + $0x138] sm:$0xff] }
  0xe4   : > { %7198 = vmatmul.mubr.f32.gmra.mrb[30].mxu0 %v10532_v51  ;;  %v8636_v51 = vpack.c.bf16 %v1103_v45, %v1102_v20  ;;  %v1109_v20 = vld [vmem:[#allocation7 + $0x168] sm:$0xff]  ;;  %v1110_v45 = vld [vmem:[#allocation7 + $0x170] sm:$0xff] }
  0xe5   : > { %7232 = vmatprep.mubr.f32.mxu0 %v757_v57  ;;  %v1104_v57 = vld [vmem:[#allocation7 + $0x140] sm:$0xff] }
  0xe8   : > { %7233 = vmatmul.mubr.f32.vlgmr.msra.gmra.mrb[0].mxu0 %v758_v33  ;;  %v1106_v33 = vld [vmem:[#allocation7 + $0x150] sm:$0xff] }
  0xe9   : > { %8627 = vmatpush3.bf16.msra.mxu0 %v8624_v63  ;;  %7235 = vmatprep.mubr.f32.mxu0 %v10325_v12  ;;  %v8640_v63 = vpack.c.bf16 %v1105_v19, %v1104_v57  ;;  %v1111_v19 = vld [vmem:[#allocation7 + $0x178] sm:$0xff]  ;;  %v8656_v57 = vpack.c.bf16 %v1403_v59, %v1402_v58  ;;  %v10576_v58 = vld [vmem:[#allocation2 + $0x22] sm:$0xff] }
  0xea   : > { %8629 = vmatprep.subr.bf16.mxu0 %v8628_v36  ;;  %11487 = vst [vmem:[#allocation27_spill] sm:$0xff] %v10576_v58  ;;  %v10578_v59 = vld [vmem:[#allocation2 + $0x32] sm:$0xff] }
  0xeb   : > { %11488 = vst [vmem:[#allocation28_spill] sm:$0xff] %v10578_v59 }
  0xec   : > { %7236 = vmatmul.mubr.f32.gmra.mrb[2].mxu0 %v10328_v13 }
  0xed   : > { %7238 = vmatprep.mubr.f32.mxu0 %v10331_v14  ;;  %8631 = vmatpush3.bf16.msra.mxu0 %v8628_v36  ;;  %v8644_v36 = vpack.c.bf16 %v1107_v21, %v1106_v33  ;;  %v10565_v33 = vld [vmem:[%s10204_s12 + $0xf8] sm:$0xff]  ;;  %v1063_v21 = vld [vmem:[#allocation2 + $0x2] sm:$0xff] }
  0xee   : > { %8633 = vmatprep.subr.bf16.mxu0 %v8632_v42  ;;  %11485 = vst [vmem:[#allocation25_spill] sm:$0xff] %v10565_v33  ;;  %444 = vst [vmem:[#allocation2 + $0x189] sm:$0xff] %v10565_v33 }
  0xf0   : > { %7239 = vmatmul.mubr.f32.gmra.mrb[4].mxu0 %v10337_v15 }
  0xf1   : > { %7241 = vmatprep.mubr.f32.mxu0 %v10341_v16  ;;  %8635 = vmatpush3.bf16.msra.mxu0 %v8632_v42  ;;  %v8648_v42 = vpack.c.bf16 %v1109_v20, %v1108_v39  ;;  %v1405_v39 = vld [vmem:[#allocation7 + $0x198] sm:$0xff]  ;;  %v1064_v20 = vld [vmem:[#allocation2 + $0xa] sm:$0xff] }
  0xf2   : > { %8637 = vmatprep.subr.bf16.mxu0 %v8636_v51 }
  0xf4   : > { %7242 = vmatmul.mubr.f32.gmra.mrb[6].mxu0 %v10344_v17 }
  0xf5   : > { %7244 = vmatprep.mubr.f32.mxu0 %v10347_v18  ;;  %8639 = vmatpush3.bf16.msra.mxu0 %v8636_v51  ;;  %v8652_v51 = vpack.c.bf16 %v1111_v19, %v1110_v45  ;;  %v1406_v19 = vld [vmem:[#allocation7 + $0x1a0] sm:$0xff] }
  0xf6   : > { %8641 = vmatprep.subr.bf16.mxu0 %v8640_v63 }
  0xf8   : > { %7245 = vmatmul.mubr.f32.gmra.mrb[8].mxu0 %v10353_v22 }
  0xf9   : > { %7247 = vmatprep.mubr.f32.mxu0 %v10357_v23  ;;  %8643 = vmatpush3.bf16.msra.mxu0 %v8640_v63  ;;  %v10561_v63 = vld [vmem:[%s10204_s12 + $0xf0] sm:$0xff] }
  0xfa   : > { %8645 = vmatprep.subr.bf16.mxu0 %v8644_v36  ;;  %11484 = vst [vmem:[#allocation24_spill] sm:$0xff] %v10561_v63  ;;  %443 = vst [vmem:[#allocation2 + $0x181] sm:$0xff] %v10561_v63  ;;  %v1408_v63 = vld [vmem:[#allocation7 + $0x1b0] sm:$0xff] }
  0xfc   : > { %7248 = vmatmul.mubr.f32.gmra.mrb[10].mxu0 %v10360_v24 }
  0xfd   : > { %7250 = vmatprep.mubr.f32.mxu0 %v10363_v25  ;;  %8647 = vmatpush3.bf16.msra.mxu0 %v8644_v36  ;;  %v1404_v36 = vld [vmem:[#allocation7 + $0x190] sm:$0xff] }
  0xfe   : > { %8649 = vmatprep.subr.bf16.mxu0 %v8648_v42  ;;  %v8660_v45 = vpack.c.bf16 %v1405_v39, %v1404_v36  ;;  %v10584_v36 = vld [vmem:[#allocation2 + $0x4a] sm:$0xff]  ;;  %v1410_v39 = vld [vmem:[#allocation7 + $0x1c0] sm:$0xff] }
  0xff   : > { %11490 = vst [vmem:[#allocation30_spill] sm:$0xff] %v10584_v36 }
 0x100   : > { %7251 = vmatmul.mubr.f32.gmra.mrb[12].mxu0 %v10369_v26 }
 0x101   : > { %7253 = vmatprep.mubr.f32.mxu0 %v10373_v27  ;;  %8651 = vmatpush3.bf16.msra.mxu0 %v8648_v42  ;;  %v10573_v42 = vld [vmem:[#allocation2 + $0x1a] sm:$0xff] }
 0x102   : > { %8653 = vmatprep.subr.bf16.mxu0 %v8652_v51  ;;  %11486 = vst [vmem:[#allocation26_spill] sm:$0xff] %v10573_v42 }
 0x104   : > { %7254 = vmatmul.mubr.f32.gmra.mrb[14].mxu0 %v10376_v28 }
 0x105   : > { %7256 = vmatprep.mubr.f32.mxu0 %v10379_v29  ;;  %8655 = vmatpush3.bf16.msra.mxu0 %v8652_v51  ;;  %v1407_v51 = vld [vmem:[#allocation7 + $0x1a8] sm:$0xff] }
 0x106   : > { %8657 = vmatprep.subr.bf16.mxu0 %v8656_v57  ;;  %v8664_v33 = vpack.c.bf16 %v1407_v51, %v1406_v19  ;;  %v10588_v19 = vld [vmem:[#allocation2 + $0x52] sm:$0xff]  ;;  %v10590_v51 = vld [vmem:[#allocation2 + $0x62] sm:$0xff] }
 0x107   : > { %11491 = vst [vmem:[#allocation31_spill] sm:$0xff] %v10588_v19  ;;  %11492 = vst [vmem:[#allocation32_spill] sm:$0xff] %v10590_v51 }
 0x108   : > { %7257 = vmatmul.mubr.f32.gmra.mrb[16].mxu0 %v10385_v31 }
 0x109   : > { %7259 = vmatprep.mubr.f32.mxu0 %v10389_v34 }
 0x10c   : > { %7260 = vmatmul.mubr.f32.gmra.mrb[18].mxu0 %v10392_v35 }
 0x10d   : > { %7262 = vmatprep.mubr.f32.mxu0 %v10397_v37 }
 0x110   : > { %7263 = vmatmul.mubr.f32.gmra.mrb[20].mxu0 %v10400_v38 }
 0x111   : > { %7265 = vmatprep.mubr.f32.mxu0 %v10405_v43 }
 0x114   : > { %7266 = vmatmul.mubr.f32.gmra.mrb[22].mxu0 %v10408_v44 }
 0x115   : > { %7268 = vmatprep.mubr.f32.mxu0 %v10413_v46 }
 0x118   : > { %7269 = vmatmul.mubr.f32.gmra.mrb[24].mxu0 %v10416_v47 }
 0x119   : > { %7271 = vmatprep.mubr.f32.mxu0 %v10421_v48 }
 0x11c   : > { %7272 = vmatmul.mubr.f32.gmra.mrb[26].mxu0 %v10424_v49 }
 0x11d   : > { %7274 = vmatprep.mubr.f32.mxu0 %v10427_v50 }
 0x120   : > { %7275 = vmatmul.mubr.f32.gmra.mrb[28].mxu0 %v10433_v52 }
 0x121   : > { %7277 = vmatprep.mubr.f32.mxu0 %v10437_v55  ;;  %v1409_v55 = vld [vmem:[#allocation7 + $0x1b8] sm:$0xff] }
 0x124   : > { %7278 = vmatmul.mubr.f32.gmra.mrb[30].mxu0 %v10441_v56 }
 0x125   : > { %7312 = vmatprep.mubr.f32.mxu0 %v1063_v21  ;;  %v10582_v21 = vld [vmem:[#allocation2 + $0x3a] sm:$0xff] }
 0x126   : > { %11489 = vst [vmem:[#allocation29_spill] sm:$0xff] %v10582_v21 }
 0x128   : > { %7313 = vmatmul.mubr.f32.vlgmr.msra.gmra.mrb[0].mxu0 %v1064_v20  ;;  %v1411_v20 = vld [vmem:[#allocation7 + $0x1c8] sm:$0xff] }
 0x129   : > { %8659 = vmatpush3.bf16.msra.mxu0 %v8656_v57  ;;  %7315 = vmatprep.mubr.f32.mxu0 %v10573_v42  ;;  %v8668_v57 = vpack.c.bf16 %v1409_v55, %v1408_v63  ;;  %v1413_v42 = vld [vmem:[#allocation7 + $0x1d8] sm:$0xff]  ;;  %v10594_v55 = vld [vmem:[#allocation2 + $0x6a] sm:$0xff] }
 0x12a   : > { %8661 = vmatprep.subr.bf16.mxu0 %v8660_v45  ;;  %11493 = vst [vmem:[#allocation33_spill] sm:$0xff] %v10594_v55  ;;  %v10596_v63 = vld [vmem:[#allocation2 + $0x7a] sm:$0xff] }
 0x12b   : > { %11494 = vst [vmem:[#allocation34_spill] sm:$0xff] %v10596_v63 }
 0x12c   : > { %7316 = vmatmul.mubr.f32.gmra.mrb[2].mxu0 %v10576_v58  ;;  %v1412_v58 = vld [vmem:[#allocation7 + $0x1d0] sm:$0xff] }
 0x12d   : > { %7318 = vmatprep.mubr.f32.mxu0 %v10578_v59  ;;  %8663 = vmatpush3.bf16.msra.mxu0 %v8660_v45  ;;  %v8672_v59 = vpack.c.bf16 %v1411_v20, %v1410_v39  ;;  %v8676_v45 = vpack.c.bf16 %v1413_v42, %v1412_v58  ;;  %v10602_v39 = vld [vmem:[#allocation2 + $0x92] sm:$0xff]  ;;  %v10606_v42 = vld [vmem:[#allocation2 + $0x9a] sm:$0xff]  ;;  %v10608_v58 = vld [vmem:[#allocation2 + $0xaa] sm:$0xff] }
 0x12e   : > { %8665 = vmatprep.subr.bf16.mxu0 %v8664_v33 }
 0x130   : > { %7319 = vmatmul.mubr.f32.gmra.mrb[4].mxu0 %v10582_v21  ;;  %v1415_v21 = vld [vmem:[#allocation7 + $0x1e8] sm:$0xff] }
 0x131   : > { %7321 = vmatprep.mubr.f32.mxu0 %v10584_v36  ;;  %8667 = vmatpush3.bf16.msra.mxu0 %v8664_v33  ;;  %v1414_v36 = vld [vmem:[#allocation7 + $0x1e0] sm:$0xff] }
 0x132   : > { %8669 = vmatprep.subr.bf16.mxu0 %v8668_v57  ;;  %v10600_v33 = vld [vmem:[#allocation2 + $0x82] sm:$0xff]  ;;  %v8680_v20 = vpack.c.bf16 %v1415_v21, %v1414_v36 }
 0x133   : > { %v10614_v21 = vld [vmem:[#allocation2 + $0xc2] sm:$0xff] }
 0x134   : > { %7322 = vmatmul.mubr.f32.gmra.mrb[6].mxu0 %v10588_v19  ;;  %v1417_v19 = vld [vmem:[#allocation7 + $0x1f8] sm:$0xff]  ;;  %11496 = vst [vmem:[#allocation36_spill] sm:$0xff] %v10614_v21 }
 0x135   : > { %7324 = vmatprep.mubr.f32.mxu0 %v10590_v51  ;;  %8671 = vmatpush3.bf16.msra.mxu0 %v8668_v57  ;;  %v1416_v51 = vld [vmem:[#allocation7 + $0x1f0] sm:$0xff] }
 0x136   : > { %8673 = vmatprep.subr.bf16.mxu0 %v8672_v59  ;;  %v8684_v57 = vpack.c.bf16 %v1417_v19, %v1416_v51  ;;  %v10620_v19 = vld [vmem:[#allocation2 + $0xda] sm:$0xff]  ;;  %v10624_v51 = vld [vmem:[#allocation2 + $0xe2] sm:$0xff] }
 0x137   : > { %11498 = vst [vmem:[#allocation38_spill] sm:$0xff] %v10620_v19  ;;  %11499 = vst [vmem:[#allocation39_spill] sm:$0xff] %v10624_v51 }
 0x138   : > { %7325 = vmatmul.mubr.f32.gmra.mrb[8].mxu0 %v10594_v55  ;;  %v1709_v55 = vld [vmem:[#allocation7 + $0x208] sm:$0xff] }
 0x139   : > { %7327 = vmatprep.mubr.f32.mxu0 %v10596_v63  ;;  %8675 = vmatpush3.bf16.msra.mxu0 %v8672_v59  ;;  %v1708_v63 = vld [vmem:[#allocation7 + $0x200] sm:$0xff]  ;;  %v10612_v59 = vld [vmem:[#allocation2 + $0xb2] sm:$0xff] }
 0x13a   : > { %8677 = vmatprep.subr.bf16.mxu0 %v8676_v45  ;;  %11495 = vst [vmem:[#allocation35_spill] sm:$0xff] %v10612_v59  ;;  %v8688_v36 = vpack.c.bf16 %v1709_v55, %v1708_v63  ;;  %v10630_v55 = vld [vmem:[#allocation2 + $0xfa] sm:$0xff]  ;;  %v10632_v63 = vld [vmem:[#allocation2 + $0x10a] sm:$0xff] }
 0x13b   : > { %11501 = vst [vmem:[#allocation41_spill] sm:$0xff] %v10630_v55  ;;  %11502 = vst [vmem:[#allocation42_spill] sm:$0xff] %v10632_v63 }
 0x13c   : > { %7328 = vmatmul.mubr.f32.gmra.mrb[10].mxu0 %v10600_v33 }
 0x13d   : > { %7330 = vmatprep.mubr.f32.mxu0 %v10602_v39  ;;  %8679 = vmatpush3.bf16.msra.mxu0 %v8676_v45  ;;  %v10618_v45 = vld [vmem:[#allocation2 + $0xca] sm:$0xff] }
 0x13e   : > { %8681 = vmatprep.subr.bf16.mxu0 %v8680_v20  ;;  %11497 = vst [vmem:[#allocation37_spill] sm:$0xff] %v10618_v45 }
 0x140   : > { %7331 = vmatmul.mubr.f32.gmra.mrb[12].mxu0 %v10606_v42 }
 0x141   : > { %7333 = vmatprep.mubr.f32.mxu0 %v10608_v58  ;;  %8683 = vmatpush3.bf16.msra.mxu0 %v8680_v20  ;;  %v10626_v20 = vld [vmem:[#allocation2 + $0xf2] sm:$0xff] }
 0x142   : > { %8685 = vmatprep.subr.bf16.mxu0 %v8684_v57  ;;  %11500 = vst [vmem:[#allocation40_spill] sm:$0xff] %v10626_v20 }
 0x144   : > { %7334 = vmatmul.mubr.f32.gmra.mrb[14].mxu0 %v10612_v59  ;;  %v1713_v59 = vld [vmem:[#allocation7 + $0x228] sm:$0xff] }
 0x145   : > { %7336 = vmatprep.mubr.f32.mxu0 %v10614_v21  ;;  %8687 = vmatpush3.bf16.msra.mxu0 %v8684_v57  ;;  %v10636_v57 = vld [vmem:[#allocation2 + $0x112] sm:$0xff] }
 0x146   : > { %8689 = vmatprep.subr.bf16.mxu0 %v8688_v36  ;;  %11503 = vst [vmem:[#allocation43_spill] sm:$0xff] %v10636_v57 }
 0x148   : > { %7337 = vmatmul.mubr.f32.gmra.mrb[16].mxu0 %v10618_v45  ;;  %v10638_v45 = vld [vmem:[#allocation2 + $0x122] sm:$0xff] }
 0x149   : > { %7339 = vmatprep.mubr.f32.mxu0 %v10620_v19  ;;  %11504 = vst [vmem:[#allocation44_spill] sm:$0xff] %v10638_v45  ;;  %v10642_v19 = vld [vmem:[#allocation2 + $0x12a] sm:$0xff] }
 0x14a   : > { %11505 = vst [vmem:[#allocation45_spill] sm:$0xff] %v10642_v19 }
 0x14c   : > { %7340 = vmatmul.mubr.f32.gmra.mrb[18].mxu0 %v10624_v51  ;;  %v10644_v51 = vld [vmem:[#allocation2 + $0x13a] sm:$0xff] }
 0x14d   : > { %7342 = vmatprep.mubr.f32.mxu0 %v10626_v20  ;;  %11506 = vst [vmem:[#allocation46_spill] sm:$0xff] %v10644_v51  ;;  %v10648_v20 = vld [vmem:[#allocation2 + $0x142] sm:$0xff] }
 0x14e   : > { %11507 = vst [vmem:[#allocation47_spill] sm:$0xff] %v10648_v20 }
 0x150   : > { %7343 = vmatmul.mubr.f32.gmra.mrb[20].mxu0 %v10630_v55  ;;  %v10650_v55 = vld [vmem:[#allocation2 + $0x152] sm:$0xff] }
 0x151   : > { %7345 = vmatprep.mubr.f32.mxu0 %v10632_v63  ;;  %11508 = vst [vmem:[#allocation48_spill] sm:$0xff] %v10650_v55  ;;  %v10654_v63 = vld [vmem:[#allocation2 + $0x15a] sm:$0xff] }
 0x152   : > { %11509 = vst [vmem:[#allocation49_spill] sm:$0xff] %v10654_v63 }
 0x154   : > { %7346 = vmatmul.mubr.f32.gmra.mrb[22].mxu0 %v10636_v57  ;;  %v10656_v57 = vld [vmem:[#allocation2 + $0x16a] sm:$0xff] }
 0x155   : > { %7348 = vmatprep.mubr.f32.mxu0 %v10638_v45  ;;  %11510 = vst [vmem:[#allocation50_spill] sm:$0xff] %v10656_v57  ;;  %v10660_v45 = vld [vmem:[#allocation2 + $0x172] sm:$0xff] }
 0x156   : > { %11511 = vst [vmem:[#allocation51_spill] sm:$0xff] %v10660_v45 }
 0x158   : > { %7349 = vmatmul.mubr.f32.gmra.mrb[24].mxu0 %v10642_v19  ;;  %v1710_v19 = vld [vmem:[#allocation7 + $0x210] sm:$0xff] }
 0x159   : > { %7351 = vmatprep.mubr.f32.mxu0 %v10644_v51  ;;  %v1711_v51 = vld [vmem:[#allocation7 + $0x218] sm:$0xff] }
 0x15a   : > { %v8692_v21 = vpack.c.bf16 %v1711_v51, %v1710_v19  ;;  %v1717_v19 = vld [vmem:[#allocation7 + $0x248] sm:$0xff]  ;;  %v2016_v51 = vld [vmem:[#allocation7 + $0x290] sm:$0xff] }
 0x15c   : > { %7352 = vmatmul.mubr.f32.gmra.mrb[26].mxu0 %v10648_v20  ;;  %v1712_v20 = vld [vmem:[#allocation7 + $0x220] sm:$0xff] }
 0x15d   : > { %7354 = vmatprep.mubr.f32.mxu0 %v10650_v55  ;;  %v1714_v55 = vld [vmem:[#allocation7 + $0x230] sm:$0xff] }
 0x160   : > { %7355 = vmatmul.mubr.f32.gmra.mrb[28].mxu0 %v10654_v63  ;;  %v8696_v63 = vpack.c.bf16 %v1713_v59, %v1712_v20  ;;  %v1719_v59 = vld [vmem:[#allocation7 + $0x258] sm:$0xff] }
 0x161   : > { %7357 = vmatprep.mubr.f32.mxu0 %v10656_v57  ;;  %v1715_v57 = vld [vmem:[#allocation7 + $0x238] sm:$0xff] }
 0x162   : > { %v2017_v20 = vld [vmem:[#allocation7 + $0x298] sm:$0xff] }
 0x164   : > { %7358 = vmatmul.mubr.f32.gmra.mrb[30].mxu0 %v10660_v45  ;;  %v8700_v45 = vpack.c.bf16 %v1715_v57, %v1714_v55  ;;  %v8724_v55 = vpack.c.bf16 %v2017_v20, %v2016_v51  ;;  %v2019_v57 = vld [vmem:[#allocation7 + $0x2a8] sm:$0xff] }
 0x165   : > { %7392 = vmatprep.mubr.f32.mxu0 %v10444_v60  ;;  %v1716_v60 = vld [vmem:[#allocation7 + $0x240] sm:$0xff]  ;;  %v2628_v51 = vld [vmem:[#allocation7 + $0x388] sm:$0xff] }
 0x166   : > { %v11533_v20 = vld [vmem:[#allocation35_spill] sm:$0xff] }
 0x168   : > { %7393 = vmatmul.mubr.f32.vlgmr.msra.gmra.mrb[0].mxu0 %v10448_v1  ;;  %v8704_v1 = vpack.c.bf16 %v1717_v19, %v1716_v60  ;;  %v2020_v19 = vld [vmem:[#allocation7 + $0x2b0] sm:$0xff] }
 0x169   : > { %8691 = vmatpush3.bf16.msra.mxu0 %v8688_v36  ;;  %7395 = vmatprep.mubr.f32.mxu0 %v10450_v2  ;;  %v1718_v2 = vld [vmem:[#allocation7 + $0x250] sm:$0xff]  ;;  %v1723_v36 = vld [vmem:[#allocation7 + $0x278] sm:$0xff] }
 0x16a   : > { %8693 = vmatprep.subr.bf16.mxu0 %v8692_v21 }
 0x16c   : > { %7396 = vmatmul.mubr.f32.gmra.mrb[2].mxu0 %v10454_v6  ;;  %v8708_v6 = vpack.c.bf16 %v1719_v59, %v1718_v2  ;;  %v2023_v59 = vld [vmem:[#allocation7 + $0x2c8] sm:$0xff] }
 0x16d   : > { %7398 = vmatprep.mubr.f32.mxu0 %v10456_v7  ;;  %8695 = vmatpush3.bf16.msra.mxu0 %v8692_v21  ;;  %v1720_v7 = vld [vmem:[#allocation7 + $0x260] sm:$0xff]  ;;  %v1721_v21 = vld [vmem:[#allocation7 + $0x268] sm:$0xff] }
 0x16e   : > { %8697 = vmatprep.subr.bf16.mxu0 %v8696_v63 }
 0x170   : > { %7399 = vmatmul.mubr.f32.gmra.mrb[4].mxu0 %v10460_v10  ;;  %v8712_v10 = vpack.c.bf16 %v1721_v21, %v1720_v7  ;;  %v2027_v7 = vld [vmem:[#allocation7 + $0x2e8] sm:$0xff]  ;;  %v2029_v21 = vld [vmem:[#allocation7 + $0x2f8] sm:$0xff] }
 0x171   : > { %7401 = vmatprep.mubr.f32.mxu0 %v10462_v11  ;;  %8699 = vmatpush3.bf16.msra.mxu0 %v8696_v63  ;;  %v1722_v11 = vld [vmem:[#allocation7 + $0x270] sm:$0xff]  ;;  %v2018_v63 = vld [vmem:[#allocation7 + $0x2a0] sm:$0xff] }
 0x172   : > { %8701 = vmatprep.subr.bf16.mxu0 %v8700_v45  ;;  %v8728_v60 = vpack.c.bf16 %v2019_v57, %v2018_v63  ;;  %v11536_v63 = vld [vmem:[#allocation38_spill] sm:$0xff]  ;;  %v11539_v57 = vld [vmem:[#allocation41_spill] sm:$0xff] }
 0x174   : > { %7402 = vmatmul.mubr.f32.gmra.mrb[6].mxu0 %v10466_v30  ;;  %v8716_v30 = vpack.c.bf16 %v1723_v36, %v1722_v11  ;;  %v11529_v11 = vld [vmem:[#allocation31_spill] sm:$0xff]  ;;  %v11530_v36 = vld [vmem:[#allocation32_spill] sm:$0xff] }
 0x175   : > { %7404 = vmatprep.mubr.f32.mxu0 %v10468_v32  ;;  %8703 = vmatpush3.bf16.msra.mxu0 %v8700_v45  ;;  %v2014_v32 = vld [vmem:[#allocation7 + $0x280] sm:$0xff]  ;;  %v2015_v45 = vld [vmem:[#allocation7 + $0x288] sm:$0xff] }
 0x176   : > { %8705 = vmatprep.subr.bf16.mxu0 %v8704_v1 }
 0x178   : > { %7405 = vmatmul.mubr.f32.gmra.mrb[8].mxu0 %v10472_v40  ;;  %v8720_v40 = vpack.c.bf16 %v2015_v45, %v2014_v32  ;;  %v2331_v32 = vld [vmem:[#allocation7 + $0x350] sm:$0xff]  ;;  %v2332_v45 = vld [vmem:[#allocation7 + $0x358] sm:$0xff] }
 0x179   : > { %7407 = vmatprep.mubr.f32.mxu0 %v10474_v41  ;;  %8707 = vmatpush3.bf16.msra.mxu0 %v8704_v1  ;;  %v11512_v41 = vld [vmem:[#allocation15_spill] sm:$0xff]  ;;  %v2021_v1 = vld [vmem:[#allocation7 + $0x2b8] sm:$0xff] }
 0x17a   : > { %8709 = vmatprep.subr.bf16.mxu0 %v8708_v6  ;;  %v8732_v2 = vpack.c.bf16 %v2021_v1, %v2020_v19  ;;  %v11541_v19 = vld [vmem:[#allocation43_spill] sm:$0xff]  ;;  %v11542_v1 = vld [vmem:[#allocation44_spill] sm:$0xff] }
 0x17c   : > { %7408 = vmatmul.mubr.f32.gmra.mrb[10].mxu0 %v10478_v53  ;;  %v11513_v53 = vld [vmem:[#allocation16_spill] sm:$0xff] }
 0x17d   : > { %7410 = vmatprep.mubr.f32.mxu0 %v10480_v54  ;;  %8711 = vmatpush3.bf16.msra.mxu0 %v8708_v6  ;;  %v11514_v54 = vld [vmem:[#allocation17_spill] sm:$0xff] }
 0x17e   : > { %8713 = vmatprep.subr.bf16.mxu0 %v8712_v10  ;;  %v2025_v6 = vld [vmem:[#allocation7 + $0x2d8] sm:$0xff] }
 0x180   : > { %7411 = vmatmul.mubr.f32.gmra.mrb[12].mxu0 %v10484_v61  ;;  %v11515_v61 = vld [vmem:[#allocation18_spill] sm:$0xff] }
 0x181   : > { %7413 = vmatprep.mubr.f32.mxu0 %v10486_v62  ;;  %8715 = vmatpush3.bf16.msra.mxu0 %v8712_v10  ;;  %v11516_v62 = vld [vmem:[#allocation19_spill] sm:$0xff] }
 0x182   : > { %8717 = vmatprep.subr.bf16.mxu0 %v8716_v30  ;;  %v2322_v10 = vld [vmem:[#allocation7 + $0x308] sm:$0xff] }
 0x184   : > { %7414 = vmatmul.mubr.f32.gmra.mrb[14].mxu0 %v10490_v3  ;;  %v11517_v3 = vld [vmem:[#allocation20_spill] sm:$0xff] }
 0x185   : > { %7416 = vmatprep.mubr.f32.mxu0 %v10492_v4  ;;  %8719 = vmatpush3.bf16.msra.mxu0 %v8716_v30  ;;  %v11518_v4 = vld [vmem:[#allocation21_spill] sm:$0xff] }
 0x186   : > { %8721 = vmatprep.subr.bf16.mxu0 %v8720_v40 }
 0x188   : > { %7417 = vmatmul.mubr.f32.gmra.mrb[16].mxu0 %v10496_v5  ;;  %v11519_v5 = vld [vmem:[#allocation22_spill] sm:$0xff] }
 0x189   : > { %7419 = vmatprep.mubr.f32.mxu0 %v10498_v0  ;;  %v10692_v0 = vld [vmem:[#allocation2 + $0x180] sm:$0xff] }
 0x18c   : > { %7420 = vmatmul.mubr.f32.gmra.mrb[18].mxu0 %v10502_v8  ;;  %v11520_v8 = vld [vmem:[#allocation23_spill] sm:$0xff] }
 0x18d   : > { %7422 = vmatprep.mubr.f32.mxu0 %v10504_v9  ;;  %v10696_v9 = vld [vmem:[#allocation2 + $0x188] sm:$0xff] }
 0x190   : > { %7423 = vmatmul.mubr.f32.gmra.mrb[20].mxu0 %v11512_v41  ;;  %v11532_v41 = vld [vmem:[#allocation34_spill] sm:$0xff] }
 0x191   : > { %7425 = vmatprep.mubr.f32.mxu0 %v11513_v53  ;;  %v8772_v53 = vpack.c.bf16 %v2332_v45, %v2331_v32  ;;  %v2300_v32 = vld [vmem:[#allocation2 + $0xc0] sm:$0xff] }
 0x194   : > { %7426 = vmatmul.mubr.f32.gmra.mrb[22].mxu0 %v11514_v54  ;;  %v2333_v54 = vld [vmem:[#allocation7 + $0x360] sm:$0xff] }
 0x195   : > { %7428 = vmatprep.mubr.f32.mxu0 %v11515_v61  ;;  %v2334_v61 = vld [vmem:[#allocation7 + $0x368] sm:$0xff] }
 0x198   : > { %7429 = vmatmul.mubr.f32.gmra.mrb[24].mxu0 %v11516_v62  ;;  %v8776_v62 = vpack.c.bf16 %v2334_v61, %v2333_v54  ;;  %v2302_v54 = vld [vmem:[#allocation2 + $0xd8] sm:$0xff] }
 0x199   : > { %7431 = vmatprep.mubr.f32.mxu0 %v11517_v3  ;;  %v2335_v3 = vld [vmem:[#allocation7 + $0x370] sm:$0xff] }
 0x19c   : > { %7432 = vmatmul.mubr.f32.gmra.mrb[26].mxu0 %v11518_v4  ;;  %v2336_v4 = vld [vmem:[#allocation7 + $0x378] sm:$0xff] }
 0x19d   : > { %7434 = vmatprep.mubr.f32.mxu0 %v11519_v5  ;;  %v8780_v5 = vpack.c.bf16 %v2336_v4, %v2335_v3  ;;  %v2934_v3 = vld [vmem:[#allocation7 + $0x408] sm:$0xff]  ;;  %v2303_v4 = vld [vmem:[#allocation2 + $0xe0] sm:$0xff] }
 0x1a0   : > { %7435 = vmatmul.mubr.f32.gmra.mrb[28].mxu0 %v11520_v8  ;;  %v2627_v8 = vld [vmem:[#allocation7 + $0x380] sm:$0xff] }
 0x1a1   : > { %7437 = vmatprep.mubr.f32.mxu0 %v10692_v0 }
 0x1a4   : > { %7438 = vmatmul.mubr.f32.gmra.mrb[30].mxu0 %v10696_v9 }
 0x1a5   : > { %7472 = vmatprep.mubr.f32.mxu0 %v10325_v12  ;;  %v2022_v12 = vld [vmem:[#allocation7 + $0x2c0] sm:$0xff] }
 0x1a8   : > { %7473 = vmatmul.mubr.f32.vlgmr.msra.gmra.mrb[0].mxu0 %v10328_v13  ;;  %v8736_v13 = vpack.c.bf16 %v2023_v59, %v2022_v12  ;;  %v11544_v12 = vld [vmem:[#allocation46_spill] sm:$0xff]  ;;  %v11545_v59 = vld [vmem:[#allocation47_spill] sm:$0xff] }
 0x1a9   : > { %8723 = vmatpush3.bf16.msra.mxu0 %v8720_v40  ;;  %7475 = vmatprep.mubr.f32.mxu0 %v10331_v14  ;;  %v2024_v14 = vld [vmem:[#allocation7 + $0x2d0] sm:$0xff]  ;;  %v11531_v40 = vld [vmem:[#allocation33_spill] sm:$0xff] }
 0x1aa   : > { %8725 = vmatprep.subr.bf16.mxu0 %v8724_v55 }
 0x1ac   : > { %7476 = vmatmul.mubr.f32.gmra.mrb[2].mxu0 %v10337_v15  ;;  %v8740_v15 = vpack.c.bf16 %v2025_v6, %v2024_v14  ;;  %v11547_v14 = vld [vmem:[#allocation49_spill] sm:$0xff]  ;;  %v11548_v6 = vld [vmem:[#allocation50_spill] sm:$0xff] }
 0x1ad   : > { %7478 = vmatprep.mubr.f32.mxu0 %v10341_v16  ;;  %8727 = vmatpush3.bf16.msra.mxu0 %v8724_v55  ;;  %v2026_v16 = vld [vmem:[#allocation7 + $0x2e0] sm:$0xff]  ;;  %v11534_v55 = vld [vmem:[#allocation36_spill] sm:$0xff] }
 0x1ae   : > { %8729 = vmatprep.subr.bf16.mxu0 %v8728_v60 }
 0x1b0   : > { %7479 = vmatmul.mubr.f32.gmra.mrb[4].mxu0 %v10344_v17  ;;  %v8744_v17 = vpack.c.bf16 %v2027_v7, %v2026_v16  ;;  %v11549_v16 = vld [vmem:[#allocation51_spill] sm:$0xff] }
 0x1b1   : > { %7481 = vmatprep.mubr.f32.mxu0 %v10347_v18  ;;  %8731 = vmatpush3.bf16.msra.mxu0 %v8728_v60  ;;  %v2028_v18 = vld [vmem:[#allocation7 + $0x2f0] sm:$0xff]  ;;  %v11540_v60 = vld [vmem:[#allocation42_spill] sm:$0xff] }
 0x1b2   : > { %8733 = vmatprep.subr.bf16.mxu0 %v8732_v2  ;;  %v10764_v7 = vld [vmem:[#allocation2 + $0x18a] sm:$0xff] }
 0x1b4   : > { %7482 = vmatmul.mubr.f32.gmra.mrb[6].mxu0 %v10353_v22  ;;  %v8748_v22 = vpack.c.bf16 %v2029_v21, %v2028_v18  ;;  %v2629_v18 = vld [vmem:[#allocation7 + $0x390] sm:$0xff]  ;;  %v2630_v21 = vld [vmem:[#allocation7 + $0x398] sm:$0xff] }
 0x1b5   : > { %7484 = vmatprep.mubr.f32.mxu0 %v10357_v23  ;;  %8735 = vmatpush3.bf16.msra.mxu0 %v8732_v2  ;;  %v2321_v23 = vld [vmem:[#allocation7 + $0x300] sm:$0xff]  ;;  %v11543_v2 = vld [vmem:[#allocation45_spill] sm:$0xff] }
 0x1b6   : > { %8737 = vmatprep.subr.bf16.mxu0 %v8736_v13 }
 0x1b8   : > { %7485 = vmatmul.mubr.f32.gmra.mrb[8].mxu0 %v10360_v24  ;;  %v8752_v24 = vpack.c.bf16 %v2322_v10, %v2321_v23  ;;  %v2290_v23 = vld [vmem:[#allocation2 + $0x48] sm:$0xff]  ;;  %v8788_v10 = vpack.c.bf16 %v2630_v21, %v2629_v18  ;;  %v3377_v18 = vld [vmem:[#allocation9 + $0x18] sm:$0xff] }
 0x1b9   : > { %7487 = vmatprep.mubr.f32.mxu0 %v10363_v25  ;;  %8739 = vmatpush3.bf16.msra.mxu0 %v8736_v13  ;;  %v11521_v25 = vld [vmem:[#allocation14_spill] sm:$0xff]  ;;  %v11546_v13 = vld [vmem:[#allocation48_spill] sm:$0xff] }
 0x1ba   : > { %8741 = vmatprep.subr.bf16.mxu0 %v8740_v15  ;;  %v2596_v21 = vld [vmem:[#allocation2 + $0x49] sm:$0xff] }
 0x1bc   : > { %7488 = vmatmul.mubr.f32.gmra.mrb[10].mxu0 %v10369_v26  ;;  %v11522_v26 = vld [vmem:[#allocation24_spill] sm:$0xff] }
 0x1bd   : > { %7490 = vmatprep.mubr.f32.mxu0 %v10373_v27  ;;  %8743 = vmatpush3.bf16.msra.mxu0 %v8740_v15  ;;  %v2323_v27 = vld [vmem:[#allocation7 + $0x310] sm:$0xff]  ;;  %v10760_v15 = vld [vmem:[#allocation2 + $0x182] sm:$0xff] }
 0x1be   : > { %8745 = vmatprep.subr.bf16.mxu0 %v8744_v17 }
 0x1c0   : > { %7491 = vmatmul.mubr.f32.gmra.mrb[12].mxu0 %v10376_v28  ;;  %v2324_v28 = vld [vmem:[#allocation7 + $0x318] sm:$0xff] }
 0x1c1   : > { %7493 = vmatprep.mubr.f32.mxu0 %v10379_v29  ;;  %8747 = vmatpush3.bf16.msra.mxu0 %v8744_v17  ;;  %v11523_v29 = vld [vmem:[#allocation25_spill] sm:$0xff]  ;;  %v2288_v17 = vld [vmem:[#allocation2 + $0x30] sm:$0xff] }
 0x1c2   : > { %8749 = vmatprep.subr.bf16.mxu0 %v8748_v22 }
 0x1c4   : > { %7494 = vmatmul.mubr.f32.gmra.mrb[14].mxu0 %v10385_v31  ;;  %v11524_v31 = vld [vmem:[#allocation26_spill] sm:$0xff] }
 0x1c5   : > { %7496 = vmatprep.mubr.f32.mxu0 %v10389_v34  ;;  %8751 = vmatpush3.bf16.msra.mxu0 %v8748_v22  ;;  %v8756_v34 = vpack.c.bf16 %v2324_v28, %v2323_v27  ;;  %v2289_v22 = vld [vmem:[#allocation2 + $0x38] sm:$0xff]  ;;  %v2292_v27 = vld [vmem:[#allocation2 + $0x60] sm:$0xff] }
 0x1c6   : > { %8753 = vmatprep.subr.bf16.mxu0 %v8752_v24 }
 0x1c8   : > { %7497 = vmatmul.mubr.f32.gmra.mrb[16].mxu0 %v10392_v35  ;;  %v2325_v35 = vld [vmem:[#allocation7 + $0x320] sm:$0xff] }
 0x1c9   : > { %7499 = vmatprep.mubr.f32.mxu0 %v10397_v37  ;;  %v2326_v37 = vld [vmem:[#allocation7 + $0x328] sm:$0xff] }
 0x1cc   : > { %7500 = vmatmul.mubr.f32.gmra.mrb[18].mxu0 %v10400_v38  ;;  %v11525_v38 = vld [vmem:[#allocation27_spill] sm:$0xff] }
 0x1cd   : > { %7502 = vmatprep.mubr.f32.mxu0 %v10405_v43  ;;  %v11526_v43 = vld [vmem:[#allocation28_spill] sm:$0xff] }
 0x1d0   : > { %7503 = vmatmul.mubr.f32.gmra.mrb[20].mxu0 %v10408_v44  ;;  %v8760_v44 = vpack.c.bf16 %v2326_v37, %v2325_v35  ;;  %v2294_v35 = vld [vmem:[#allocation2 + $0x78] sm:$0xff] }
 0x1d1   : > { %7505 = vmatprep.mubr.f32.mxu0 %v10413_v46  ;;  %v2327_v46 = vld [vmem:[#allocation7 + $0x330] sm:$0xff] }
 0x1d4   : > { %7506 = vmatmul.mubr.f32.gmra.mrb[22].mxu0 %v10416_v47  ;;  %v2328_v47 = vld [vmem:[#allocation7 + $0x338] sm:$0xff] }
 0x1d5   : > { %7508 = vmatprep.mubr.f32.mxu0 %v10421_v48  ;;  %v11527_v48 = vld [vmem:[#allocation29_spill] sm:$0xff] }
 0x1d8   : > { %7509 = vmatmul.mubr.f32.gmra.mrb[24].mxu0 %v10424_v49  ;;  %v11528_v49 = vld [vmem:[#allocation30_spill] sm:$0xff] }
 0x1d9   : > { %7511 = vmatprep.mubr.f32.mxu0 %v10427_v50  ;;  %v8764_v50 = vpack.c.bf16 %v2328_v47, %v2327_v46  ;;  %v2296_v46 = vld [vmem:[#allocation2 + $0x90] sm:$0xff] }
 0x1dc   : > { %7512 = vmatmul.mubr.f32.gmra.mrb[26].mxu0 %v10433_v52  ;;  %v2329_v52 = vld [vmem:[#allocation7 + $0x340] sm:$0xff] }
 0x1dd   : > { %7514 = vmatprep.mubr.f32.mxu0 %v11521_v25  ;;  %v2632_v25 = vld [vmem:[#allocation7 + $0x3a8] sm:$0xff] }
 0x1e0   : > { %7515 = vmatmul.mubr.f32.gmra.mrb[28].mxu0 %v10441_v56  ;;  %v2330_v56 = vld [vmem:[#allocation7 + $0x348] sm:$0xff] }
 0x1e1   : > { %7517 = vmatprep.mubr.f32.mxu0 %v11522_v26  ;;  %v8768_v30 = vpack.c.bf16 %v2330_v56, %v2329_v52  ;;  %v2291_v26 = vld [vmem:[#allocation2 + $0x50] sm:$0xff]  ;;  %v2298_v52 = vld [vmem:[#allocation2 + $0xa8] sm:$0xff] }
 0x1e4   : > { %7518 = vmatmul.mubr.f32.gmra.mrb[30].mxu0 %v11523_v29  ;;  %v2633_v29 = vld [vmem:[#allocation7 + $0x3b0] sm:$0xff] }
 0x1e5   : > { %7552 = vmatprep.mubr.f32.mxu0 %v11524_v31  ;;  %v2634_v31 = vld [vmem:[#allocation7 + $0x3b8] sm:$0xff] }
 0x1e6   : > { %v8796_v37 = vpack.c.bf16 %v2634_v31, %v2633_v29  ;;  %v2940_v31 = vld [vmem:[#allocation7 + $0x438] sm:$0xff] }
 0x1e8   : > { %7553 = vmatmul.mubr.f32.vlgmr.msra.gmra.mrb[0].mxu0 %v11525_v38  ;;  %v2635_v38 = vld [vmem:[#allocation7 + $0x3c0] sm:$0xff] }
 0x1e9   : > { %8755 = vmatpush3.bf16.msra.mxu0 %v8752_v24  ;;  %7555 = vmatprep.mubr.f32.mxu0 %v11526_v43  ;;  %v2631_v24 = vld [vmem:[#allocation7 + $0x3a0] sm:$0xff]  ;;  %v2636_v43 = vld [vmem:[#allocation7 + $0x3c8] sm:$0xff] }
 0x1ea   : > { %8757 = vmatprep.subr.bf16.mxu0 %v8756_v34  ;;  %v8792_v28 = vpack.c.bf16 %v2632_v25, %v2631_v24  ;;  %v8800_v47 = vpack.c.bf16 %v2636_v43, %v2635_v38  ;;  %v3379_v24 = vld [vmem:[#allocation9 + $0x28] sm:$0xff]  ;;  %v2597_v25 = vld [vmem:[#allocation2 + $0x51] sm:$0xff]  ;;  %v2600_v38 = vld [vmem:[#allocation2 + $0x79] sm:$0xff] }
 0x1ec   : > { %7556 = vmatmul.mubr.f32.gmra.mrb[2].mxu0 %v11527_v48  ;;  %v2637_v48 = vld [vmem:[#allocation7 + $0x3d0] sm:$0xff] }
 0x1ed   : > { %7558 = vmatprep.mubr.f32.mxu0 %v11528_v49  ;;  %8759 = vmatpush3.bf16.msra.mxu0 %v8756_v34  ;;  %v2293_v34 = vld [vmem:[#allocation2 + $0x68] sm:$0xff]  ;;  %v2638_v49 = vld [vmem:[#allocation7 + $0x3d8] sm:$0xff] }
 0x1ee   : > { %8761 = vmatprep.subr.bf16.mxu0 %v8760_v44  ;;  %v8804_v56 = vpack.c.bf16 %v2638_v49, %v2637_v48  ;;  %v3382_v48 = vld [vmem:[#allocation9 + $0x40] sm:$0xff]  ;;  %v3383_v49 = vld [vmem:[#allocation9 + $0x48] sm:$0xff] }
 0x1f0   : > { %7559 = vmatmul.mubr.f32.gmra.mrb[4].mxu0 %v11529_v11  ;;  %v2639_v11 = vld [vmem:[#allocation7 + $0x3e0] sm:$0xff] }
 0x1f1   : > { %7561 = vmatprep.mubr.f32.mxu0 %v11530_v36  ;;  %8763 = vmatpush3.bf16.msra.mxu0 %v8760_v44  ;;  %v2295_v44 = vld [vmem:[#allocation2 + $0x80] sm:$0xff]  ;;  %v2640_v36 = vld [vmem:[#allocation7 + $0x3e8] sm:$0xff] }
 0x1f2   : > { %8765 = vmatprep.subr.bf16.mxu0 %v8764_v50  ;;  %v8808_v45 = vpack.c.bf16 %v2640_v36, %v2639_v11  ;;  %v8864_v11 = vpack.c.bf16 %v3383_v49, %v3382_v48  ;;  %v2943_v36 = vld [vmem:[#allocation7 + $0x450] sm:$0xff]  ;;  %v2923_v48 = vld [vmem:[#allocation2 + $0x142] sm:$0xff] }
 0x1f3   : > { %v2924_v49 = vld [vmem:[#allocation2 + $0x152] sm:$0xff] }
 0x1f4   : > { %7562 = vmatmul.mubr.f32.gmra.mrb[6].mxu0 %v11531_v40  ;;  %v2641_v40 = vld [vmem:[#allocation7 + $0x3f0] sm:$0xff] }
 0x1f5   : > { %7564 = vmatprep.mubr.f32.mxu0 %v11532_v41  ;;  %8767 = vmatpush3.bf16.msra.mxu0 %v8764_v50  ;;  %v2297_v50 = vld [vmem:[#allocation2 + $0x98] sm:$0xff] }
 0x1f6   : > { %8769 = vmatprep.subr.bf16.mxu0 %v8768_v30  ;;  %v2642_v41 = vld [vmem:[#allocation7 + $0x3f8] sm:$0xff] }
 0x1f7   : > { %v8812_v61 = vpack.c.bf16 %v2642_v41, %v2641_v40  ;;  %v2945_v41 = vld [vmem:[#allocation7 + $0x460] sm:$0xff] }
 0x1f8   : > { %7565 = vmatmul.mubr.f32.gmra.mrb[8].mxu0 %v10600_v33  ;;  %v8784_v33 = vpack.c.bf16 %v2628_v51, %v2627_v8  ;;  %v2305_v51 = vld [vmem:[#allocation2 + $0xf8] sm:$0xff] }
 0x1f9   : > { %7567 = vmatprep.mubr.f32.mxu0 %v10602_v39  ;;  %8771 = vmatpush3.bf16.msra.mxu0 %v8768_v30  ;;  %v11535_v39 = vld [vmem:[#allocation37_spill] sm:$0xff]  ;;  %v2299_v30 = vld [vmem:[#allocation2 + $0xb0] sm:$0xff] }
 0x1fa   : > { %8773 = vmatprep.subr.bf16.mxu0 %v8772_v53 }
 0x1fc   : > { %7568 = vmatmul.mubr.f32.gmra.mrb[10].mxu0 %v10606_v42  ;;  %v11537_v42 = vld [vmem:[#allocation39_spill] sm:$0xff] }
 0x1fd   : > { %7570 = vmatprep.mubr.f32.mxu0 %v10608_v58  ;;  %8775 = vmatpush3.bf16.msra.mxu0 %v8772_v53  ;;  %v11538_v58 = vld [vmem:[#allocation40_spill] sm:$0xff]  ;;  %v2301_v53 = vld [vmem:[#allocation2 + $0xc8] sm:$0xff] }
 0x1fe   : > { %8777 = vmatprep.subr.bf16.mxu0 %v8776_v62 }
 0x200   : > { %7571 = vmatmul.mubr.f32.gmra.mrb[12].mxu0 %v11533_v20  ;;  %v2306_v20 = vld [vmem:[#allocation2 + $0x108] sm:$0xff] }
 0x201   : > { %7573 = vmatprep.mubr.f32.mxu0 %v11534_v55  ;;  %8779 = vmatpush3.bf16.msra.mxu0 %v8776_v62  ;;  %v2933_v62 = vld [vmem:[#allocation7 + $0x400] sm:$0xff]  ;;  %v2307_v55 = vld [vmem:[#allocation2 + $0x110] sm:$0xff] }
 0x202   : > { %8781 = vmatprep.subr.bf16.mxu0 %v8780_v5  ;;  %v8816_v8 = vpack.c.bf16 %v2934_v3, %v2933_v62  ;;  %v2947_v3 = vld [vmem:[#allocation7 + $0x470] sm:$0xff] }
 0x204   : > { %7574 = vmatmul.mubr.f32.gmra.mrb[14].mxu0 %v11535_v39  ;;  %v2309_v39 = vld [vmem:[#allocation2 + $0x128] sm:$0xff] }
 0x205   : > { %7576 = vmatprep.mubr.f32.mxu0 %v11536_v63  ;;  %8783 = vmatpush3.bf16.msra.mxu0 %v8780_v5  ;;  %v2304_v5 = vld [vmem:[#allocation2 + $0xf0] sm:$0xff]  ;;  %v2310_v63 = vld [vmem:[#allocation2 + $0x138] sm:$0xff] }
 0x206   : > { %8785 = vmatprep.subr.bf16.mxu0 %v8784_v33 }
 0x208   : > { %7577 = vmatmul.mubr.f32.gmra.mrb[16].mxu0 %v11537_v42  ;;  %v2311_v42 = vld [vmem:[#allocation2 + $0x140] sm:$0xff] }
 0x209   : > { %7579 = vmatprep.mubr.f32.mxu0 %v11538_v58  ;;  %v2312_v58 = vld [vmem:[#allocation2 + $0x150] sm:$0xff] }
 0x20c   : > { %7580 = vmatmul.mubr.f32.gmra.mrb[18].mxu0 %v11539_v57  ;;  %v2313_v57 = vld [vmem:[#allocation2 + $0x158] sm:$0xff] }
 0x20d   : > { %7582 = vmatprep.mubr.f32.mxu0 %v11540_v60  ;;  %v2314_v60 = vld [vmem:[#allocation2 + $0x168] sm:$0xff] }
 0x210   : > { %7583 = vmatmul.mubr.f32.gmra.mrb[20].mxu0 %v11541_v19  ;;  %v2315_v19 = vld [vmem:[#allocation2 + $0x170] sm:$0xff] }
 0x211   : > { %7585 = vmatprep.mubr.f32.mxu0 %v11542_v1  ;;  %v10769_v1 = vld [vmem:[#allocation2] sm:$0xff] }
 0x214   : > { %7586 = vmatmul.mubr.f32.gmra.mrb[22].mxu0 %v11543_v2  ;;  %v2594_v2 = vld [vmem:[#allocation2 + $0x31] sm:$0xff] }
 0x215   : > { %7588 = vmatprep.mubr.f32.mxu0 %v11544_v12  ;;  %v2935_v12 = vld [vmem:[#allocation7 + $0x410] sm:$0xff] }
 0x218   : > { %7589 = vmatmul.mubr.f32.gmra.mrb[24].mxu0 %v11545_v59  ;;  %v2936_v59 = vld [vmem:[#allocation7 + $0x418] sm:$0xff] }
 0x219   : > { %7591 = vmatprep.mubr.f32.mxu0 %v11546_v13  ;;  %v3374_v13 = vld [vmem:[#allocation9] sm:$0xff] }
 0x21c   : > { %7592 = vmatmul.mubr.f32.gmra.mrb[26].mxu0 %v11547_v14  ;;  %v3375_v14 = vld [vmem:[#allocation9 + $0x8] sm:$0xff] }
 0x21d   : > { %7594 = vmatprep.mubr.f32.mxu0 %v11548_v6  ;;  %v3376_v6 = vld [vmem:[#allocation9 + $0x10] sm:$0xff] }
 0x220   : > { %7595 = vmatmul.mubr.f32.gmra.mrb[28].mxu0 %v11549_v16  ;;  %v2595_v16 = vld [vmem:[#allocation2 + $0x39] sm:$0xff] }
 0x221   : > { %7597 = vmatprep.mubr.f32.mxu0 %v10760_v15 }
 0x224   : > { %7598 = vmatmul.mubr.f32.gmra.mrb[30].mxu0 %v10764_v7 }
 0x225   : > { %7632 = vmatprep.mubr.f32.mxu0 %v2288_v17  ;;  %v8848_v17 = vpack.c.bf16 %v3375_v14, %v3374_v13  ;;  %v9785_v13 = vld [vmem:[#allocation2 + $0x181] sm:$0xff]  ;;  %v2624_v14 = vld [vmem:[#allocation2 + $0x199] sm:$0xff] }
 0x227   : > { %8849 = vmatprep.subr.bf16.mxu1 %v8848_v17 }
 0x228   : > { %7633 = vmatmul.mubr.f32.vlgmr.msra.gmra.mrb[0].mxu0 %v2289_v22  ;;  %v2937_v22 = vld [vmem:[#allocation7 + $0x420] sm:$0xff]  ;;  %8851 = vmatpush3.bf16.msra.mxu1 %v8848_v17  ;;  %v2900_v17 = vld [vmem:[#allocation2 + $0x32] sm:$0xff] }
 0x229   : > { %8787 = vmatpush3.bf16.msra.mxu0 %v8784_v33  ;;  %7635 = vmatprep.mubr.f32.mxu0 %v2290_v23  ;;  %v2308_v33 = vld [vmem:[#allocation2 + $0x120] sm:$0xff]  ;;  %v2938_v23 = vld [vmem:[#allocation7 + $0x428] sm:$0xff] }
 0x22a   : > { %8789 = vmatprep.subr.bf16.mxu0 %v8788_v10 }
 0x22c   : > { %7636 = vmatmul.mubr.f32.gmra.mrb[2].mxu0 %v2291_v26  ;;  %v2598_v26 = vld [vmem:[#allocation2 + $0x61] sm:$0xff] }
 0x22d   : > { %7638 = vmatprep.mubr.f32.mxu0 %v2292_v27  ;;  %8791 = vmatpush3.bf16.msra.mxu0 %v8788_v10  ;;  %v3378_v10 = vld [vmem:[#allocation9 + $0x20] sm:$0xff]  ;;  %v8824_v27 = vpack.c.bf16 %v2938_v23, %v2937_v22 }
 0x22e   : > { %8793 = vmatprep.subr.bf16.mxu0 %v8792_v28  ;;  %v8856_v29 = vpack.c.bf16 %v3379_v24, %v3378_v10  ;;  %v2904_v22 = vld [vmem:[#allocation2 + $0x62] sm:$0xff]  ;;  %v2906_v23 = vld [vmem:[#allocation2 + $0x7a] sm:$0xff]  ;;  %v2908_v24 = vld [vmem:[#allocation2 + $0x92] sm:$0xff] }
 0x22f   : > { %v2907_v10 = vld [vmem:[#allocation2 + $0x82] sm:$0xff] }
 0x230   : > { %7639 = vmatmul.mubr.f32.gmra.mrb[4].mxu0 %v2293_v34  ;;  %v3380_v34 = vld [vmem:[#allocation9 + $0x30] sm:$0xff] }
 0x231   : > { %7641 = vmatprep.mubr.f32.mxu0 %v2294_v35  ;;  %8795 = vmatpush3.bf16.msra.mxu0 %v8792_v28  ;;  %v2939_v28 = vld [vmem:[#allocation7 + $0x430] sm:$0xff]  ;;  %v3381_v35 = vld [vmem:[#allocation9 + $0x38] sm:$0xff] }
 0x232   : > { %8797 = vmatprep.subr.bf16.mxu0 %v8796_v37  ;;  %v8828_v43 = vpack.c.bf16 %v2940_v31, %v2939_v28  ;;  %v2912_v28 = vld [vmem:[#allocation2 + $0xc2] sm:$0xff]  ;;  %v2914_v31 = vld [vmem:[#allocation2 + $0xda] sm:$0xff] }
 0x234   : > { %7642 = vmatmul.mubr.f32.gmra.mrb[6].mxu0 %v2295_v44  ;;  %v2941_v44 = vld [vmem:[#allocation7 + $0x440] sm:$0xff] }
 0x235   : > { %7644 = vmatprep.mubr.f32.mxu0 %v2296_v46  ;;  %8799 = vmatpush3.bf16.msra.mxu0 %v8796_v37  ;;  %v2599_v37 = vld [vmem:[#allocation2 + $0x69] sm:$0xff]  ;;  %v8860_v46 = vpack.c.bf16 %v3381_v35, %v3380_v34  ;;  %v2916_v35 = vld [vmem:[#allocation2 + $0xf2] sm:$0xff] }
 0x236   : > { %8801 = vmatprep.subr.bf16.mxu0 %v8800_v47  ;;  %v2915_v34 = vld [vmem:[#allocation2 + $0xe2] sm:$0xff] }
 0x238   : > { %7645 = vmatmul.mubr.f32.gmra.mrb[8].mxu0 %v2297_v50  ;;  %v2601_v50 = vld [vmem:[#allocation2 + $0x81] sm:$0xff] }
 0x239   : > { %7647 = vmatprep.mubr.f32.mxu0 %v2298_v52  ;;  %8803 = vmatpush3.bf16.msra.mxu0 %v8800_v47  ;;  %v2942_v47 = vld [vmem:[#allocation7 + $0x448] sm:$0xff]  ;;  %v2602_v52 = vld [vmem:[#allocation2 + $0x91] sm:$0xff] }
 0x23a   : > { %8805 = vmatprep.subr.bf16.mxu0 %v8804_v56 }
 0x23c   : > { %7648 = vmatmul.mubr.f32.gmra.mrb[10].mxu0 %v2299_v30  ;;  %v2944_v30 = vld [vmem:[#allocation7 + $0x458] sm:$0xff] }
 0x23d   : > { %7650 = vmatprep.mubr.f32.mxu0 %v2300_v32  ;;  %8807 = vmatpush3.bf16.msra.mxu0 %v8804_v56  ;;  %v8832_v56 = vpack.c.bf16 %v2942_v47, %v2941_v44  ;;  %v2603_v32 = vld [vmem:[#allocation2 + $0x99] sm:$0xff]  ;;  %v8836_v40 = vpack.c.bf16 %v2944_v30, %v2943_v36  ;;  %v2920_v44 = vld [vmem:[#allocation2 + $0x122] sm:$0xff]  ;;  %v3384_v30 = vld [vmem:[#allocation9 + $0x50] sm:$0xff] }
 0x23e   : > { %8809 = vmatprep.subr.bf16.mxu0 %v8808_v45  ;;  %v2922_v47 = vld [vmem:[#allocation2 + $0x13a] sm:$0xff]  ;;  %v2931_v36 = vld [vmem:[#allocation2 + $0x1a2] sm:$0xff] }
 0x240   : > { %7651 = vmatmul.mubr.f32.gmra.mrb[12].mxu0 %v2301_v53  ;;  %v2946_v53 = vld [vmem:[#allocation7 + $0x468] sm:$0xff] }
 0x241   : > { %7653 = vmatprep.mubr.f32.mxu0 %v2302_v54  ;;  %8811 = vmatpush3.bf16.msra.mxu0 %v8808_v45  ;;  %v2604_v45 = vld [vmem:[#allocation2 + $0xa9] sm:$0xff]  ;;  %v2605_v54 = vld [vmem:[#allocation2 + $0xb1] sm:$0xff]  ;;  %v8840_v62 = vpack.c.bf16 %v2946_v53, %v2945_v41 }
 0x242   : > { %8813 = vmatprep.subr.bf16.mxu0 %v8812_v61  ;;  %v3387_v41 = vld [vmem:[#allocation9 + $0x68] sm:$0xff] }
 0x244   : > { %7654 = vmatmul.mubr.f32.gmra.mrb[14].mxu0 %v2303_v4  ;;  %v2948_v4 = vld [vmem:[#allocation7 + $0x478] sm:$0xff] }
 0x245   : > { %7656 = vmatprep.mubr.f32.mxu0 %v2304_v5  ;;  %8815 = vmatpush3.bf16.msra.mxu0 %v8812_v61  ;;  %v2606_v61 = vld [vmem:[#allocation2 + $0xc1] sm:$0xff]  ;;  %v2607_v5 = vld [vmem:[#allocation2 + $0xc9] sm:$0xff] }
 0x246   : > { %8817 = vmatprep.subr.bf16.mxu0 %v8816_v8 }
 0x248   : > { %7657 = vmatmul.mubr.f32.gmra.mrb[16].mxu0 %v2305_v51  ;;  %v8844_v51 = vpack.c.bf16 %v2948_v4, %v2947_v3  ;;  %v3682_v4 = vld [vmem:[#allocation9 + $0x90] sm:$0xff] }
 0x249   : > { %7659 = vmatprep.mubr.f32.mxu0 %v2306_v20  ;;  %v2609_v20 = vld [vmem:[#allocation2 + $0xe1] sm:$0xff] }
 0x24c   : > { %7660 = vmatmul.mubr.f32.gmra.mrb[18].mxu0 %v2307_v55  ;;  %v2610_v55 = vld [vmem:[#allocation2 + $0xf1] sm:$0xff] }
 0x24d   : > { %7662 = vmatprep.mubr.f32.mxu0 %v2308_v33  ;;  %v2611_v33 = vld [vmem:[#allocation2 + $0xf9] sm:$0xff] }
 0x250   : > { %7663 = vmatmul.mubr.f32.gmra.mrb[20].mxu0 %v2309_v39  ;;  %v2612_v39 = vld [vmem:[#allocation2 + $0x109] sm:$0xff] }
 0x251   : > { %7665 = vmatprep.mubr.f32.mxu0 %v2310_v63  ;;  %v2613_v63 = vld [vmem:[#allocation2 + $0x111] sm:$0xff] }
 0x254   : > { %7666 = vmatmul.mubr.f32.gmra.mrb[22].mxu0 %v2311_v42  ;;  %v2614_v42 = vld [vmem:[#allocation2 + $0x121] sm:$0xff] }
 0x255   : > { %7668 = vmatprep.mubr.f32.mxu0 %v2312_v58  ;;  %v2615_v58 = vld [vmem:[#allocation2 + $0x129] sm:$0xff] }
 0x258   : > { %7669 = vmatmul.mubr.f32.gmra.mrb[24].mxu0 %v2313_v57  ;;  %v2616_v57 = vld [vmem:[#allocation2 + $0x139] sm:$0xff] }
 0x259   : > { %7671 = vmatprep.mubr.f32.mxu0 %v2314_v60  ;;  %v2617_v60 = vld [vmem:[#allocation2 + $0x141] sm:$0xff] }
 0x25c   : > { %7672 = vmatmul.mubr.f32.gmra.mrb[26].mxu0 %v2315_v19  ;;  %v2618_v19 = vld [vmem:[#allocation2 + $0x151] sm:$0xff] }
 0x25d   : > { %7674 = vmatprep.mubr.f32.mxu0 %v10692_v0  ;;  %v8820_v0 = vpack.c.bf16 %v2936_v59, %v2935_v12  ;;  %v2620_v12 = vld [vmem:[#allocation2 + $0x169] sm:$0xff]  ;;  %v2621_v59 = vld [vmem:[#allocation2 + $0x171] sm:$0xff] }
 0x260   : > { %7675 = vmatmul.mubr.f32.gmra.mrb[28].mxu0 %v10696_v9  ;;  %v8852_v9 = vpack.c.bf16 %v3377_v18, %v3376_v6  ;;  %v9786_v6 = vld [vmem:[#allocation2 + $0x189] sm:$0xff]  ;;  %v2901_v18 = vld [vmem:[#allocation2 + $0x3a] sm:$0xff] }
 0x261   : > { %7677 = vmatprep.mubr.f32.mxu0 %v10769_v1 }
 0x262   : > { %8853 = vmatprep.subr.bf16.mxu1 %v8852_v9 }
 0x263   : > { %8855 = vmatpush3.bf16.msra.mxu1 %v8852_v9  ;;  %v2905_v9 = vld [vmem:[#allocation2 + $0x6a] sm:$0xff] }
 0x264   : > { %7678 = vmatmul.mubr.f32.gmra.mrb[30].mxu0 %v10769_v1  ;;  %8857 = vmatprep.subr.bf16.mxu1 %v8856_v29 }
 0x265   : > { %7712 = vmatprep.mubr.f32.mxu0 %v2594_v2  ;;  %v2619_v2 = vld [vmem:[#allocation2 + $0x159] sm:$0xff] }
 0x267   : > { %8859 = vmatpush3.bf16.msra.mxu1 %v8856_v29  ;;  %v2913_v29 = vld [vmem:[#allocation2 + $0xca] sm:$0xff] }
 0x268   : > { %7713 = vmatmul.mubr.f32.vlgmr.msra.gmra.mrb[0].mxu0 %v2595_v16  ;;  %8861 = vmatprep.subr.bf16.mxu1 %v8860_v46  ;;  %v2625_v16 = vld [vmem:[#allocation2 + $0x1a1] sm:$0xff] }
 0x269   : > { %8819 = vmatpush3.bf16.msra.mxu0 %v8816_v8  ;;  %7715 = vmatprep.mubr.f32.mxu0 %v2596_v21  ;;  %v2608_v8 = vld [vmem:[#allocation2 + $0xd9] sm:$0xff]  ;;  %v2902_v21 = vld [vmem:[#allocation2 + $0x4a] sm:$0xff] }
 0x26a   : > { %8821 = vmatprep.subr.bf16.mxu0 %v8820_v0 }
 0x26b   : > { %8863 = vmatpush3.bf16.msra.mxu1 %v8860_v46  ;;  %v2921_v46 = vld [vmem:[#allocation2 + $0x12a] sm:$0xff] }
 0x26c   : > { %7716 = vmatmul.mubr.f32.gmra.mrb[2].mxu0 %v2597_v25  ;;  %8865 = vmatprep.subr.bf16.mxu1 %v8864_v11  ;;  %v2909_v25 = vld [vmem:[#allocation2 + $0x9a] sm:$0xff] }
 0x26d   : > { %7718 = vmatprep.mubr.f32.mxu0 %v2598_v26  ;;  %8823 = vmatpush3.bf16.msra.mxu0 %v8820_v0  ;;  %v2903_v0 = vld [vmem:[#allocation2 + $0x52] sm:$0xff]  ;;  %v2910_v26 = vld [vmem:[#allocation2 + $0xaa] sm:$0xff] }
 0x26e   : > { %8825 = vmatprep.subr.bf16.mxu0 %v8824_v27 }
 0x26f   : > { %8867 = vmatpush3.bf16.msra.mxu1 %v8864_v11  ;;  %v2930_v11 = vld [vmem:[#allocation2 + $0x19a] sm:$0xff] }
 0x270   : > { %7719 = vmatmul.mubr.f32.gmra.mrb[4].mxu0 %v2599_v37  ;;  %v2917_v37 = vld [vmem:[#allocation2 + $0xfa] sm:$0xff] }
 0x271   : > { %7721 = vmatprep.mubr.f32.mxu0 %v2600_v38  ;;  %8827 = vmatpush3.bf16.msra.mxu0 %v8824_v27  ;;  %v2911_v27 = vld [vmem:[#allocation2 + $0xb2] sm:$0xff]  ;;  %v2918_v38 = vld [vmem:[#allocation2 + $0x10a] sm:$0xff] }
 0x272   : > { %8829 = vmatprep.subr.bf16.mxu0 %v8828_v43 }
 0x274   : > { %7722 = vmatmul.mubr.f32.gmra.mrb[6].mxu0 %v2601_v50  ;;  %v2925_v50 = vld [vmem:[#allocation2 + $0x15a] sm:$0xff] }
 0x275   : > { %7724 = vmatprep.mubr.f32.mxu0 %v2602_v52  ;;  %8831 = vmatpush3.bf16.msra.mxu0 %v8828_v43  ;;  %v2919_v43 = vld [vmem:[#allocation2 + $0x112] sm:$0xff]  ;;  %v2926_v52 = vld [vmem:[#allocation2 + $0x16a] sm:$0xff] }
 0x276   : > { %8833 = vmatprep.subr.bf16.mxu0 %v8832_v56 }
 0x278   : > { %7725 = vmatmul.mubr.f32.gmra.mrb[8].mxu0 %v2603_v32  ;;  %v3385_v32 = vld [vmem:[#allocation9 + $0x58] sm:$0xff] }
 0x279   : > { %7727 = vmatprep.mubr.f32.mxu0 %v2604_v45  ;;  %8835 = vmatpush3.bf16.msra.mxu0 %v8832_v56  ;;  %v2927_v56 = vld [vmem:[#allocation2 + $0x172] sm:$0xff]  ;;  %v8868_v45 = vpack.c.bf16 %v3385_v32, %v3384_v30 }
 0x27a   : > { %8837 = vmatprep.subr.bf16.mxu0 %v8836_v40 }
 0x27b   : > { %8869 = vmatprep.subr.bf16.mxu1 %v8868_v45 }
 0x27c   : > { %7728 = vmatmul.mubr.f32.gmra.mrb[10].mxu0 %v2605_v54  ;;  %8871 = vmatpush3.bf16.msra.mxu1 %v8868_v45  ;;  %v3388_v54 = vld [vmem:[#allocation9 + $0x70] sm:$0xff] }
 0x27d   : > { %7730 = vmatprep.mubr.f32.mxu0 %v2606_v61  ;;  %8839 = vmatpush3.bf16.msra.mxu0 %v8836_v40  ;;  %v3386_v40 = vld [vmem:[#allocation9 + $0x60] sm:$0xff]  ;;  %v3389_v61 = vld [vmem:[#allocation9 + $0x78] sm:$0xff] }
 0x27e   : > { %8841 = vmatprep.subr.bf16.mxu0 %v8840_v62  ;;  %v8872_v53 = vpack.c.bf16 %v3387_v41, %v3386_v40 }
 0x280   : > { %7731 = vmatmul.mubr.f32.gmra.mrb[12].mxu0 %v2607_v5  ;;  %8873 = vmatprep.subr.bf16.mxu1 %v8872_v53  ;;  %v3683_v5 = vld [vmem:[#allocation9 + $0x98] sm:$0xff] }
 0x281   : > { %7733 = vmatprep.mubr.f32.mxu0 %v2608_v8  ;;  %8843 = vmatpush3.bf16.msra.mxu0 %v8840_v62  ;;  %v8876_v62 = vpack.c.bf16 %v3389_v61, %v3388_v54  ;;  %v8884_v8 = vpack.c.bf16 %v3683_v5, %v3682_v4 }
 0x282   : > { %8845 = vmatprep.subr.bf16.mxu0 %v8844_v51  ;;  %8875 = vmatpush3.bf16.msra.mxu1 %v8872_v53 }
 0x283   : > { %8877 = vmatprep.subr.bf16.mxu1 %v8876_v62 }
 0x284   : > { %7734 = vmatmul.mubr.f32.gmra.mrb[14].mxu0 %v2609_v20  ;;  %v3685_v20 = vld [vmem:[#allocation9 + $0xa8] sm:$0xff] }
 0x285   : > { %7736 = vmatprep.mubr.f32.mxu0 %v2610_v55  ;;  %8847 = vmatpush3.bf16.msra.mxu0 %v8844_v51  ;;  %v3684_v51 = vld [vmem:[#allocation9 + $0xa0] sm:$0xff] }
 0x286   : > { %8879 = vmatpush3.bf16.msra.mxu1 %v8876_v62  ;;  %v8888_v55 = vpack.c.bf16 %v3685_v20, %v3684_v51 }
 0x288   : > { %7737 = vmatmul.mubr.f32.gmra.mrb[16].mxu0 %v2611_v33  ;;  %v3686_v33 = vld [vmem:[#allocation9 + $0xb0] sm:$0xff] }
 0x289   : > { %7739 = vmatprep.mubr.f32.mxu0 %v2612_v39  ;;  %7873 = vmatmul.mubr.f32.vlgmr.msra.gmra.mrb[0].mxu1 %v10769_v1  ;;  %v3687_v39 = vld [vmem:[#allocation9 + $0xb8] sm:$0xff]  ;;  %v3688_v1 = vld [vmem:[#allocation9 + $0xc0] sm:$0xff] }
 0x28c   : > { %7740 = vmatmul.mubr.f32.gmra.mrb[18].mxu0 %v2613_v63  ;;  %v8892_v63 = vpack.c.bf16 %v3687_v39, %v3686_v33 }
 0x28d   : > { %7742 = vmatprep.mubr.f32.mxu0 %v2614_v42  ;;  %v3689_v42 = vld [vmem:[#allocation9 + $0xc8] sm:$0xff] }
 0x290   : > { %7743 = vmatmul.mubr.f32.gmra.mrb[20].mxu0 %v2615_v58  ;;  %v8896_v58 = vpack.c.bf16 %v3689_v42, %v3688_v1 }
 0x291   : > { %7745 = vmatprep.mubr.f32.mxu0 %v2616_v57  ;;  %v3690_v57 = vld [vmem:[#allocation9 + $0xd0] sm:$0xff] }
 0x294   : > { %7746 = vmatmul.mubr.f32.gmra.mrb[22].mxu0 %v2617_v60  ;;  %v3691_v60 = vld [vmem:[#allocation9 + $0xd8] sm:$0xff] }
 0x295   : > { %7748 = vmatprep.mubr.f32.mxu0 %v2618_v19  ;;  %v8900_v19 = vpack.c.bf16 %v3691_v60, %v3690_v57 }
 0x298   : > { %7749 = vmatmul.mubr.f32.gmra.mrb[24].mxu0 %v2619_v2  ;;  %v3692_v2 = vld [vmem:[#allocation9 + $0xe0] sm:$0xff] }
 0x299   : > { %7751 = vmatprep.mubr.f32.mxu0 %v2620_v12  ;;  %v3693_v12 = vld [vmem:[#allocation9 + $0xe8] sm:$0xff] }
 0x29c   : > { %7752 = vmatmul.mubr.f32.gmra.mrb[26].mxu0 %v2621_v59  ;;  %v8904_v59 = vpack.c.bf16 %v3693_v12, %v3692_v2 }
 0x29d   : > { %7754 = vmatprep.mubr.f32.mxu0 %v9785_v13  ;;  %v3694_v13 = vld [vmem:[#allocation9 + $0xf0] sm:$0xff] }
 0x2a0   : > { %7755 = vmatmul.mubr.f32.gmra.mrb[28].mxu0 %v9786_v6 }
 0x2a1   : > { %7757 = vmatprep.mubr.f32.mxu0 %v2624_v14  ;;  %v3695_v14 = vld [vmem:[#allocation9 + $0xf8] sm:$0xff] }
 0x2a2   : > { %v8908_v6 = vpack.c.bf16 %v3695_v14, %v3694_v13 }
 0x2a4   : > { %7758 = vmatmul.mubr.f32.gmra.mrb[30].mxu0 %v2625_v16  ;;  %v3986_v16 = vld [vmem:[#allocation9 + $0x100] sm:$0xff] }
 0x2a5   : > { %7792 = vmatprep.mubr.f32.mxu0 %v2900_v17  ;;  %v3987_v17 = vld [vmem:[#allocation9 + $0x108] sm:$0xff] }
 0x2a8   : > { %7793 = vmatmul.mubr.f32.vlgmr.msra.gmra.mrb[0].mxu0 %v2901_v18  ;;  %v10776_v18 = vpack.c.bf16 %v3987_v17, %v3986_v16 }
 0x2a9   : > { %7795 = vmatprep.mubr.f32.mxu0 %v2902_v21  ;;  %v10782_v21 = vld [vmem:[%s11397_s2] ss:$0 sm:$0xff] }
 0x2ac   : > { %7796 = vmatmul.mubr.f32.gmra.mrb[2].mxu0 %v2903_v0 }
 0x2ad   : > { %7798 = vmatprep.mubr.f32.mxu0 %v2904_v22 }
 0x2b0   : > { %7799 = vmatmul.mubr.f32.gmra.mrb[4].mxu0 %v2905_v9 }
 0x2b1   : > { %7801 = vmatprep.mubr.f32.mxu0 %v2906_v23 }
 0x2b4   : > { %7802 = vmatmul.mubr.f32.gmra.mrb[6].mxu0 %v2907_v10 }
 0x2b5   : > { %7804 = vmatprep.mubr.f32.mxu0 %v2908_v24 }
 0x2b8   : > { %7805 = vmatmul.mubr.f32.gmra.mrb[8].mxu0 %v2909_v25 }
 0x2b9   : > { %7807 = vmatprep.mubr.f32.mxu0 %v2910_v26 }
 0x2bc   : > { %7808 = vmatmul.mubr.f32.gmra.mrb[10].mxu0 %v2911_v27 }
 0x2bd   : > { %7810 = vmatprep.mubr.f32.mxu0 %v2912_v28 }
 0x2c0   : > { %7811 = vmatmul.mubr.f32.gmra.mrb[12].mxu0 %v2913_v29 }
 0x2c1   : > { %7813 = vmatprep.mubr.f32.mxu0 %v2914_v31 }
 0x2c4   : > { %7814 = vmatmul.mubr.f32.gmra.mrb[14].mxu0 %v2915_v34 }
 0x2c5   : > { %7816 = vmatprep.mubr.f32.mxu0 %v2916_v35 }
 0x2c8   : > { %7817 = vmatmul.mubr.f32.gmra.mrb[16].mxu0 %v2917_v37 }
 0x2c9   : > { %7819 = vmatprep.mubr.f32.mxu0 %v2918_v38 }
 0x2cc   : > { %7820 = vmatmul.mubr.f32.gmra.mrb[18].mxu0 %v2919_v43 }
 0x2cd   : > { %7822 = vmatprep.mubr.f32.mxu0 %v2920_v44 }
 0x2d0   : > { %7823 = vmatmul.mubr.f32.gmra.mrb[20].mxu0 %v2921_v46 }
 0x2d1   : > { %7825 = vmatprep.mubr.f32.mxu0 %v2922_v47 }
 0x2d4   : > { %7826 = vmatmul.mubr.f32.gmra.mrb[22].mxu0 %v2923_v48 }
 0x2d5   : > { %7828 = vmatprep.mubr.f32.mxu0 %v2924_v49 }
 0x2d8   : > { %7829 = vmatmul.mubr.f32.gmra.mrb[24].mxu0 %v2925_v50 }
 0x2d9   : > { %7831 = vmatprep.mubr.f32.mxu0 %v2926_v52 }
 0x2dc   : > { %7832 = vmatmul.mubr.f32.gmra.mrb[26].mxu0 %v2927_v56 }
 0x2dd   : > { %7834 = vmatprep.mubr.f32.mxu0 %v10760_v15  ;;  %v3680_v15 = vld [vmem:[#allocation9 + $0x80] sm:$0xff] }
 0x2e0   : > { %7835 = vmatmul.mubr.f32.gmra.mrb[28].mxu0 %v10764_v7  ;;  %v3681_v7 = vld [vmem:[#allocation9 + $0x88] sm:$0xff] }
 0x2e1   : > { %7837 = vmatprep.mubr.f32.mxu0 %v2930_v11  ;;  %v8880_v3 = vpack.c.bf16 %v3681_v7, %v3680_v15 }
 0x2e3   : > { %8881 = vmatprep.subr.bf16.mxu1 %v8880_v3 }
 0x2e4   : > { %7838 = vmatmul.mubr.f32.gmra.mrb[30].mxu0 %v2931_v36  ;;  %8883 = vmatpush3.bf16.msra.mxu1 %v8880_v3 }
 0x2e5   : > { %8885 = vmatprep.subr.bf16.mxu1 %v8884_v8 }
 0x2e8   : > { %8887 = vmatpush3.bf16.msra.mxu1 %v8884_v8 }
 0x2e9   : > { %8889 = vmatprep.subr.bf16.mxu1 %v8888_v55 }
 0x2ec   : > { %8891 = vmatpush3.bf16.msra.mxu1 %v8888_v55 }
 0x2ed   : > { %8893 = vmatprep.subr.bf16.mxu1 %v8892_v63 }
 0x2f0   : > { %8895 = vmatpush3.bf16.msra.mxu1 %v8892_v63 }
 0x2f1   : > { %8897 = vmatprep.subr.bf16.mxu1 %v8896_v58 }
 0x2f4   : > { %8899 = vmatpush3.bf16.msra.mxu1 %v8896_v58 }
 0x2f5   : > { %8901 = vmatprep.subr.bf16.mxu1 %v8900_v19 }
 0x2f8   : > { %8903 = vmatpush3.bf16.msra.mxu1 %v8900_v19 }
 0x2f9   : > { %8905 = vmatprep.subr.bf16.mxu1 %v8904_v59 }
 0x2fc   : > { %8907 = vmatpush3.bf16.msra.mxu1 %v8904_v59 }
 0x2fd   : > { %8909 = vmatprep.subr.bf16.mxu1 %v8908_v6 }
 0x300   : > { %8911 = vmatpush3.bf16.msra.mxu1 %v8908_v6 }
 0x301   : > { %8913 = vmatprep.subr.bf16.mxu1 %v10776_v18 }
 0x37b   : > { %v7794_v0 = vpop.f32.mrb[0].mxu0 }
 0x37c   : > { %v9136_v22 = vadd.f32 %v7794_v0, %v10782_v21  ;;  %v3015_v9 = vpop.f32.mrb[1].mxu0 }
 0x37d   : > { %v9137_v23 = vadd.f32 %v10782_v21, %v3015_v9 }
 0x37e   : > { %v3207_v10 = vmul.f32 0.2, %v9136_v22 }
 0x37f   : > { %v3206_v24 = vmul.f32 0.2, %v9137_v23  ;;  %v7797_v25 = vpop.f32.mrb[2].mxu0 }
 0x380   : > { %v10786_v26 = vmax.f32 %v9136_v22, %v3207_v10  ;;  %v9138_v27 = vadd.f32 %v7797_v25, %v10782_v21  ;;  %v3025_v28 = vpop.f32.mrb[3].mxu0 }
 0x381   : > { %v10789_v29 = vmax.f32 %v9137_v23, %v3206_v24  ;;  %v9139_v31 = vadd.f32 %v10782_v21, %v3025_v28 }
 0x382   : > { %3272 = vst [vmem:[#allocation3 + $0x21] sm:$0xff] %v10786_v26  ;;  %v3209_v34 = vmul.f32 0.2, %v9138_v27 }
 0x383   : > { %3271 = vst [vmem:[#allocation3 + $0x19] sm:$0xff] %v10789_v29  ;;  %v3208_v35 = vmul.f32 0.2, %v9139_v31  ;;  %v7800_v37 = vpop.f32.mrb[4].mxu0 }
 0x384   : > { %v10794_v38 = vmax.f32 %v9138_v27, %v3209_v34  ;;  %v9140_v43 = vadd.f32 %v7800_v37, %v10782_v21  ;;  %v3035_v44 = vpop.f32.mrb[5].mxu0 }
 0x385   : > { %v10797_v46 = vmax.f32 %v9139_v31, %v3208_v35  ;;  %v9141_v47 = vadd.f32 %v10782_v21, %v3035_v44 }
 0x386   : > { %3274 = vst [vmem:[#allocation3 + $0x39] sm:$0xff] %v10794_v38  ;;  %v3211_v48 = vmul.f32 0.2, %v9140_v43 }
 0x387   : > { %3273 = vst [vmem:[#allocation3 + $0x31] sm:$0xff] %v10797_v46  ;;  %v3210_v49 = vmul.f32 0.2, %v9141_v47  ;;  %v7803_v50 = vpop.f32.mrb[6].mxu0 }
 0x388   : > { %v10802_v52 = vmax.f32 %v9140_v43, %v3211_v48  ;;  %v9142_v56 = vadd.f32 %v7803_v50, %v10782_v21  ;;  %v3045_v11 = vpop.f32.mrb[7].mxu0 }
 0x389   : > { %v10805_v36 = vmax.f32 %v9141_v47, %v3210_v49  ;;  %v9143_v30 = vadd.f32 %v10782_v21, %v3045_v11 }
 0x38a   : > { %3276 = vst [vmem:[#allocation3 + $0x51] sm:$0xff] %v10802_v52  ;;  %v3213_v32 = vmul.f32 0.2, %v9142_v56  ;;  %v10809_v45 = vld [vmem:[#allocation3 + $0x18] sm:$0xff]  ;;  %v10811_v40 = vld [vmem:[#allocation3 + $0x20] sm:$0xff] }
 0x38b   : > { %3275 = vst [vmem:[#allocation3 + $0x49] sm:$0xff] %v10805_v36  ;;  %v3212_v41 = vmul.f32 0.2, %v9143_v30  ;;  %v7806_v53 = vpop.f32.mrb[8].mxu0  ;;  %7875 = vmatprep.mubr.f32.mxu1 %v10809_v45 }
 0x38c   : > { %v10815_v54 = vmax.f32 %v9142_v56, %v3213_v32  ;;  %v9144_v61 = vadd.f32 %v7806_v53, %v10782_v21  ;;  %v3055_v62 = vpop.f32.mrb[9].mxu0  ;;  %7876 = vmatmul.mubr.f32.gmra.mrb[2].mxu1 %v10811_v40 }
 0x38d   : > { %v10819_v15 = vmax.f32 %v9143_v30, %v3212_v41  ;;  %v9145_v7 = vadd.f32 %v10782_v21, %v3055_v62 }
 0x38e   : > { %3278 = vst [vmem:[#allocation3 + $0x69] sm:$0xff] %v10815_v54  ;;  %v3215_v3 = vmul.f32 0.2, %v9144_v61  ;;  %v10823_v4 = vld [vmem:[#allocation3 + $0x30] sm:$0xff]  ;;  %v10825_v5 = vld [vmem:[#allocation3 + $0x38] sm:$0xff] }
 0x38f   : > { %3277 = vst [vmem:[#allocation3 + $0x61] sm:$0xff] %v10819_v15  ;;  %v3214_v8 = vmul.f32 0.2, %v9145_v7  ;;  %v7809_v51 = vpop.f32.mrb[10].mxu0  ;;  %7878 = vmatprep.mubr.f32.mxu1 %v10823_v4 }
 0x390   : > { %v10829_v20 = vmax.f32 %v9144_v61, %v3215_v3  ;;  %v9146_v55 = vadd.f32 %v7809_v51, %v10782_v21  ;;  %v3065_v33 = vpop.f32.mrb[11].mxu0  ;;  %7879 = vmatmul.mubr.f32.gmra.mrb[4].mxu1 %v10825_v5 }
 0x391   : > { %v10833_v39 = vmax.f32 %v9145_v7, %v3214_v8  ;;  %v9147_v63 = vadd.f32 %v10782_v21, %v3065_v33 }
 0x392   : > { %3280 = vst [vmem:[#allocation3 + $0x81] sm:$0xff] %v10829_v20  ;;  %v3217_v1 = vmul.f32 0.2, %v9146_v55  ;;  %v10837_v42 = vld [vmem:[#allocation3 + $0x48] sm:$0xff]  ;;  %v10839_v58 = vld [vmem:[#allocation3 + $0x50] sm:$0xff] }
 0x393   : > { %3279 = vst [vmem:[#allocation3 + $0x79] sm:$0xff] %v10833_v39  ;;  %v3216_v57 = vmul.f32 0.2, %v9147_v63  ;;  %v7812_v60 = vpop.f32.mrb[12].mxu0  ;;  %7881 = vmatprep.mubr.f32.mxu1 %v10837_v42 }
 0x394   : > { %v10843_v19 = vmax.f32 %v9146_v55, %v3217_v1  ;;  %v9148_v2 = vadd.f32 %v7812_v60, %v10782_v21  ;;  %v3075_v12 = vpop.f32.mrb[13].mxu0  ;;  %7882 = vmatmul.mubr.f32.gmra.mrb[6].mxu1 %v10839_v58 }
 0x395   : > { %v10847_v59 = vmax.f32 %v9147_v63, %v3216_v57  ;;  %v9149_v13 = vadd.f32 %v10782_v21, %v3075_v12 }
 0x396   : > { %3282 = vst [vmem:[#allocation3 + $0x99] sm:$0xff] %v10843_v19  ;;  %v3219_v14 = vmul.f32 0.2, %v9148_v2  ;;  %v10851_v6 = vld [vmem:[#allocation3 + $0x60] sm:$0xff]  ;;  %v10853_v16 = vld [vmem:[#allocation3 + $0x68] sm:$0xff] }
 0x397   : > { %3281 = vst [vmem:[#allocation3 + $0x91] sm:$0xff] %v10847_v59  ;;  %v3218_v17 = vmul.f32 0.2, %v9149_v13  ;;  %v7815_v0 = vpop.f32.mrb[14].mxu0  ;;  %7884 = vmatprep.mubr.f32.mxu1 %v10851_v6 }
 0x398   : > { %v10857_v22 = vmax.f32 %v9148_v2, %v3219_v14  ;;  %v9150_v9 = vadd.f32 %v7815_v0, %v10782_v21  ;;  %v3085_v23 = vpop.f32.mrb[15].mxu0  ;;  %7885 = vmatmul.mubr.f32.gmra.mrb[8].mxu1 %v10853_v16 }
 0x399   : > { %v10861_v10 = vmax.f32 %v9149_v13, %v3218_v17  ;;  %v9151_v24 = vadd.f32 %v10782_v21, %v3085_v23 }
 0x39a   : > { %3284 = vst [vmem:[#allocation3 + $0xb1] sm:$0xff] %v10857_v22  ;;  %v3221_v25 = vmul.f32 0.2, %v9150_v9  ;;  %v10865_v27 = vld [vmem:[#allocation3 + $0x78] sm:$0xff]  ;;  %v10867_v28 = vld [vmem:[#allocation3 + $0x80] sm:$0xff] }
 0x39b   : > { %3283 = vst [vmem:[#allocation3 + $0xa9] sm:$0xff] %v10861_v10  ;;  %v3220_v31 = vmul.f32 0.2, %v9151_v24  ;;  %v7818_v34 = vpop.f32.mrb[16].mxu0  ;;  %7887 = vmatprep.mubr.f32.mxu1 %v10865_v27 }
 0x39c   : > { %v10871_v35 = vmax.f32 %v9150_v9, %v3221_v25  ;;  %v9152_v37 = vadd.f32 %v7818_v34, %v10782_v21  ;;  %v3095_v43 = vpop.f32.mrb[17].mxu0  ;;  %7888 = vmatmul.mubr.f32.gmra.mrb[10].mxu1 %v10867_v28 }
 0x39d   : > { %v10875_v44 = vmax.f32 %v9151_v24, %v3220_v31  ;;  %v9153_v47 = vadd.f32 %v10782_v21, %v3095_v43 }
 0x39e   : > { %3286 = vst [vmem:[#allocation3 + $0xc9] sm:$0xff] %v10871_v35  ;;  %v3223_v48 = vmul.f32 0.2, %v9152_v37  ;;  %v10879_v49 = vld [vmem:[#allocation3 + $0x90] sm:$0xff]  ;;  %v10881_v50 = vld [vmem:[#allocation3 + $0x98] sm:$0xff] }
 0x39f   : > { %3285 = vst [vmem:[#allocation3 + $0xc1] sm:$0xff] %v10875_v44  ;;  %v3222_v56 = vmul.f32 0.2, %v9153_v47  ;;  %v7821_v11 = vpop.f32.mrb[18].mxu0  ;;  %7890 = vmatprep.mubr.f32.mxu1 %v10879_v49 }
 0x3a0   : > { %v10885_v30 = vmax.f32 %v9152_v37, %v3223_v48  ;;  %v9154_v32 = vadd.f32 %v7821_v11, %v10782_v21  ;;  %v3105_v41 = vpop.f32.mrb[19].mxu0  ;;  %7891 = vmatmul.mubr.f32.gmra.mrb[12].mxu1 %v10881_v50 }
 0x3a1   : > { %v10889_v53 = vmax.f32 %v9153_v47, %v3222_v56  ;;  %v9155_v61 = vadd.f32 %v10782_v21, %v3105_v41 }
 0x3a2   : > { %3288 = vst [vmem:[#allocation3 + $0xe1] sm:$0xff] %v10885_v30  ;;  %v3225_v62 = vmul.f32 0.2, %v9154_v32  ;;  %v10893_v7 = vld [vmem:[#allocation3 + $0xa8] sm:$0xff]  ;;  %v10895_v3 = vld [vmem:[#allocation3 + $0xb0] sm:$0xff] }
 0x3a3   : > { %3287 = vst [vmem:[#allocation3 + $0xd9] sm:$0xff] %v10889_v53  ;;  %v3224_v8 = vmul.f32 0.2, %v9155_v61  ;;  %v7824_v51 = vpop.f32.mrb[20].mxu0  ;;  %7893 = vmatprep.mubr.f32.mxu1 %v10893_v7 }
 0x3a4   : > { %v10899_v55 = vmax.f32 %v9154_v32, %v3225_v62  ;;  %v9156_v33 = vadd.f32 %v7824_v51, %v10782_v21  ;;  %v3115_v63 = vpop.f32.mrb[21].mxu0  ;;  %7894 = vmatmul.mubr.f32.gmra.mrb[14].mxu1 %v10895_v3 }
 0x3a5   : > { %v10903_v1 = vmax.f32 %v9155_v61, %v3224_v8  ;;  %v9157_v57 = vadd.f32 %v10782_v21, %v3115_v63 }
 0x3a6   : > { %3290 = vst [vmem:[#allocation3 + $0xf9] sm:$0xff] %v10899_v55  ;;  %v3227_v60 = vmul.f32 0.2, %v9156_v33  ;;  %v10907_v2 = vld [vmem:[#allocation3 + $0xc0] sm:$0xff]  ;;  %v10909_v12 = vld [vmem:[#allocation3 + $0xc8] sm:$0xff] }
 0x3a7   : > { %3289 = vst [vmem:[#allocation3 + $0xf1] sm:$0xff] %v10903_v1  ;;  %v3226_v13 = vmul.f32 0.2, %v9157_v57  ;;  %v7827_v14 = vpop.f32.mrb[22].mxu0  ;;  %7896 = vmatprep.mubr.f32.mxu1 %v10907_v2 }
 0x3a8   : > { %v10913_v17 = vmax.f32 %v9156_v33, %v3227_v60  ;;  %v9158_v0 = vadd.f32 %v7827_v14, %v10782_v21  ;;  %v3125_v9 = vpop.f32.mrb[23].mxu0  ;;  %7897 = vmatmul.mubr.f32.gmra.mrb[16].mxu1 %v10909_v12 }
 0x3a9   : > { %v10917_v23 = vmax.f32 %v9157_v57, %v3226_v13  ;;  %v9159_v24 = vadd.f32 %v10782_v21, %v3125_v9 }
 0x3aa   : > { %3292 = vst [vmem:[#allocation3 + $0x111] sm:$0xff] %v10913_v17  ;;  %v3229_v25 = vmul.f32 0.2, %v9158_v0  ;;  %v10921_v31 = vld [vmem:[#allocation3 + $0xd8] sm:$0xff]  ;;  %v10923_v34 = vld [vmem:[#allocation3 + $0xe0] sm:$0xff] }
 0x3ab   : > { %3291 = vst [vmem:[#allocation3 + $0x109] sm:$0xff] %v10917_v23  ;;  %v3228_v37 = vmul.f32 0.2, %v9159_v24  ;;  %v7830_v43 = vpop.f32.mrb[24].mxu0  ;;  %7899 = vmatprep.mubr.f32.mxu1 %v10921_v31 }
 0x3ac   : > { %v10927_v47 = vmax.f32 %v9158_v0, %v3229_v25  ;;  %v9160_v48 = vadd.f32 %v7830_v43, %v10782_v21  ;;  %v3135_v56 = vpop.f32.mrb[25].mxu0  ;;  %7900 = vmatmul.mubr.f32.gmra.mrb[18].mxu1 %v10923_v34 }
 0x3ad   : > { %v10931_v11 = vmax.f32 %v9159_v24, %v3228_v37  ;;  %v9161_v32 = vadd.f32 %v10782_v21, %v3135_v56 }
 0x3ae   : > { %3294 = vst [vmem:[#allocation3 + $0x129] sm:$0xff] %v10927_v47  ;;  %v3231_v41 = vmul.f32 0.2, %v9160_v48  ;;  %v10935_v61 = vld [vmem:[#allocation3 + $0xf0] sm:$0xff]  ;;  %v10937_v62 = vld [vmem:[#allocation3 + $0xf8] sm:$0xff] }
 0x3af   : > { %11550 = vst [vmem:[#allocation15_spill] sm:$0xff] %v10937_v62  ;;  %3293 = vst [vmem:[#allocation3 + $0x121] sm:$0xff] %v10931_v11  ;;  %v3230_v8 = vmul.f32 0.2, %v9161_v32  ;;  %v7833_v51 = vpop.f32.mrb[26].mxu0  ;;  %7902 = vmatprep.mubr.f32.mxu1 %v10935_v61 }
 0x3b0   : > { %v10941_v33 = vmax.f32 %v9160_v48, %v3231_v41  ;;  %v9162_v63 = vadd.f32 %v7833_v51, %v10782_v21  ;;  %v3145_v57 = vpop.f32.mrb[27].mxu0  ;;  %7903 = vmatmul.mubr.f32.gmra.mrb[20].mxu1 %v10937_v62 }
 0x3b1   : > { %v10945_v60 = vmax.f32 %v9161_v32, %v3230_v8  ;;  %v9163_v13 = vadd.f32 %v10782_v21, %v3145_v57 }
 0x3b2   : > { %3296 = vst [vmem:[#allocation3 + $0x141] sm:$0xff] %v10941_v33  ;;  %v3233_v14 = vmul.f32 0.2, %v9162_v63  ;;  %v10949_v0 = vld [vmem:[#allocation3 + $0x108] sm:$0xff]  ;;  %v10951_v9 = vld [vmem:[#allocation3 + $0x110] sm:$0xff] }
 0x3b3   : > { %11551 = vst [vmem:[#allocation16_spill] sm:$0xff] %v10949_v0  ;;  %11552 = vst [vmem:[#allocation17_spill] sm:$0xff] %v10951_v9  ;;  %v3232_v24 = vmul.f32 0.2, %v9163_v13  ;;  %v7836_v25 = vpop.f32.mrb[28].mxu0  ;;  %7905 = vmatprep.mubr.f32.mxu1 %v10949_v0 }
 0x3b4   : > { %3295 = vst [vmem:[#allocation3 + $0x139] sm:$0xff] %v10945_v60  ;;  %v10955_v37 = vmax.f32 %v9162_v63, %v3233_v14  ;;  %v9164_v43 = vadd.f32 %v7836_v25, %v10782_v21  ;;  %v3155_v48 = vpop.f32.mrb[29].mxu0  ;;  %7906 = vmatmul.mubr.f32.gmra.mrb[22].mxu1 %v10951_v9 }
 0x3b5   : > { %v10959_v56 = vmax.f32 %v9163_v13, %v3232_v24  ;;  %v9165_v32 = vadd.f32 %v10782_v21, %v3155_v48 }
 0x3b6   : > { %3298 = vst [vmem:[#allocation3 + $0x159] sm:$0xff] %v10955_v37  ;;  %v3235_v41 = vmul.f32 0.2, %v9164_v43  ;;  %v10963_v8 = vld [vmem:[#allocation3 + $0x120] sm:$0xff]  ;;  %v10965_v51 = vld [vmem:[#allocation3 + $0x128] sm:$0xff] }
 0x3b7   : > { %3297 = vst [vmem:[#allocation3 + $0x151] sm:$0xff] %v10959_v56  ;;  %v3234_v63 = vmul.f32 0.2, %v9165_v32  ;;  %v7839_v57 = vpop.f32.mrb[30].mxu0  ;;  %7908 = vmatprep.mubr.f32.mxu1 %v10963_v8 }
 0x3b8   : > { %v10969_v14 = vmax.f32 %v9164_v43, %v3235_v41  ;;  %v9166_v13 = vadd.f32 %v7839_v57, %v10782_v21  ;;  %v3165_v24 = vpop.f32.mrb[31].mxu0  ;;  %7909 = vmatmul.mubr.f32.gmra.mrb[24].mxu1 %v10965_v51 }
 0x3b9   : > { %v10973_v25 = vmax.f32 %v9165_v32, %v3234_v63  ;;  %v9167_v48 = vadd.f32 %v10782_v21, %v3165_v24  ;;  %v3988_v24 = vld [vmem:[#allocation9 + $0x110] sm:$0xff] }
 0x3ba   : > { %3300 = vst [vmem:[#allocation3 + $0x171] sm:$0xff] %v10969_v14  ;;  %v3237_v9 = vmul.f32 0.2, %v9166_v13 }
 0x3bb   : > { %v10977_v0 = vld [vmem:[#allocation3 + $0x138] sm:$0xff]  ;;  %v10979_v62 = vld [vmem:[#allocation3 + $0x140] sm:$0xff]  ;;  %3299 = vst [vmem:[#allocation3 + $0x169] sm:$0xff] %v10973_v25  ;;  %v3236_v43 = vmul.f32 0.2, %v9167_v48 }
 0x3bc   : > { %11553 = vst [vmem:[#allocation18_spill] sm:$0xff] %v10977_v0  ;;  %11554 = vst [vmem:[#allocation19_spill] sm:$0xff] %v10979_v62  ;;  %7911 = vmatprep.mubr.f32.mxu1 %v10977_v0  ;;  %v10983_v41 = vmax.f32 %v9166_v13, %v3237_v9  ;;  %v3647_v13 = vld [vmem:[#allocation3 + $0x1] sm:$0xff] }
 0x3bd   : > { %7912 = vmatmul.mubr.f32.gmra.mrb[26].mxu1 %v10979_v62  ;;  %v10986_v32 = vmax.f32 %v9167_v48, %v3236_v43  ;;  %v3989_v48 = vld [vmem:[#allocation9 + $0x118] sm:$0xff]  ;;  %v3990_v62 = vld [vmem:[#allocation9 + $0x120] sm:$0xff] }
 0x3be   : > { %11555 = vst [vmem:[#allocation20_spill] sm:$0xff] %v10983_v41  ;;  %3302 = vst [vmem:[#allocation3 + $0x189] sm:$0xff] %v10983_v41  ;;  %v10989_v21 = vld [vmem:[#allocation3 + $0x150] sm:$0xff]  ;;  %v10991_v63 = vld [vmem:[#allocation3 + $0x158] sm:$0xff]  ;;  %v8916_v41 = vpack.c.bf16 %v3989_v48, %v3988_v24 }
 0x3bf   : > { %11556 = vst [vmem:[#allocation21_spill] sm:$0xff] %v10986_v32  ;;  %11557 = vst [vmem:[#allocation22_spill] sm:$0xff] %v10989_v21  ;;  %7914 = vmatprep.mubr.f32.mxu1 %v10989_v21  ;;  %v3648_v43 = vld [vmem:[#allocation3 + $0x9] sm:$0xff]  ;;  %v3992_v21 = vld [vmem:[#allocation9 + $0x130] sm:$0xff] }
 0x3c0   : > { %11558 = vst [vmem:[#allocation23_spill] sm:$0xff] %v10991_v63  ;;  %3301 = vst [vmem:[#allocation3 + $0x181] sm:$0xff] %v10986_v32  ;;  %v3991_v32 = vld [vmem:[#allocation9 + $0x128] sm:$0xff]  ;;  %v3993_v0 = vld [vmem:[#allocation9 + $0x138] sm:$0xff] }
 0x3c1   : > { %7915 = vmatmul.mubr.f32.gmra.mrb[28].mxu1 %v10991_v63  ;;  %v8920_v63 = vpack.c.bf16 %v3991_v32, %v3990_v62  ;;  %v3995_v24 = vld [vmem:[#allocation9 + $0x148] sm:$0xff]  ;;  %v3997_v62 = vld [vmem:[#allocation9 + $0x158] sm:$0xff] }
 0x3c2   : > { %v10996_v57 = vld [vmem:[#allocation3 + $0x168] sm:$0xff]  ;;  %v10998_v9 = vld [vmem:[#allocation3 + $0x170] sm:$0xff]  ;;  %v4293_v32 = vld [vmem:[#allocation9 + $0x188] sm:$0xff] }
 0x3c3   : > { %11559 = vst [vmem:[#allocation14_spill] sm:$0xff] %v10998_v9  ;;  %7917 = vmatprep.mubr.f32.mxu1 %v10996_v57  ;;  %v4299_v48 = vld [vmem:[#allocation9 + $0x1b8] sm:$0xff] }
 0x3c5   : > { %7918 = vmatmul.mubr.f32.gmra.mrb[30].mxu1 %v10998_v9  ;;  %v3994_v9 = vld [vmem:[#allocation9 + $0x140] sm:$0xff] }
 0x3c6   : > { %7952 = vmatprep.mubr.f32.mxu1 %v3647_v13  ;;  %v8924_v13 = vpack.c.bf16 %v3993_v0, %v3992_v21  ;;  %v3999_v0 = vld [vmem:[#allocation9 + $0x168] sm:$0xff] }
 0x3c9   : > { %7953 = vmatmul.mubr.f32.vlgmr.msra.gmra.mrb[0].mxu1 %v3648_v43  ;;  %v11039_v43 = vld [vmem:[#allocation3 + $0x32] sm:$0xff] }
 0x3ca   : > { %7955 = vmatprep.mubr.f32.mxu1 %v10789_v29  ;;  %8915 = vmatpush3.bf16.msra.mxu1 %v10776_v18  ;;  %v8928_v18 = vpack.c.bf16 %v3995_v24, %v3994_v9  ;;  %v3996_v29 = vld [vmem:[#allocation9 + $0x150] sm:$0xff] }
 0x3cb   : > { %8917 = vmatprep.subr.bf16.mxu1 %v8916_v41  ;;  %v4298_v9 = vld [vmem:[#allocation9 + $0x1b0] sm:$0xff] }
 0x3cc   : > { %v11042_v24 = vld [vmem:[#allocation3 + $0x3a] sm:$0xff] }
 0x3cd   : > { %7956 = vmatmul.mubr.f32.gmra.mrb[2].mxu1 %v10786_v26  ;;  %v8932_v26 = vpack.c.bf16 %v3997_v62, %v3996_v29  ;;  %v4301_v29 = vld [vmem:[#allocation9 + $0x1c8] sm:$0xff]  ;;  %v11045_v62 = vld [vmem:[#allocation3 + $0x4a] sm:$0xff] }
 0x3ce   : > { %7958 = vmatprep.mubr.f32.mxu1 %v10797_v46  ;;  %8919 = vmatpush3.bf16.msra.mxu1 %v8916_v41  ;;  %v3998_v46 = vld [vmem:[#allocation9 + $0x160] sm:$0xff]  ;;  %v4001_v41 = vld [vmem:[#allocation9 + $0x178] sm:$0xff] }
 0x3cf   : > { %8921 = vmatprep.subr.bf16.mxu1 %v8920_v63 }
 0x3d1   : > { %7959 = vmatmul.mubr.f32.gmra.mrb[4].mxu1 %v10794_v38  ;;  %v8936_v38 = vpack.c.bf16 %v3999_v0, %v3998_v46  ;;  %v11048_v46 = vld [vmem:[#allocation3 + $0x52] sm:$0xff]  ;;  %v4302_v0 = vld [vmem:[#allocation9 + $0x1d0] sm:$0xff] }
 0x3d2   : > { %7961 = vmatprep.mubr.f32.mxu1 %v10805_v36  ;;  %8923 = vmatpush3.bf16.msra.mxu1 %v8920_v63  ;;  %v4000_v36 = vld [vmem:[#allocation9 + $0x170] sm:$0xff] }
 0x3d3   : > { %8925 = vmatprep.subr.bf16.mxu1 %v8924_v13  ;;  %v11036_v63 = vld [vmem:[#allocation3 + $0x22] sm:$0xff] }
 0x3d5   : > { %7962 = vmatmul.mubr.f32.gmra.mrb[6].mxu1 %v10802_v52  ;;  %v8940_v52 = vpack.c.bf16 %v4001_v41, %v4000_v36  ;;  %v11051_v36 = vld [vmem:[#allocation3 + $0x62] sm:$0xff] }
 0x3d6   : > { %7964 = vmatprep.mubr.f32.mxu1 %v10819_v15  ;;  %8927 = vmatpush3.bf16.msra.mxu1 %v8924_v13  ;;  %v4292_v15 = vld [vmem:[#allocation9 + $0x180] sm:$0xff]  ;;  %v8956_v13 = vpack.c.bf16 %v4299_v48, %v4298_v9  ;;  %v4599_v9 = vld [vmem:[#allocation9 + $0x208] sm:$0xff] }
 0x3d7   : > { %8929 = vmatprep.subr.bf16.mxu1 %v8928_v18  ;;  %v11069_v48 = vld [vmem:[#allocation3 + $0xaa] sm:$0xff] }
 0x3d9   : > { %7965 = vmatmul.mubr.f32.gmra.mrb[8].mxu1 %v10815_v54  ;;  %v8944_v54 = vpack.c.bf16 %v4293_v32, %v4292_v15  ;;  %v4304_v15 = vld [vmem:[#allocation9 + $0x1e0] sm:$0xff]  ;;  %v4305_v32 = vld [vmem:[#allocation9 + $0x1e8] sm:$0xff] }
 0x3da   : > { %7967 = vmatprep.mubr.f32.mxu1 %v10833_v39  ;;  %8931 = vmatpush3.bf16.msra.mxu1 %v8928_v18  ;;  %v4294_v39 = vld [vmem:[#allocation9 + $0x190] sm:$0xff]  ;;  %v4300_v18 = vld [vmem:[#allocation9 + $0x1c0] sm:$0xff] }
 0x3db   : > { %8933 = vmatprep.subr.bf16.mxu1 %v8932_v26 }
 0x3dd   : > { %7968 = vmatmul.mubr.f32.gmra.mrb[10].mxu1 %v10829_v20  ;;  %v3953_v20 = vld [vmem:[#allocation3 + $0x2] sm:$0xff] }
 0x3de   : > { %7970 = vmatprep.mubr.f32.mxu1 %v10847_v59  ;;  %8935 = vmatpush3.bf16.msra.mxu1 %v8932_v26  ;;  %v3954_v59 = vld [vmem:[#allocation3 + $0xa] sm:$0xff]  ;;  %v8960_v26 = vpack.c.bf16 %v4301_v29, %v4300_v18  ;;  %v11072_v18 = vld [vmem:[#allocation3 + $0xb2] sm:$0xff]  ;;  %v11075_v29 = vld [vmem:[#allocation3 + $0xc2] sm:$0xff] }
 0x3df   : > { %8937 = vmatprep.subr.bf16.mxu1 %v8936_v38 }
 0x3e1   : > { %7971 = vmatmul.mubr.f32.gmra.mrb[12].mxu1 %v10843_v19  ;;  %v4295_v19 = vld [vmem:[#allocation9 + $0x198] sm:$0xff] }
 0x3e2   : > { %7973 = vmatprep.mubr.f32.mxu1 %v10861_v10  ;;  %8939 = vmatpush3.bf16.msra.mxu1 %v8936_v38  ;;  %v4296_v10 = vld [vmem:[#allocation9 + $0x1a0] sm:$0xff]  ;;  %v4303_v38 = vld [vmem:[#allocation9 + $0x1d8] sm:$0xff] }
 0x3e3   : > { %8941 = vmatprep.subr.bf16.mxu1 %v8940_v52  ;;  %v8964_v41 = vpack.c.bf16 %v4303_v38, %v4302_v0  ;;  %v11081_v0 = vld [vmem:[#allocation3 + $0xda] sm:$0xff]  ;;  %v11084_v38 = vld [vmem:[#allocation3 + $0xe2] sm:$0xff] }
 0x3e5   : > { %7974 = vmatmul.mubr.f32.gmra.mrb[14].mxu1 %v10857_v22  ;;  %v8948_v22 = vpack.c.bf16 %v4295_v19, %v4294_v39  ;;  %v11060_v39 = vld [vmem:[#allocation3 + $0x82] sm:$0xff] }
 0x3e6   : > { %7976 = vmatprep.mubr.f32.mxu1 %v10875_v44  ;;  %8943 = vmatpush3.bf16.msra.mxu1 %v8940_v52  ;;  %v11033_v44 = vld [vmem:[#allocation3 + $0x1a] sm:$0xff]  ;;  %v11054_v52 = vld [vmem:[#allocation3 + $0x6a] sm:$0xff] }
 0x3e7   : > { %8945 = vmatprep.subr.bf16.mxu1 %v8944_v54  ;;  %v4306_v19 = vld [vmem:[#allocation9 + $0x1f0] sm:$0xff] }
 0x3e9   : > { %7977 = vmatmul.mubr.f32.gmra.mrb[16].mxu1 %v10871_v35  ;;  %v4297_v35 = vld [vmem:[#allocation9 + $0x1a8] sm:$0xff] }
 0x3ea   : > { %7979 = vmatprep.mubr.f32.mxu1 %v10889_v53  ;;  %v8952_v21 = vpack.c.bf16 %v4297_v35, %v4296_v10  ;;  %v11066_v35 = vld [vmem:[#allocation3 + $0x9a] sm:$0xff] }
 0x3ed   : > { %7980 = vmatmul.mubr.f32.gmra.mrb[18].mxu1 %v10885_v30 }
 0x3ee   : > { %7982 = vmatprep.mubr.f32.mxu1 %v10903_v1 }
 0x3f1   : > { %7983 = vmatmul.mubr.f32.gmra.mrb[20].mxu1 %v10899_v55 }
 0x3f2   : > { %7985 = vmatprep.mubr.f32.mxu1 %v10917_v23 }
 0x3f5   : > { %7986 = vmatmul.mubr.f32.gmra.mrb[22].mxu1 %v10913_v17 }
 0x3f6   : > { %7988 = vmatprep.mubr.f32.mxu1 %v10931_v11 }
 0x3f9   : > { %7989 = vmatmul.mubr.f32.gmra.mrb[24].mxu1 %v10927_v47 }
 0x3fa   : > { %7991 = vmatprep.mubr.f32.mxu1 %v10945_v60 }
 0x3fd   : > { %7992 = vmatmul.mubr.f32.gmra.mrb[26].mxu1 %v10941_v33 }
 0x3fe   : > { %7994 = vmatprep.mubr.f32.mxu1 %v10959_v56 }
 0x401   : > { %7995 = vmatmul.mubr.f32.gmra.mrb[28].mxu1 %v10955_v37 }
 0x402   : > { %7997 = vmatprep.mubr.f32.mxu1 %v10973_v25 }
 0x405   : > { %7998 = vmatmul.mubr.f32.gmra.mrb[30].mxu1 %v10969_v14 }
 0x406   : > { %8032 = vmatprep.mubr.f32.mxu1 %v3953_v20  ;;  %v8968_v20 = vpack.c.bf16 %v4305_v32, %v4304_v15  ;;  %v11090_v15 = vld [vmem:[#allocation3 + $0xfa] sm:$0xff]  ;;  %v11093_v32 = vld [vmem:[#allocation3 + $0x10a] sm:$0xff] }
 0x407   : > { %11561 = vst [vmem:[#allocation25_spill] sm:$0xff] %v11090_v15  ;;  %11562 = vst [vmem:[#allocation26_spill] sm:$0xff] %v11093_v32 }
 0x409   : > { %8033 = vmatmul.mubr.f32.vlgmr.msra.gmra.mrb[0].mxu1 %v3954_v59  ;;  %v4307_v59 = vld [vmem:[#allocation9 + $0x1f8] sm:$0xff] }
 0x40a   : > { %8035 = vmatprep.mubr.f32.mxu1 %v11033_v44  ;;  %8947 = vmatpush3.bf16.msra.mxu1 %v8944_v54  ;;  %v11057_v54 = vld [vmem:[#allocation3 + $0x7a] sm:$0xff]  ;;  %v8972_v10 = vpack.c.bf16 %v4307_v59, %v4306_v19  ;;  %v11099_v19 = vld [vmem:[#allocation3 + $0x122] sm:$0xff]  ;;  %v11102_v59 = vld [vmem:[#allocation3 + $0x12a] sm:$0xff] }
 0x40b   : > { %8949 = vmatprep.subr.bf16.mxu1 %v8948_v22  ;;  %11564 = vst [vmem:[#allocation28_spill] sm:$0xff] %v11099_v19  ;;  %11565 = vst [vmem:[#allocation29_spill] sm:$0xff] %v11102_v59 }
 0x40d   : > { %8036 = vmatmul.mubr.f32.gmra.mrb[2].mxu1 %v11036_v63 }
 0x40e   : > { %8038 = vmatprep.mubr.f32.mxu1 %v11039_v43  ;;  %8951 = vmatpush3.bf16.msra.mxu1 %v8948_v22  ;;  %v11063_v22 = vld [vmem:[#allocation3 + $0x92] sm:$0xff] }
 0x40f   : > { %8953 = vmatprep.subr.bf16.mxu1 %v8952_v21 }
 0x411   : > { %8039 = vmatmul.mubr.f32.gmra.mrb[4].mxu1 %v11042_v24 }
 0x412   : > { %8041 = vmatprep.mubr.f32.mxu1 %v11045_v62  ;;  %8955 = vmatpush3.bf16.msra.mxu1 %v8952_v21  ;;  %v4598_v21 = vld [vmem:[#allocation9 + $0x200] sm:$0xff] }
 0x413   : > { %8957 = vmatprep.subr.bf16.mxu1 %v8956_v13 }
 0x415   : > { %8042 = vmatmul.mubr.f32.gmra.mrb[6].mxu1 %v11048_v46 }
 0x416   : > { %8044 = vmatprep.mubr.f32.mxu1 %v11051_v36  ;;  %8959 = vmatpush3.bf16.msra.mxu1 %v8956_v13  ;;  %v8976_v13 = vpack.c.bf16 %v4599_v9, %v4598_v21  ;;  %v11108_v21 = vld [vmem:[#allocation3 + $0x142] sm:$0xff]  ;;  %v11111_v9 = vld [vmem:[#allocation3 + $0x152] sm:$0xff] }
 0x417   : > { %8961 = vmatprep.subr.bf16.mxu1 %v8960_v26  ;;  %11567 = vst [vmem:[#allocation31_spill] sm:$0xff] %v11108_v21  ;;  %11568 = vst [vmem:[#allocation32_spill] sm:$0xff] %v11111_v9 }
 0x419   : > { %8045 = vmatmul.mubr.f32.gmra.mrb[8].mxu1 %v11054_v52 }
 0x41a   : > { %8047 = vmatprep.mubr.f32.mxu1 %v11057_v54  ;;  %8963 = vmatpush3.bf16.msra.mxu1 %v8960_v26  ;;  %v11078_v26 = vld [vmem:[#allocation3 + $0xca] sm:$0xff] }
 0x41b   : > { %8965 = vmatprep.subr.bf16.mxu1 %v8964_v41 }
 0x41d   : > { %8048 = vmatmul.mubr.f32.gmra.mrb[10].mxu1 %v11060_v39 }
 0x41e   : > { %8050 = vmatprep.mubr.f32.mxu1 %v11063_v22  ;;  %8967 = vmatpush3.bf16.msra.mxu1 %v8964_v41  ;;  %v11087_v41 = vld [vmem:[#allocation3 + $0xf2] sm:$0xff] }
 0x41f   : > { %8969 = vmatprep.subr.bf16.mxu1 %v8968_v20  ;;  %11560 = vst [vmem:[#allocation24_spill] sm:$0xff] %v11087_v41 }
 0x421   : > { %8051 = vmatmul.mubr.f32.gmra.mrb[12].mxu1 %v11066_v35 }
 0x422   : > { %8053 = vmatprep.mubr.f32.mxu1 %v11069_v48  ;;  %8971 = vmatpush3.bf16.msra.mxu1 %v8968_v20  ;;  %v11096_v20 = vld [vmem:[#allocation3 + $0x112] sm:$0xff] }
 0x423   : > { %8973 = vmatprep.subr.bf16.mxu1 %v8972_v10  ;;  %11563 = vst [vmem:[#allocation27_spill] sm:$0xff] %v11096_v20 }
 0x425   : > { %8054 = vmatmul.mubr.f32.gmra.mrb[14].mxu1 %v11072_v18 }
 0x426   : > { %8056 = vmatprep.mubr.f32.mxu1 %v11075_v29  ;;  %8975 = vmatpush3.bf16.msra.mxu1 %v8972_v10  ;;  %v11105_v10 = vld [vmem:[#allocation3 + $0x13a] sm:$0xff] }
 0x427   : > { %8977 = vmatprep.subr.bf16.mxu1 %v8976_v13  ;;  %11566 = vst [vmem:[#allocation30_spill] sm:$0xff] %v11105_v10 }
 0x429   : > { %8057 = vmatmul.mubr.f32.gmra.mrb[16].mxu1 %v11078_v26 }
 0x42a   : > { %8059 = vmatprep.mubr.f32.mxu1 %v11081_v0 }
 0x42d   : > { %8060 = vmatmul.mubr.f32.gmra.mrb[18].mxu1 %v11084_v38 }
 0x42e   : > { %8062 = vmatprep.mubr.f32.mxu1 %v11087_v41  ;;  %v4603_v41 = vld [vmem:[#allocation9 + $0x228] sm:$0xff] }
 0x431   : > { %8063 = vmatmul.mubr.f32.gmra.mrb[20].mxu1 %v11090_v15  ;;  %v4602_v15 = vld [vmem:[#allocation9 + $0x220] sm:$0xff] }
 0x432   : > { %8065 = vmatprep.mubr.f32.mxu1 %v11093_v32  ;;  %v4600_v32 = vld [vmem:[#allocation9 + $0x210] sm:$0xff] }
 0x435   : > { %8066 = vmatmul.mubr.f32.gmra.mrb[22].mxu1 %v11096_v20  ;;  %v11114_v20 = vld [vmem:[#allocation3 + $0x15a] sm:$0xff] }
 0x436   : > { %8068 = vmatprep.mubr.f32.mxu1 %v11099_v19  ;;  %11569 = vst [vmem:[#allocation33_spill] sm:$0xff] %v11114_v20  ;;  %v11117_v19 = vld [vmem:[#allocation3 + $0x16a] sm:$0xff] }
 0x437   : > { %11570 = vst [vmem:[#allocation34_spill] sm:$0xff] %v11117_v19 }
 0x439   : > { %8069 = vmatmul.mubr.f32.gmra.mrb[24].mxu1 %v11102_v59  ;;  %v11120_v59 = vld [vmem:[#allocation3 + $0x172] sm:$0xff] }
 0x43a   : > { %8071 = vmatprep.mubr.f32.mxu1 %v11105_v10  ;;  %11571 = vst [vmem:[#allocation35_spill] sm:$0xff] %v11120_v59  ;;  %v4601_v10 = vld [vmem:[#allocation9 + $0x218] sm:$0xff] }
 0x43d   : > { %8072 = vmatmul.mubr.f32.gmra.mrb[26].mxu1 %v11108_v21  ;;  %v8980_v21 = vpack.c.bf16 %v4601_v10, %v4600_v32  ;;  %v4607_v32 = vld [vmem:[#allocation9 + $0x248] sm:$0xff] }
 0x43e   : > { %8074 = vmatprep.mubr.f32.mxu1 %v11111_v9  ;;  %v4604_v9 = vld [vmem:[#allocation9 + $0x230] sm:$0xff] }
 0x441   : > { %8075 = vmatmul.mubr.f32.gmra.mrb[28].mxu1 %v11114_v20  ;;  %v8984_v20 = vpack.c.bf16 %v4603_v41, %v4602_v15  ;;  %v4611_v41 = vld [vmem:[#allocation9 + $0x268] sm:$0xff]  ;;  %v4613_v15 = vld [vmem:[#allocation9 + $0x278] sm:$0xff] }
 0x442   : > { %8077 = vmatprep.mubr.f32.mxu1 %v11117_v19  ;;  %v4605_v19 = vld [vmem:[#allocation9 + $0x238] sm:$0xff] }
 0x445   : > { %8078 = vmatmul.mubr.f32.gmra.mrb[30].mxu1 %v11120_v59  ;;  %v8988_v59 = vpack.c.bf16 %v4605_v19, %v4604_v9  ;;  %v11156_v19 = vld [vmem:[#allocation3 + $0x188] sm:$0xff]  ;;  %v4908_v9 = vld [vmem:[#allocation9 + $0x2a0] sm:$0xff] }
 0x446   : > { %8112 = vmatprep.mubr.f32.mxu1 %v10809_v45  ;;  %v4606_v45 = vld [vmem:[#allocation9 + $0x240] sm:$0xff] }
 0x449   : > { %8113 = vmatmul.mubr.f32.vlgmr.msra.gmra.mrb[0].mxu1 %v10811_v40  ;;  %v8992_v40 = vpack.c.bf16 %v4607_v32, %v4606_v45  ;;  %v4909_v45 = vld [vmem:[#allocation9 + $0x2a8] sm:$0xff] }
 0x44a   : > { %8115 = vmatprep.mubr.f32.mxu1 %v10823_v4  ;;  %8979 = vmatpush3.bf16.msra.mxu1 %v8976_v13  ;;  %v4608_v4 = vld [vmem:[#allocation9 + $0x250] sm:$0xff]  ;;  %v4609_v13 = vld [vmem:[#allocation9 + $0x258] sm:$0xff]  ;;  %v9016_v32 = vpack.c.bf16 %v4909_v45, %v4908_v9  ;;  %v5211_v9 = vld [vmem:[#allocation9 + $0x300] sm:$0xff] }
 0x44b   : > { %8981 = vmatprep.subr.bf16.mxu1 %v8980_v21  ;;  %v5212_v45 = vld [vmem:[#allocation9 + $0x308] sm:$0xff] }
 0x44d   : > { %8116 = vmatmul.mubr.f32.gmra.mrb[2].mxu1 %v10825_v5  ;;  %v8996_v5 = vpack.c.bf16 %v4609_v13, %v4608_v4  ;;  %v4910_v4 = vld [vmem:[#allocation9 + $0x2b0] sm:$0xff]  ;;  %v4911_v13 = vld [vmem:[#allocation9 + $0x2b8] sm:$0xff] }
 0x44e   : > { %8118 = vmatprep.mubr.f32.mxu1 %v10837_v42  ;;  %8983 = vmatpush3.bf16.msra.mxu1 %v8980_v21  ;;  %v4610_v42 = vld [vmem:[#allocation9 + $0x260] sm:$0xff]  ;;  %v4566_v21 = vld [vmem:[#allocation3 + $0x21] sm:$0xff] }
 0x44f   : > { %8985 = vmatprep.subr.bf16.mxu1 %v8984_v20 }
 0x451   : > { %8119 = vmatmul.mubr.f32.gmra.mrb[4].mxu1 %v10839_v58  ;;  %v9000_v58 = vpack.c.bf16 %v4611_v41, %v4610_v42  ;;  %v9020_v42 = vpack.c.bf16 %v4911_v13, %v4910_v4  ;;  %v11168_v41 = vld [vmem:[#allocation3 + $0x51] sm:$0xff]  ;;  %v9040_v4 = vpack.c.bf16 %v5212_v45, %v5211_v9  ;;  %v11198_v13 = vld [vmem:[#allocation3 + $0xc9] sm:$0xff] }
 0x452   : > { %8121 = vmatprep.mubr.f32.mxu1 %v10851_v6  ;;  %8987 = vmatpush3.bf16.msra.mxu1 %v8984_v20  ;;  %v4612_v6 = vld [vmem:[#allocation9 + $0x270] sm:$0xff]  ;;  %v4905_v20 = vld [vmem:[#allocation9 + $0x288] sm:$0xff]  ;;  %v5521_v9 = vld [vmem:[#allocation9 + $0x3a0] sm:$0xff] }
 0x453   : > { %8989 = vmatprep.subr.bf16.mxu1 %v8988_v59  ;;  %v5522_v45 = vld [vmem:[#allocation9 + $0x3a8] sm:$0xff] }
 0x455   : > { %8122 = vmatmul.mubr.f32.gmra.mrb[6].mxu1 %v10853_v16  ;;  %v9004_v16 = vpack.c.bf16 %v4613_v15, %v4612_v6  ;;  %v4913_v6 = vld [vmem:[#allocation9 + $0x2c8] sm:$0xff]  ;;  %v11171_v15 = vld [vmem:[#allocation3 + $0x61] sm:$0xff] }
 0x456   : > { %8124 = vmatprep.mubr.f32.mxu1 %v10865_v27  ;;  %8991 = vmatpush3.bf16.msra.mxu1 %v8988_v59  ;;  %v4904_v27 = vld [vmem:[#allocation9 + $0x280] sm:$0xff]  ;;  %v4565_v59 = vld [vmem:[#allocation3 + $0x19] sm:$0xff] }
 0x457   : > { %8993 = vmatprep.subr.bf16.mxu1 %v8992_v40 }
 0x459   : > { %8125 = vmatmul.mubr.f32.gmra.mrb[8].mxu1 %v10867_v28  ;;  %v9008_v28 = vpack.c.bf16 %v4905_v20, %v4904_v27  ;;  %v11174_v27 = vld [vmem:[#allocation3 + $0x69] sm:$0xff]  ;;  %v4914_v20 = vld [vmem:[#allocation9 + $0x2d0] sm:$0xff] }
 0x45a   : > { %8127 = vmatprep.mubr.f32.mxu1 %v10879_v49  ;;  %8995 = vmatpush3.bf16.msra.mxu1 %v8992_v40  ;;  %v11572_v49 = vld [vmem:[#allocation15_spill] sm:$0xff] }
 0x45b   : > { %8997 = vmatprep.subr.bf16.mxu1 %v8996_v5  ;;  %v11162_v40 = vld [vmem:[#allocation3 + $0x39] sm:$0xff] }
 0x45d   : > { %8128 = vmatmul.mubr.f32.gmra.mrb[10].mxu1 %v10881_v50  ;;  %v11573_v50 = vld [vmem:[#allocation16_spill] sm:$0xff] }
 0x45e   : > { %8130 = vmatprep.mubr.f32.mxu1 %v10893_v7  ;;  %8999 = vmatpush3.bf16.msra.mxu1 %v8996_v5  ;;  %v11574_v7 = vld [vmem:[#allocation17_spill] sm:$0xff] }
 0x45f   : > { %9001 = vmatprep.subr.bf16.mxu1 %v9000_v58  ;;  %v11165_v5 = vld [vmem:[#allocation3 + $0x49] sm:$0xff] }
 0x461   : > { %8131 = vmatmul.mubr.f32.gmra.mrb[12].mxu1 %v10895_v3  ;;  %v11575_v3 = vld [vmem:[#allocation18_spill] sm:$0xff] }
 0x462   : > { %8133 = vmatprep.mubr.f32.mxu1 %v10907_v2  ;;  %9003 = vmatpush3.bf16.msra.mxu1 %v9000_v58  ;;  %v11576_v2 = vld [vmem:[#allocation19_spill] sm:$0xff]  ;;  %v4912_v58 = vld [vmem:[#allocation9 + $0x2c0] sm:$0xff] }
 0x463   : > { %9005 = vmatprep.subr.bf16.mxu1 %v9004_v16 }
 0x465   : > { %8134 = vmatmul.mubr.f32.gmra.mrb[14].mxu1 %v10909_v12  ;;  %v11577_v12 = vld [vmem:[#allocation22_spill] sm:$0xff] }
 0x466   : > { %8136 = vmatprep.mubr.f32.mxu1 %v10921_v31  ;;  %9007 = vmatpush3.bf16.msra.mxu1 %v9004_v16  ;;  %v11578_v31 = vld [vmem:[#allocation23_spill] sm:$0xff]  ;;  %v9024_v16 = vpack.c.bf16 %v4913_v6, %v4912_v58  ;;  %v11587_v6 = vld [vmem:[#allocation29_spill] sm:$0xff] }
 0x467   : > { %9009 = vmatprep.subr.bf16.mxu1 %v9008_v28  ;;  %v5518_v58 = vld [vmem:[#allocation9 + $0x388] sm:$0xff] }
 0x469   : > { %8137 = vmatmul.mubr.f32.gmra.mrb[16].mxu1 %v10923_v34  ;;  %v11579_v34 = vld [vmem:[#allocation14_spill] sm:$0xff] }
 0x46a   : > { %8139 = vmatprep.mubr.f32.mxu1 %v10935_v61  ;;  %v11153_v61 = vld [vmem:[#allocation3 + $0x180] sm:$0xff] }
 0x46d   : > { %8140 = vmatmul.mubr.f32.gmra.mrb[18].mxu1 %v11572_v49  ;;  %v11177_v49 = vld [vmem:[#allocation3 + $0x79] sm:$0xff] }
 0x46e   : > { %8142 = vmatprep.mubr.f32.mxu1 %v11573_v50 }
 0x471   : > { %8143 = vmatmul.mubr.f32.gmra.mrb[20].mxu1 %v11574_v7  ;;  %v11180_v7 = vld [vmem:[#allocation3 + $0x81] sm:$0xff] }
 0x472   : > { %8145 = vmatprep.mubr.f32.mxu1 %v10963_v8  ;;  %v4906_v8 = vld [vmem:[#allocation9 + $0x290] sm:$0xff] }
 0x475   : > { %8146 = vmatmul.mubr.f32.gmra.mrb[22].mxu1 %v10965_v51  ;;  %v4907_v51 = vld [vmem:[#allocation9 + $0x298] sm:$0xff] }
 0x476   : > { %8148 = vmatprep.mubr.f32.mxu1 %v11575_v3  ;;  %v9012_v10 = vpack.c.bf16 %v4907_v51, %v4906_v8  ;;  %v4916_v3 = vld [vmem:[#allocation9 + $0x2e0] sm:$0xff]  ;;  %v4918_v8 = vld [vmem:[#allocation9 + $0x2f0] sm:$0xff]  ;;  %v4919_v51 = vld [vmem:[#allocation9 + $0x2f8] sm:$0xff] }
 0x479   : > { %8149 = vmatmul.mubr.f32.gmra.mrb[24].mxu1 %v11576_v2  ;;  %v4917_v2 = vld [vmem:[#allocation9 + $0x2e8] sm:$0xff] }
 0x47a   : > { %8151 = vmatprep.mubr.f32.mxu1 %v11577_v12  ;;  %v11183_v12 = vld [vmem:[#allocation3 + $0x91] sm:$0xff] }
 0x47d   : > { %8152 = vmatmul.mubr.f32.gmra.mrb[26].mxu1 %v11578_v31  ;;  %v9032_v31 = vpack.c.bf16 %v4917_v2, %v4916_v3  ;;  %v11250_v3 = vld [vmem:[#allocation3 + $0x18a] sm:$0xff]  ;;  %v5519_v2 = vld [vmem:[#allocation9 + $0x390] sm:$0xff] }
 0x47e   : > { %8154 = vmatprep.mubr.f32.mxu1 %v10996_v57  ;;  %v11159_v57 = vld [vmem:[#allocation3 + $0x31] sm:$0xff] }
 0x481   : > { %8155 = vmatmul.mubr.f32.gmra.mrb[28].mxu1 %v11579_v34  ;;  %v11186_v34 = vld [vmem:[#allocation3 + $0x99] sm:$0xff] }
 0x482   : > { %8157 = vmatprep.mubr.f32.mxu1 %v11153_v61 }
 0x485   : > { %8158 = vmatmul.mubr.f32.gmra.mrb[30].mxu1 %v11156_v19 }
 0x486   : > { %8192 = vmatprep.mubr.f32.mxu1 %v4565_v59  ;;  %v11189_v59 = vld [vmem:[#allocation3 + $0xa9] sm:$0xff] }
 0x489   : > { %8193 = vmatmul.mubr.f32.vlgmr.msra.gmra.mrb[0].mxu1 %v4566_v21  ;;  %v11192_v21 = vld [vmem:[#allocation3 + $0xb1] sm:$0xff] }
 0x48a   : > { %8195 = vmatprep.mubr.f32.mxu1 %v11159_v57  ;;  %9011 = vmatpush3.bf16.msra.mxu1 %v9008_v28  ;;  %v4915_v28 = vld [vmem:[#allocation9 + $0x2d8] sm:$0xff] }
 0x48b   : > { %9013 = vmatprep.subr.bf16.mxu1 %v9012_v10  ;;  %v9028_v50 = vpack.c.bf16 %v4915_v28, %v4914_v20  ;;  %v11591_v20 = vld [vmem:[#allocation33_spill] sm:$0xff]  ;;  %v11593_v28 = vld [vmem:[#allocation35_spill] sm:$0xff] }
 0x48d   : > { %8196 = vmatmul.mubr.f32.gmra.mrb[2].mxu1 %v11162_v40 }
 0x48e   : > { %8198 = vmatprep.mubr.f32.mxu1 %v11165_v5  ;;  %9015 = vmatpush3.bf16.msra.mxu1 %v9012_v10  ;;  %v9036_v10 = vpack.c.bf16 %v4919_v51, %v4918_v8  ;;  %v5178_v8 = vld [vmem:[#allocation3 + $0x30] sm:$0xff] }
 0x48f   : > { %9017 = vmatprep.subr.bf16.mxu1 %v9016_v32 }
 0x491   : > { %8199 = vmatmul.mubr.f32.gmra.mrb[4].mxu1 %v11168_v41 }
 0x492   : > { %8201 = vmatprep.mubr.f32.mxu1 %v11171_v15  ;;  %9019 = vmatpush3.bf16.msra.mxu1 %v9016_v32  ;;  %v11195_v32 = vld [vmem:[#allocation3 + $0xc1] sm:$0xff] }
 0x493   : > { %9021 = vmatprep.subr.bf16.mxu1 %v9020_v42 }
 0x495   : > { %8202 = vmatmul.mubr.f32.gmra.mrb[6].mxu1 %v11174_v27 }
 0x496   : > { %8204 = vmatprep.mubr.f32.mxu1 %v11177_v49  ;;  %9023 = vmatpush3.bf16.msra.mxu1 %v9020_v42  ;;  %v5226_v42 = vld [vmem:[#allocation9 + $0x378] sm:$0xff] }
 0x497   : > { %9025 = vmatprep.subr.bf16.mxu1 %v9024_v16 }
 0x499   : > { %8205 = vmatmul.mubr.f32.gmra.mrb[8].mxu1 %v11180_v7 }
 0x49a   : > { %8207 = vmatprep.mubr.f32.mxu1 %v11183_v12  ;;  %9027 = vmatpush3.bf16.msra.mxu1 %v9024_v16  ;;  %v11588_v16 = vld [vmem:[#allocation30_spill] sm:$0xff] }
 0x49b   : > { %9029 = vmatprep.subr.bf16.mxu1 %v9028_v50 }
 0x49d   : > { %8208 = vmatmul.mubr.f32.gmra.mrb[10].mxu1 %v11186_v34 }
 0x49e   : > { %8210 = vmatprep.mubr.f32.mxu1 %v11189_v59  ;;  %9031 = vmatpush3.bf16.msra.mxu1 %v9028_v50  ;;  %v11247_v50 = vld [vmem:[#allocation3 + $0x182] sm:$0xff] }
 0x49f   : > { %9033 = vmatprep.subr.bf16.mxu1 %v9032_v31 }
 0x4a1   : > { %8211 = vmatmul.mubr.f32.gmra.mrb[12].mxu1 %v11192_v21 }
 0x4a2   : > { %8213 = vmatprep.mubr.f32.mxu1 %v11195_v32  ;;  %9035 = vmatpush3.bf16.msra.mxu1 %v9032_v31  ;;  %v5520_v31 = vld [vmem:[#allocation9 + $0x398] sm:$0xff] }
 0x4a3   : > { %9037 = vmatprep.subr.bf16.mxu1 %v9036_v10  ;;  %v9076_v51 = vpack.c.bf16 %v5520_v31, %v5519_v2  ;;  %v5200_v2 = vld [vmem:[#allocation3 + $0x138] sm:$0xff]  ;;  %v5201_v31 = vld [vmem:[#allocation3 + $0x140] sm:$0xff] }
 0x4a5   : > { %8214 = vmatmul.mubr.f32.gmra.mrb[14].mxu1 %v11198_v13 }
 0x4a6   : > { %8216 = vmatprep.mubr.f32.mxu1 %v10889_v53  ;;  %9039 = vmatpush3.bf16.msra.mxu1 %v9036_v10  ;;  %v5213_v53 = vld [vmem:[#allocation9 + $0x310] sm:$0xff]  ;;  %v5179_v10 = vld [vmem:[#allocation3 + $0x38] sm:$0xff] }
 0x4a7   : > { %9041 = vmatprep.subr.bf16.mxu1 %v9040_v4 }
 0x4a9   : > { %8217 = vmatmul.mubr.f32.gmra.mrb[16].mxu1 %v10885_v30  ;;  %v11580_v30 = vld [vmem:[#allocation21_spill] sm:$0xff] }
 0x4aa   : > { %8219 = vmatprep.mubr.f32.mxu1 %v10903_v1  ;;  %v11581_v1 = vld [vmem:[#allocation20_spill] sm:$0xff] }
 0x4ad   : > { %8220 = vmatmul.mubr.f32.gmra.mrb[18].mxu1 %v10899_v55  ;;  %v5214_v55 = vld [vmem:[#allocation9 + $0x318] sm:$0xff] }
 0x4ae   : > { %8222 = vmatprep.mubr.f32.mxu1 %v10917_v23  ;;  %v5215_v23 = vld [vmem:[#allocation9 + $0x320] sm:$0xff] }
 0x4b1   : > { %8223 = vmatmul.mubr.f32.gmra.mrb[20].mxu1 %v10913_v17  ;;  %v9044_v17 = vpack.c.bf16 %v5214_v55, %v5213_v53  ;;  %v5181_v53 = vld [vmem:[#allocation3 + $0x50] sm:$0xff]  ;;  %v5523_v55 = vld [vmem:[#allocation9 + $0x3b0] sm:$0xff] }
 0x4b2   : > { %8225 = vmatprep.mubr.f32.mxu1 %v10931_v11 }
 0x4b5   : > { %8226 = vmatmul.mubr.f32.gmra.mrb[22].mxu1 %v10927_v47  ;;  %v5216_v47 = vld [vmem:[#allocation9 + $0x328] sm:$0xff] }
 0x4b6   : > { %8228 = vmatprep.mubr.f32.mxu1 %v10945_v60  ;;  %v9048_v11 = vpack.c.bf16 %v5216_v47, %v5215_v23  ;;  %v5218_v60 = vld [vmem:[#allocation9 + $0x338] sm:$0xff] }
 0x4b7   : > { %v5183_v47 = vld [vmem:[#allocation3 + $0x68] sm:$0xff] }
 0x4b9   : > { %8229 = vmatmul.mubr.f32.gmra.mrb[24].mxu1 %v10941_v33  ;;  %v5217_v33 = vld [vmem:[#allocation9 + $0x330] sm:$0xff] }
 0x4ba   : > { %8231 = vmatprep.mubr.f32.mxu1 %v10959_v56  ;;  %v5219_v56 = vld [vmem:[#allocation9 + $0x340] sm:$0xff] }
 0x4bd   : > { %8232 = vmatmul.mubr.f32.gmra.mrb[26].mxu1 %v10955_v37  ;;  %v9052_v37 = vpack.c.bf16 %v5218_v60, %v5217_v33  ;;  %v5526_v33 = vld [vmem:[#allocation9 + $0x3c8] sm:$0xff] }
 0x4be   : > { %8234 = vmatprep.mubr.f32.mxu1 %v10973_v25  ;;  %v5184_v60 = vld [vmem:[#allocation3 + $0x78] sm:$0xff] }
 0x4c1   : > { %8235 = vmatmul.mubr.f32.gmra.mrb[28].mxu1 %v10969_v14  ;;  %v5220_v14 = vld [vmem:[#allocation9 + $0x348] sm:$0xff] }
 0x4c2   : > { %8237 = vmatprep.mubr.f32.mxu1 %v11580_v30  ;;  %v9056_v25 = vpack.c.bf16 %v5220_v14, %v5219_v56  ;;  %v9080_v30 = vpack.c.bf16 %v5522_v45, %v5521_v9  ;;  %v5185_v56 = vld [vmem:[#allocation3 + $0x80] sm:$0xff]  ;;  %v5205_v9 = vld [vmem:[#allocation3 + $0x170] sm:$0xff] }
 0x4c3   : > { %v5527_v14 = vld [vmem:[#allocation9 + $0x3d0] sm:$0xff]  ;;  %v9787_v45 = vld [vmem:[#allocation2] sm:$0xff] }
 0x4c5   : > { %8238 = vmatmul.mubr.f32.gmra.mrb[30].mxu1 %v11581_v1  ;;  %v5524_v1 = vld [vmem:[#allocation9 + $0x3b8] sm:$0xff] }
 0x4c6   : > { %8272 = vmatprep.mubr.f32.mxu1 %v11033_v44  ;;  %v5221_v44 = vld [vmem:[#allocation9 + $0x350] sm:$0xff]  ;;  %v9084_v23 = vpack.c.bf16 %v5524_v1, %v5523_v55  ;;  %v5827_v55 = vld [vmem:[#allocation9 + $0x420] sm:$0xff]  ;;  %v5828_v1 = vld [vmem:[#allocation9 + $0x428] sm:$0xff] }
 0x4c9   : > { %8273 = vmatmul.mubr.f32.vlgmr.msra.gmra.mrb[0].mxu1 %v11036_v63  ;;  %v5222_v63 = vld [vmem:[#allocation9 + $0x358] sm:$0xff] }
 0x4ca   : > { %8275 = vmatprep.mubr.f32.mxu1 %v11039_v43  ;;  %9043 = vmatpush3.bf16.msra.mxu1 %v9040_v4  ;;  %v9060_v43 = vpack.c.bf16 %v5222_v63, %v5221_v44  ;;  %v5180_v4 = vld [vmem:[#allocation3 + $0x48] sm:$0xff]  ;;  %v5186_v44 = vld [vmem:[#allocation3 + $0x90] sm:$0xff] }
 0x4cb   : > { %9045 = vmatprep.subr.bf16.mxu1 %v9044_v17 }
 0x4cd   : > { %8276 = vmatmul.mubr.f32.gmra.mrb[2].mxu1 %v11042_v24  ;;  %v5223_v24 = vld [vmem:[#allocation9 + $0x360] sm:$0xff] }
 0x4ce   : > { %8278 = vmatprep.mubr.f32.mxu1 %v11045_v62  ;;  %9047 = vmatpush3.bf16.msra.mxu1 %v9044_v17  ;;  %v5224_v62 = vld [vmem:[#allocation9 + $0x368] sm:$0xff]  ;;  %v5182_v17 = vld [vmem:[#allocation3 + $0x60] sm:$0xff] }
 0x4cf   : > { %9049 = vmatprep.subr.bf16.mxu1 %v9048_v11 }
 0x4d1   : > { %8279 = vmatmul.mubr.f32.gmra.mrb[4].mxu1 %v11048_v46  ;;  %v9064_v46 = vpack.c.bf16 %v5224_v62, %v5223_v24  ;;  %v5529_v24 = vld [vmem:[#allocation9 + $0x3e0] sm:$0xff]  ;;  %v5530_v62 = vld [vmem:[#allocation9 + $0x3e8] sm:$0xff] }
 0x4d2   : > { %8281 = vmatprep.mubr.f32.mxu1 %v11051_v36  ;;  %9051 = vmatpush3.bf16.msra.mxu1 %v9048_v11  ;;  %v5225_v36 = vld [vmem:[#allocation9 + $0x370] sm:$0xff]  ;;  %v5525_v11 = vld [vmem:[#allocation9 + $0x3c0] sm:$0xff] }
 0x4d3   : > { %9053 = vmatprep.subr.bf16.mxu1 %v9052_v37 }
 0x4d5   : > { %8282 = vmatmul.mubr.f32.gmra.mrb[6].mxu1 %v11054_v52  ;;  %v9068_v52 = vpack.c.bf16 %v5226_v42, %v5225_v36  ;;  %v9096_v36 = vpack.c.bf16 %v5530_v62, %v5529_v24  ;;  %v5189_v42 = vld [vmem:[#allocation3 + $0xb0] sm:$0xff]  ;;  %v5512_v62 = vld [vmem:[#allocation3 + $0x181] sm:$0xff] }
 0x4d6   : > { %8284 = vmatprep.mubr.f32.mxu1 %v11057_v54  ;;  %9055 = vmatpush3.bf16.msra.mxu1 %v9052_v37  ;;  %v5517_v54 = vld [vmem:[#allocation9 + $0x380] sm:$0xff]  ;;  %v9088_v37 = vpack.c.bf16 %v5526_v33, %v5525_v11  ;;  %v5834_v11 = vld [vmem:[#allocation9 + $0x458] sm:$0xff]  ;;  %v5836_v33 = vld [vmem:[#allocation9 + $0x468] sm:$0xff] }
 0x4d7   : > { %9057 = vmatprep.subr.bf16.mxu1 %v9056_v25  ;;  %v5511_v24 = vld [vmem:[#allocation3 + $0x171] sm:$0xff] }
 0x4d9   : > { %8285 = vmatmul.mubr.f32.gmra.mrb[8].mxu1 %v11060_v39  ;;  %v9072_v39 = vpack.c.bf16 %v5518_v58, %v5517_v54  ;;  %v5532_v54 = vld [vmem:[#allocation9 + $0x3f8] sm:$0xff]  ;;  %v5190_v58 = vld [vmem:[#allocation3 + $0xc0] sm:$0xff] }
 0x4da   : > { %8287 = vmatprep.mubr.f32.mxu1 %v11063_v22  ;;  %9059 = vmatpush3.bf16.msra.mxu1 %v9056_v25  ;;  %v11582_v22 = vld [vmem:[#allocation24_spill] sm:$0xff]  ;;  %v5528_v25 = vld [vmem:[#allocation9 + $0x3d8] sm:$0xff] }
 0x4db   : > { %9061 = vmatprep.subr.bf16.mxu1 %v9060_v43  ;;  %v9092_v63 = vpack.c.bf16 %v5528_v25, %v5527_v14  ;;  %v5505_v14 = vld [vmem:[#allocation3 + $0x129] sm:$0xff]  ;;  %v5507_v25 = vld [vmem:[#allocation3 + $0x141] sm:$0xff] }
 0x4dd   : > { %8288 = vmatmul.mubr.f32.gmra.mrb[10].mxu1 %v11066_v35  ;;  %v11583_v35 = vld [vmem:[#allocation25_spill] sm:$0xff] }
 0x4de   : > { %8290 = vmatprep.mubr.f32.mxu1 %v11069_v48  ;;  %9063 = vmatpush3.bf16.msra.mxu1 %v9060_v43  ;;  %v11584_v48 = vld [vmem:[#allocation26_spill] sm:$0xff]  ;;  %v5187_v43 = vld [vmem:[#allocation3 + $0x98] sm:$0xff] }
 0x4df   : > { %9065 = vmatprep.subr.bf16.mxu1 %v9064_v46 }
 0x4e1   : > { %8291 = vmatmul.mubr.f32.gmra.mrb[12].mxu1 %v11072_v18  ;;  %v11585_v18 = vld [vmem:[#allocation27_spill] sm:$0xff] }
 0x4e2   : > { %8293 = vmatprep.mubr.f32.mxu1 %v11075_v29  ;;  %9067 = vmatpush3.bf16.msra.mxu1 %v9064_v46  ;;  %v11586_v29 = vld [vmem:[#allocation28_spill] sm:$0xff]  ;;  %v5188_v46 = vld [vmem:[#allocation3 + $0xa8] sm:$0xff] }
 0x4e3   : > { %9069 = vmatprep.subr.bf16.mxu1 %v9068_v52 }
 0x4e5   : > { %8294 = vmatmul.mubr.f32.gmra.mrb[14].mxu1 %v11078_v26  ;;  %v11589_v26 = vld [vmem:[#allocation31_spill] sm:$0xff] }
 0x4e6   : > { %8296 = vmatprep.mubr.f32.mxu1 %v11081_v0  ;;  %9071 = vmatpush3.bf16.msra.mxu1 %v9068_v52  ;;  %v11590_v0 = vld [vmem:[#allocation32_spill] sm:$0xff] }
 0x4e7   : > { %9073 = vmatprep.subr.bf16.mxu1 %v9072_v39  ;;  %v5531_v52 = vld [vmem:[#allocation9 + $0x3f0] sm:$0xff] }
 0x4e9   : > { %8297 = vmatmul.mubr.f32.gmra.mrb[16].mxu1 %v11084_v38  ;;  %v11592_v38 = vld [vmem:[#allocation34_spill] sm:$0xff] }
 0x4ea   : > { %8299 = vmatprep.mubr.f32.mxu1 %v11582_v22  ;;  %v5191_v22 = vld [vmem:[#allocation3 + $0xc8] sm:$0xff] }
 0x4ed   : > { %8300 = vmatmul.mubr.f32.gmra.mrb[18].mxu1 %v11583_v35  ;;  %v5823_v35 = vld [vmem:[#allocation9 + $0x400] sm:$0xff] }
 0x4ee   : > { %8302 = vmatprep.mubr.f32.mxu1 %v11584_v48  ;;  %v5824_v48 = vld [vmem:[#allocation9 + $0x408] sm:$0xff] }
 0x4f1   : > { %8303 = vmatmul.mubr.f32.gmra.mrb[20].mxu1 %v11585_v18  ;;  %v5192_v18 = vld [vmem:[#allocation3 + $0xd8] sm:$0xff] }
 0x4f2   : > { %8305 = vmatprep.mubr.f32.mxu1 %v11586_v29  ;;  %v9104_v29 = vpack.c.bf16 %v5824_v48, %v5823_v35  ;;  %v5795_v35 = vld [vmem:[#allocation3 + $0x6a] sm:$0xff]  ;;  %v5796_v48 = vld [vmem:[#allocation3 + $0x7a] sm:$0xff] }
 0x4f5   : > { %8306 = vmatmul.mubr.f32.gmra.mrb[22].mxu1 %v11587_v6  ;;  %v5193_v6 = vld [vmem:[#allocation3 + $0xe0] sm:$0xff] }
 0x4f6   : > { %8308 = vmatprep.mubr.f32.mxu1 %v11588_v16  ;;  %v5194_v16 = vld [vmem:[#allocation3 + $0xf0] sm:$0xff] }
 0x4f9   : > { %8309 = vmatmul.mubr.f32.gmra.mrb[24].mxu1 %v11589_v26  ;;  %v5195_v26 = vld [vmem:[#allocation3 + $0xf8] sm:$0xff] }
 0x4fa   : > { %8311 = vmatprep.mubr.f32.mxu1 %v11590_v0  ;;  %v5196_v0 = vld [vmem:[#allocation3 + $0x108] sm:$0xff] }
 0x4fd   : > { %8312 = vmatmul.mubr.f32.gmra.mrb[26].mxu1 %v11591_v20  ;;  %v5197_v20 = vld [vmem:[#allocation3 + $0x110] sm:$0xff] }
 0x4fe   : > { %8314 = vmatprep.mubr.f32.mxu1 %v11592_v38  ;;  %v5198_v38 = vld [vmem:[#allocation3 + $0x120] sm:$0xff] }
 0x501   : > { %8315 = vmatmul.mubr.f32.gmra.mrb[28].mxu1 %v11593_v28  ;;  %v5199_v28 = vld [vmem:[#allocation3 + $0x128] sm:$0xff] }
 0x502   : > { %8317 = vmatprep.mubr.f32.mxu1 %v11247_v50 }
 0x505   : > { %8318 = vmatmul.mubr.f32.gmra.mrb[30].mxu1 %v11250_v3 }
 0x506   : > { %8352 = vmatprep.mubr.f32.mxu1 %v5178_v8  ;;  %v5202_v8 = vld [vmem:[#allocation3 + $0x150] sm:$0xff] }
 0x509   : > { %8353 = vmatmul.mubr.f32.vlgmr.msra.gmra.mrb[0].mxu1 %v5179_v10  ;;  %v5204_v10 = vld [vmem:[#allocation3 + $0x168] sm:$0xff] }
 0x50a   : > { %8355 = vmatprep.mubr.f32.mxu1 %v5180_v4  ;;  %9075 = vmatpush3.bf16.msra.mxu1 %v9072_v39  ;;  %v9100_v39 = vpack.c.bf16 %v5532_v54, %v5531_v52  ;;  %v5825_v4 = vld [vmem:[#allocation9 + $0x410] sm:$0xff]  ;;  %v5790_v52 = vld [vmem:[#allocation3 + $0x32] sm:$0xff] }
 0x50b   : > { %9077 = vmatprep.subr.bf16.mxu1 %v9076_v51  ;;  %v5791_v54 = vld [vmem:[#allocation3 + $0x3a] sm:$0xff] }
 0x50d   : > { %8356 = vmatmul.mubr.f32.gmra.mrb[2].mxu1 %v5181_v53 }
 0x50e   : > { %8358 = vmatprep.mubr.f32.mxu1 %v5182_v17  ;;  %9079 = vmatpush3.bf16.msra.mxu1 %v9076_v51  ;;  %v5203_v51 = vld [vmem:[#allocation3 + $0x158] sm:$0xff]  ;;  %v9112_v17 = vpack.c.bf16 %v5828_v1, %v5827_v55  ;;  %v5816_v55 = vld [vmem:[#allocation3 + $0x16a] sm:$0xff] }
 0x50f   : > { %9081 = vmatprep.subr.bf16.mxu1 %v9080_v30  ;;  %v5817_v1 = vld [vmem:[#allocation3 + $0x172] sm:$0xff] }
 0x511   : > { %8359 = vmatmul.mubr.f32.gmra.mrb[4].mxu1 %v5183_v47  ;;  %v5832_v47 = vld [vmem:[#allocation9 + $0x448] sm:$0xff] }
 0x512   : > { %8361 = vmatprep.mubr.f32.mxu1 %v5184_v60  ;;  %9083 = vmatpush3.bf16.msra.mxu1 %v9080_v30  ;;  %v5826_v30 = vld [vmem:[#allocation9 + $0x418] sm:$0xff] }
 0x513   : > { %9085 = vmatprep.subr.bf16.mxu1 %v9084_v23  ;;  %v9108_v53 = vpack.c.bf16 %v5826_v30, %v5825_v4  ;;  %v5838_v60 = vld [vmem:[#allocation9 + $0x478] sm:$0xff]  ;;  %v5814_v30 = vld [vmem:[#allocation3 + $0x152] sm:$0xff] }
 0x514   : > { %v5813_v4 = vld [vmem:[#allocation3 + $0x142] sm:$0xff] }
 0x515   : > { %8362 = vmatmul.mubr.f32.gmra.mrb[6].mxu1 %v5185_v56  ;;  %v5502_v56 = vld [vmem:[#allocation3 + $0x109] sm:$0xff] }
 0x516   : > { %8364 = vmatprep.mubr.f32.mxu1 %v5186_v44  ;;  %9087 = vmatpush3.bf16.msra.mxu1 %v9084_v23  ;;  %v5830_v23 = vld [vmem:[#allocation9 + $0x438] sm:$0xff]  ;;  %v5508_v44 = vld [vmem:[#allocation3 + $0x151] sm:$0xff] }
 0x517   : > { %9089 = vmatprep.subr.bf16.mxu1 %v9088_v37 }
 0x519   : > { %8365 = vmatmul.mubr.f32.gmra.mrb[8].mxu1 %v5187_v43  ;;  %v5510_v43 = vld [vmem:[#allocation3 + $0x169] sm:$0xff] }
 0x51a   : > { %8367 = vmatprep.mubr.f32.mxu1 %v5188_v46  ;;  %9091 = vmatpush3.bf16.msra.mxu1 %v9088_v37  ;;  %v5501_v37 = vld [vmem:[#allocation3 + $0xf9] sm:$0xff] }
 0x51b   : > { %9093 = vmatprep.subr.bf16.mxu1 %v9092_v63  ;;  %v5514_v46 = vld [vmem:[#allocation3 + $0x199] sm:$0xff] }
 0x51d   : > { %8368 = vmatmul.mubr.f32.gmra.mrb[10].mxu1 %v5189_v42  ;;  %v5515_v42 = vld [vmem:[#allocation3 + $0x1a1] sm:$0xff] }
 0x51e   : > { %8370 = vmatprep.mubr.f32.mxu1 %v5190_v58  ;;  %9095 = vmatpush3.bf16.msra.mxu1 %v9092_v63  ;;  %v5509_v63 = vld [vmem:[#allocation3 + $0x159] sm:$0xff]  ;;  %v5792_v58 = vld [vmem:[#allocation3 + $0x4a] sm:$0xff] }
 0x51f   : > { %9097 = vmatprep.subr.bf16.mxu1 %v9096_v36 }
 0x521   : > { %8371 = vmatmul.mubr.f32.gmra.mrb[12].mxu1 %v5191_v22  ;;  %v5794_v22 = vld [vmem:[#allocation3 + $0x62] sm:$0xff] }
 0x522   : > { %8373 = vmatprep.mubr.f32.mxu1 %v5192_v18  ;;  %9099 = vmatpush3.bf16.msra.mxu1 %v9096_v36  ;;  %v5513_v36 = vld [vmem:[#allocation3 + $0x189] sm:$0xff] }
 0x523   : > { %9101 = vmatprep.subr.bf16.mxu1 %v9100_v39  ;;  %v5797_v18 = vld [vmem:[#allocation3 + $0x82] sm:$0xff] }
 0x525   : > { %8374 = vmatmul.mubr.f32.gmra.mrb[14].mxu1 %v5193_v6  ;;  %v5799_v6 = vld [vmem:[#allocation3 + $0x9a] sm:$0xff] }
 0x526   : > { %8376 = vmatprep.mubr.f32.mxu1 %v5194_v16  ;;  %9103 = vmatpush3.bf16.msra.mxu1 %v9100_v39  ;;  %v5793_v39 = vld [vmem:[#allocation3 + $0x52] sm:$0xff]  ;;  %v5800_v16 = vld [vmem:[#allocation3 + $0xaa] sm:$0xff] }
 0x527   : > { %9105 = vmatprep.subr.bf16.mxu1 %v9104_v29 }
 0x529   : > { %8377 = vmatmul.mubr.f32.gmra.mrb[16].mxu1 %v5195_v26  ;;  %v5801_v26 = vld [vmem:[#allocation3 + $0xb2] sm:$0xff] }
 0x52a   : > { %8379 = vmatprep.mubr.f32.mxu1 %v5196_v0  ;;  %v5802_v0 = vld [vmem:[#allocation3 + $0xc2] sm:$0xff] }
 0x52d   : > { %8380 = vmatmul.mubr.f32.gmra.mrb[18].mxu1 %v5197_v20  ;;  %v5803_v20 = vld [vmem:[#allocation3 + $0xca] sm:$0xff] }
 0x52e   : > { %8382 = vmatprep.mubr.f32.mxu1 %v5198_v38  ;;  %v5804_v38 = vld [vmem:[#allocation3 + $0xda] sm:$0xff] }
 0x531   : > { %8383 = vmatmul.mubr.f32.gmra.mrb[20].mxu1 %v5199_v28  ;;  %v5805_v28 = vld [vmem:[#allocation3 + $0xe2] sm:$0xff] }
 0x532   : > { %8385 = vmatprep.mubr.f32.mxu1 %v5200_v2  ;;  %v5806_v2 = vld [vmem:[#allocation3 + $0xf2] sm:$0xff] }
 0x535   : > { %8386 = vmatmul.mubr.f32.gmra.mrb[22].mxu1 %v5201_v31  ;;  %v5807_v31 = vld [vmem:[#allocation3 + $0xfa] sm:$0xff] }
 0x536   : > { %8388 = vmatprep.mubr.f32.mxu1 %v5202_v8  ;;  %v5808_v8 = vld [vmem:[#allocation3 + $0x10a] sm:$0xff] }
 0x539   : > { %8389 = vmatmul.mubr.f32.gmra.mrb[24].mxu1 %v5203_v51  ;;  %v5809_v51 = vld [vmem:[#allocation3 + $0x112] sm:$0xff] }
 0x53a   : > { %8391 = vmatprep.mubr.f32.mxu1 %v5204_v10  ;;  %v5810_v10 = vld [vmem:[#allocation3 + $0x122] sm:$0xff] }
 0x53d   : > { %8392 = vmatmul.mubr.f32.gmra.mrb[26].mxu1 %v5205_v9  ;;  %v5811_v9 = vld [vmem:[#allocation3 + $0x12a] sm:$0xff] }
 0x53e   : > { %8394 = vmatprep.mubr.f32.mxu1 %v11153_v61  ;;  %v5829_v61 = vld [vmem:[#allocation9 + $0x430] sm:$0xff] }
 0x541   : > { %8395 = vmatmul.mubr.f32.gmra.mrb[28].mxu1 %v11156_v19  ;;  %v9116_v19 = vpack.c.bf16 %v5830_v23, %v5829_v61  ;;  %v5821_v61 = vld [vmem:[#allocation3 + $0x1a2] sm:$0xff]  ;;  %v11274_v23 = vld [vmem:[%s11399_s4] ss:$0 sm:$0xff] }
 0x542   : > { %8397 = vmatprep.mubr.f32.mxu1 %v9787_v45 }
 0x545   : > { %8398 = vmatmul.mubr.f32.gmra.mrb[30].mxu1 %v9787_v45  ;;  %v5812_v45 = vld [vmem:[#allocation3 + $0x13a] sm:$0xff] }
 0x546   : > { %8432 = vmatprep.mubr.f32.mxu1 %v11159_v57  ;;  %v5831_v57 = vld [vmem:[#allocation9 + $0x440] sm:$0xff] }
 0x549   : > { %8433 = vmatmul.mubr.f32.vlgmr.msra.gmra.mrb[0].mxu1 %v11162_v40  ;;  %v9120_v40 = vpack.c.bf16 %v5832_v47, %v5831_v57  ;;  %v9789_v47 = vld [vmem:[#allocation2 + $0x19] sm:$0xff] }
 0x54a   : > { %8435 = vmatprep.mubr.f32.mxu1 %v11165_v5  ;;  %9107 = vmatpush3.bf16.msra.mxu1 %v9104_v29  ;;  %v5833_v5 = vld [vmem:[#allocation9 + $0x450] sm:$0xff]  ;;  %v5798_v29 = vld [vmem:[#allocation3 + $0x92] sm:$0xff] }
 0x54b   : > { %9109 = vmatprep.subr.bf16.mxu1 %v9108_v53 }
 0x54d   : > { %8436 = vmatmul.mubr.f32.gmra.mrb[2].mxu1 %v11168_v41  ;;  %v9124_v41 = vpack.c.bf16 %v5834_v11, %v5833_v5 }
 0x54e   : > { %8438 = vmatprep.mubr.f32.mxu1 %v11171_v15  ;;  %9111 = vmatpush3.bf16.msra.mxu1 %v9108_v53  ;;  %v5835_v15 = vld [vmem:[#allocation9 + $0x460] sm:$0xff]  ;;  %v5815_v53 = vld [vmem:[#allocation3 + $0x15a] sm:$0xff] }
 0x54f   : > { %9113 = vmatprep.subr.bf16.mxu1 %v9112_v17 }
 0x551   : > { %8439 = vmatmul.mubr.f32.gmra.mrb[4].mxu1 %v11174_v27  ;;  %v9128_v27 = vpack.c.bf16 %v5836_v33, %v5835_v15  ;;  %v9791_v33 = vld [vmem:[#allocation2 + $0x31] sm:$0xff] }
 0x552   : > { %8441 = vmatprep.mubr.f32.mxu1 %v11177_v49  ;;  %9115 = vmatpush3.bf16.msra.mxu1 %v9112_v17  ;;  %v5837_v49 = vld [vmem:[#allocation9 + $0x470] sm:$0xff] }
 0x553   : > { %9117 = vmatprep.subr.bf16.mxu1 %v9116_v19  ;;  %v5820_v17 = vld [vmem:[#allocation3 + $0x19a] sm:$0xff] }
 0x555   : > { %8442 = vmatmul.mubr.f32.gmra.mrb[6].mxu1 %v11180_v7  ;;  %v9132_v7 = vpack.c.bf16 %v5838_v60, %v5837_v49 }
 0x556   : > { %8444 = vmatprep.mubr.f32.mxu1 %v11183_v12  ;;  %9119 = vmatpush3.bf16.msra.mxu1 %v9116_v19  ;;  %v5498_v12 = vld [vmem:[#allocation3 + $0xd9] sm:$0xff]  ;;  %v9788_v19 = vld [vmem:[#allocation2 + $0x21] sm:$0xff] }
 0x557   : > { %9121 = vmatprep.subr.bf16.mxu1 %v9120_v40  ;;  %v3311_v57 = vadd.f32 %v9788_v19, %v11274_v23  ;;  %v9804_v19 = vld [vmem:[#allocation2 + $0xe1] sm:$0xff] }
 0x559   : > { %8445 = vmatmul.mubr.f32.gmra.mrb[8].mxu1 %v11186_v34  ;;  %v5499_v34 = vld [vmem:[#allocation3 + $0xe1] sm:$0xff] }
 0x55a   : > { %8447 = vmatprep.mubr.f32.mxu1 %v11189_v59  ;;  %9123 = vmatpush3.bf16.msra.mxu1 %v9120_v40  ;;  %v5500_v59 = vld [vmem:[#allocation3 + $0xf1] sm:$0xff]  ;;  %v3310_v40 = vadd.f32 %v9789_v47, %v11274_v23 }
 0x55b   : > { %9125 = vmatprep.subr.bf16.mxu1 %v9124_v41 }
 0x55d   : > { %8448 = vmatmul.mubr.f32.gmra.mrb[10].mxu1 %v11192_v21  ;;  %v5503_v21 = vld [vmem:[#allocation3 + $0x111] sm:$0xff] }
 0x55e   : > { %8450 = vmatprep.mubr.f32.mxu1 %v11195_v32  ;;  %9127 = vmatpush3.bf16.msra.mxu1 %v9124_v41  ;;  %v5504_v32 = vld [vmem:[#allocation3 + $0x121] sm:$0xff]  ;;  %v9790_v41 = vld [vmem:[#allocation2 + $0x39] sm:$0xff] }
 0x55f   : > { %9129 = vmatprep.subr.bf16.mxu1 %v9128_v27 }
 0x561   : > { %8451 = vmatmul.mubr.f32.gmra.mrb[12].mxu1 %v11198_v13  ;;  %v5506_v13 = vld [vmem:[#allocation3 + $0x139] sm:$0xff] }
 0x562   : > { %8453 = vmatprep.mubr.f32.mxu1 %v5498_v12  ;;  %9131 = vmatpush3.bf16.msra.mxu1 %v9128_v27  ;;  %v3312_v27 = vadd.f32 %v9791_v33, %v11274_v23  ;;  %v9792_v12 = vld [vmem:[#allocation2 + $0x51] sm:$0xff] }
 0x563   : > { %9133 = vmatprep.subr.bf16.mxu1 %v9132_v7 }
 0x565   : > { %8454 = vmatmul.mubr.f32.gmra.mrb[14].mxu1 %v5499_v34  ;;  %v3315_v34 = vadd.f32 %v9792_v12, %v11274_v23 }
 0x566   : > { %8456 = vmatprep.mubr.f32.mxu1 %v5500_v59  ;;  %9135 = vmatpush3.bf16.msra.mxu1 %v9132_v7 }
 0x569   : > { %8457 = vmatmul.mubr.f32.gmra.mrb[16].mxu1 %v5501_v37  ;;  %v9793_v37 = vld [vmem:[#allocation2 + $0x49] sm:$0xff] }
 0x56a   : > { %8459 = vmatprep.mubr.f32.mxu1 %v5502_v56  ;;  %v3314_v56 = vadd.f32 %v9793_v37, %v11274_v23 }
 0x56d   : > { %8460 = vmatmul.mubr.f32.gmra.mrb[18].mxu1 %v5503_v21 }
 0x56e   : > { %8462 = vmatprep.mubr.f32.mxu1 %v5504_v32 }
 0x571   : > { %8463 = vmatmul.mubr.f32.gmra.mrb[20].mxu1 %v5505_v14 }
 0x572   : > { %8465 = vmatprep.mubr.f32.mxu1 %v5506_v13  ;;  %v9794_v13 = vld [vmem:[#allocation2 + $0x69] sm:$0xff] }
 0x575   : > { %8466 = vmatmul.mubr.f32.gmra.mrb[22].mxu1 %v5507_v25  ;;  %v3317_v25 = vadd.f32 %v9794_v13, %v11274_v23 }
 0x576   : > { %8468 = vmatprep.mubr.f32.mxu1 %v5508_v44 }
 0x579   : > { %8469 = vmatmul.mubr.f32.gmra.mrb[24].mxu1 %v5509_v63  ;;  %v9795_v63 = vld [vmem:[#allocation2 + $0x61] sm:$0xff] }
 0x57a   : > { %8471 = vmatprep.mubr.f32.mxu1 %v5510_v43  ;;  %v3316_v43 = vadd.f32 %v9795_v63, %v11274_v23 }
 0x57d   : > { %8472 = vmatmul.mubr.f32.gmra.mrb[26].mxu1 %v5511_v24 }
 0x57e   : > { %8474 = vmatprep.mubr.f32.mxu1 %v5512_v62 }
 0x581   : > { %8475 = vmatmul.mubr.f32.gmra.mrb[28].mxu1 %v5513_v36  ;;  %v9796_v36 = vld [vmem:[#allocation2 + $0x81] sm:$0xff] }
 0x582   : > { %8477 = vmatprep.mubr.f32.mxu1 %v5514_v46 }
 0x585   : > { %8478 = vmatmul.mubr.f32.gmra.mrb[30].mxu1 %v5515_v42  ;;  %v3319_v42 = vadd.f32 %v9796_v36, %v11274_v23 }
 0x586   : > { %8512 = vmatprep.mubr.f32.mxu1 %v5790_v52 }
 0x589   : > { %8513 = vmatmul.mubr.f32.vlgmr.msra.gmra.mrb[0].mxu1 %v5791_v54  ;;  %v9797_v54 = vld [vmem:[#allocation2 + $0x79] sm:$0xff] }
 0x58a   : > { %8515 = vmatprep.mubr.f32.mxu1 %v5792_v58  ;;  %v3318_v58 = vadd.f32 %v9797_v54, %v11274_v23 }
 0x58d   : > { %8516 = vmatmul.mubr.f32.gmra.mrb[2].mxu1 %v5793_v39 }
 0x58e   : > { %8518 = vmatprep.mubr.f32.mxu1 %v5794_v22 }
 0x591   : > { %8519 = vmatmul.mubr.f32.gmra.mrb[4].mxu1 %v5795_v35 }
 0x592   : > { %8521 = vmatprep.mubr.f32.mxu1 %v5796_v48  ;;  %v9798_v48 = vld [vmem:[#allocation2 + $0x99] sm:$0xff] }
 0x595   : > { %8522 = vmatmul.mubr.f32.gmra.mrb[6].mxu1 %v5797_v18  ;;  %v3321_v18 = vadd.f32 %v9798_v48, %v11274_v23 }
 0x596   : > { %8524 = vmatprep.mubr.f32.mxu1 %v5798_v29 }
 0x599   : > { %8525 = vmatmul.mubr.f32.gmra.mrb[8].mxu1 %v5799_v6  ;;  %v9799_v6 = vld [vmem:[#allocation2 + $0x91] sm:$0xff] }
 0x59a   : > { %8527 = vmatprep.mubr.f32.mxu1 %v5800_v16  ;;  %v3320_v16 = vadd.f32 %v9799_v6, %v11274_v23 }
 0x59d   : > { %8528 = vmatmul.mubr.f32.gmra.mrb[10].mxu1 %v5801_v26 }
 0x59e   : > { %8530 = vmatprep.mubr.f32.mxu1 %v5802_v0 }
 0x5a1   : > { %8531 = vmatmul.mubr.f32.gmra.mrb[12].mxu1 %v5803_v20 }
 0x5a2   : > { %8533 = vmatprep.mubr.f32.mxu1 %v5804_v38  ;;  %v9800_v38 = vld [vmem:[#allocation2 + $0xb1] sm:$0xff] }
 0x5a5   : > { %8534 = vmatmul.mubr.f32.gmra.mrb[14].mxu1 %v5805_v28  ;;  %v3323_v28 = vadd.f32 %v9800_v38, %v11274_v23 }
 0x5a6   : > { %8536 = vmatprep.mubr.f32.mxu1 %v5806_v2 }
 0x5a9   : > { %8537 = vmatmul.mubr.f32.gmra.mrb[16].mxu1 %v5807_v31  ;;  %v9801_v31 = vld [vmem:[#allocation2 + $0xa9] sm:$0xff] }
 0x5aa   : > { %8539 = vmatprep.mubr.f32.mxu1 %v5808_v8  ;;  %v3322_v8 = vadd.f32 %v9801_v31, %v11274_v23 }
 0x5ad   : > { %8540 = vmatmul.mubr.f32.gmra.mrb[18].mxu1 %v5809_v51 }
 0x5ae   : > { %8542 = vmatprep.mubr.f32.mxu1 %v5810_v10 }
 0x5b1   : > { %8543 = vmatmul.mubr.f32.gmra.mrb[20].mxu1 %v5811_v9 }
 0x5b2   : > { %8545 = vmatprep.mubr.f32.mxu1 %v5812_v45  ;;  %v9802_v45 = vld [vmem:[#allocation2 + $0xc9] sm:$0xff] }
 0x5b5   : > { %8546 = vmatmul.mubr.f32.gmra.mrb[22].mxu1 %v5813_v4  ;;  %v3325_v4 = vadd.f32 %v9802_v45, %v11274_v23 }
 0x5b6   : > { %8548 = vmatprep.mubr.f32.mxu1 %v5814_v30 }
 0x5b9   : > { %8549 = vmatmul.mubr.f32.gmra.mrb[24].mxu1 %v5815_v53  ;;  %v9803_v53 = vld [vmem:[#allocation2 + $0xc1] sm:$0xff] }
 0x5ba   : > { %8551 = vmatprep.mubr.f32.mxu1 %v5816_v55  ;;  %v3324_v55 = vadd.f32 %v9803_v53, %v11274_v23 }
 0x5bd   : > { %8552 = vmatmul.mubr.f32.gmra.mrb[26].mxu1 %v5817_v1 }
 0x5be   : > { %8554 = vmatprep.mubr.f32.mxu1 %v11247_v50 }
 0x5c1   : > { %8555 = vmatmul.mubr.f32.gmra.mrb[28].mxu1 %v11250_v3  ;;  %v3313_v3 = vadd.f32 %v9790_v41, %v11274_v23 }
 0x5c2   : > { %8557 = vmatprep.mubr.f32.mxu1 %v5820_v17 }
 0x5c5   : > { %8558 = vmatmul.mubr.f32.gmra.mrb[30].mxu1 %v5821_v61 }
 0x65c   : > { %v8514_v5 = vpop.f32.mrb[0].mxu1 }
 0x65d   : > { %v9168_v50 = vadd.f32 %v8514_v5, %v3311_v57  ;;  %v5905_v11 = vpop.f32.mrb[1].mxu1  ;;  %v3327_v57 = vadd.f32 %v9804_v19, %v11274_v23 }
 0x65e   : > { %v9169_v15 = vadd.f32 %v5905_v11, %v3310_v40  ;;  %v9805_v40 = vld [vmem:[#allocation2 + $0xd9] sm:$0xff] }
 0x65f   : > { %6097 = vst [vmem:[%s11282_s10 + $0x8] sm:$0xff] %v9168_v50  ;;  %v3326_v5 = vadd.f32 %v9805_v40, %v11274_v23 }
 0x660   : > { %6096 = vst [vmem:[%s11282_s10] sm:$0xff] %v9169_v15  ;;  %v8517_v49 = vpop.f32.mrb[2].mxu1 }
 0x661   : > { %v9170_v60 = vadd.f32 %v8517_v49, %v3313_v3  ;;  %v5915_v7 = vpop.f32.mrb[3].mxu1  ;;  %v9806_v3 = vld [vmem:[#allocation2 + $0xf9] sm:$0xff] }
 0x662   : > { %v9171_v59 = vadd.f32 %v5915_v7, %v3312_v27  ;;  %v3329_v15 = vadd.f32 %v9806_v3, %v11274_v23  ;;  %v9807_v27 = vld [vmem:[#allocation2 + $0xf1] sm:$0xff] }
 0x663   : > { %6099 = vst [vmem:[%s11282_s10 + $0x18] sm:$0xff] %v9170_v60  ;;  %v3328_v49 = vadd.f32 %v9807_v27, %v11274_v23 }
 0x664   : > { %6098 = vst [vmem:[%s11282_s10 + $0x10] sm:$0xff] %v9171_v59  ;;  %v8520_v21 = vpop.f32.mrb[4].mxu1 }
 0x665   : > { %v9172_v32 = vadd.f32 %v8520_v21, %v3315_v34  ;;  %v5925_v14 = vpop.f32.mrb[5].mxu1  ;;  %v9808_v34 = vld [vmem:[#allocation2 + $0x111] sm:$0xff] }
 0x666   : > { %v9173_v44 = vadd.f32 %v5925_v14, %v3314_v56  ;;  %v3331_v59 = vadd.f32 %v9808_v34, %v11274_v23  ;;  %v9809_v56 = vld [vmem:[#allocation2 + $0x109] sm:$0xff] }
 0x667   : > { %6101 = vst [vmem:[%s11282_s10 + $0x28] sm:$0xff] %v9172_v32  ;;  %v3330_v21 = vadd.f32 %v9809_v56, %v11274_v23 }
 0x668   : > { %6100 = vst [vmem:[%s11282_s10 + $0x20] sm:$0xff] %v9173_v44  ;;  %v8523_v24 = vpop.f32.mrb[6].mxu1 }
 0x669   : > { %v9174_v62 = vadd.f32 %v8523_v24, %v3317_v25  ;;  %v5935_v46 = vpop.f32.mrb[7].mxu1  ;;  %v9810_v25 = vld [vmem:[#allocation2 + $0x129] sm:$0xff] }
 0x66a   : > { %v9175_v52 = vadd.f32 %v5935_v46, %v3316_v43  ;;  %v3333_v44 = vadd.f32 %v9810_v25, %v11274_v23  ;;  %v9811_v43 = vld [vmem:[#allocation2 + $0x121] sm:$0xff] }
 0x66b   : > { %6103 = vst [vmem:[%s11282_s10 + $0x38] sm:$0xff] %v9174_v62  ;;  %v3332_v24 = vadd.f32 %v9811_v43, %v11274_v23 }
 0x66c   : > { %6102 = vst [vmem:[%s11282_s10 + $0x30] sm:$0xff] %v9175_v52  ;;  %v8526_v39 = vpop.f32.mrb[8].mxu1 }
 0x66d   : > { %v9176_v22 = vadd.f32 %v8526_v39, %v3319_v42  ;;  %v5945_v35 = vpop.f32.mrb[9].mxu1  ;;  %v9812_v42 = vld [vmem:[#allocation2 + $0x141] sm:$0xff] }
 0x66e   : > { %v9177_v29 = vadd.f32 %v5945_v35, %v3318_v58  ;;  %v3335_v52 = vadd.f32 %v9812_v42, %v11274_v23  ;;  %v9813_v58 = vld [vmem:[#allocation2 + $0x139] sm:$0xff] }
 0x66f   : > { %6105 = vst [vmem:[%s11282_s10 + $0x48] sm:$0xff] %v9176_v22  ;;  %v3334_v39 = vadd.f32 %v9813_v58, %v11274_v23 }
 0x670   : > { %6104 = vst [vmem:[%s11282_s10 + $0x40] sm:$0xff] %v9177_v29  ;;  %v8529_v26 = vpop.f32.mrb[10].mxu1 }
 0x671   : > { %v9178_v0 = vadd.f32 %v8529_v26, %v3321_v18  ;;  %v5955_v20 = vpop.f32.mrb[11].mxu1  ;;  %v9814_v18 = vld [vmem:[#allocation2 + $0x159] sm:$0xff] }
 0x672   : > { %v9179_v2 = vadd.f32 %v5955_v20, %v3320_v16  ;;  %v3337_v29 = vadd.f32 %v9814_v18, %v11274_v23  ;;  %v9815_v16 = vld [vmem:[#allocation2 + $0x151] sm:$0xff] }
 0x673   : > { %6107 = vst [vmem:[%s11282_s10 + $0x58] sm:$0xff] %v9178_v0  ;;  %v3336_v26 = vadd.f32 %v9815_v16, %v11274_v23 }
 0x674   : > { %6106 = vst [vmem:[%s11282_s10 + $0x50] sm:$0xff] %v9179_v2  ;;  %v8532_v51 = vpop.f32.mrb[12].mxu1 }
 0x675   : > { %v9180_v10 = vadd.f32 %v8532_v51, %v3323_v28  ;;  %v5965_v9 = vpop.f32.mrb[13].mxu1  ;;  %v9816_v28 = vld [vmem:[#allocation2 + $0x171] sm:$0xff] }
 0x676   : > { %v9181_v30 = vadd.f32 %v5965_v9, %v3322_v8  ;;  %v3339_v2 = vadd.f32 %v9816_v28, %v11274_v23  ;;  %v9817_v8 = vld [vmem:[#allocation2 + $0x169] sm:$0xff] }
 0x677   : > { %6109 = vst [vmem:[%s11282_s10 + $0x68] sm:$0xff] %v9180_v10  ;;  %v3338_v51 = vadd.f32 %v9817_v8, %v11274_v23 }
 0x678   : > { %6108 = vst [vmem:[%s11282_s10 + $0x60] sm:$0xff] %v9181_v30  ;;  %v8535_v1 = vpop.f32.mrb[14].mxu1 }
 0x679   : > { %v9182_v17 = vadd.f32 %v8535_v1, %v3325_v4  ;;  %v5975_v61 = vpop.f32.mrb[15].mxu1  ;;  %v9818_v4 = vld [vmem:[#allocation2 + $0x189] sm:$0xff] }
 0x67a   : > { %v9183_v47 = vadd.f32 %v5975_v61, %v3324_v55  ;;  %v3341_v30 = vadd.f32 %v9818_v4, %v11274_v23  ;;  %v9819_v55 = vld [vmem:[#allocation2 + $0x181] sm:$0xff] }
 0x67b   : > { %6111 = vst [vmem:[%s11282_s10 + $0x78] sm:$0xff] %v9182_v17  ;;  %v3340_v1 = vadd.f32 %v9819_v55, %v11274_v23 }
 0x67c   : > { %6110 = vst [vmem:[%s11282_s10 + $0x70] sm:$0xff] %v9183_v47  ;;  %v8538_v50 = vpop.f32.mrb[16].mxu1 }
 0x67d   : > { %v9184_v11 = vadd.f32 %v8538_v50, %v3327_v57  ;;  %v5985_v41 = vpop.f32.mrb[17].mxu1 }
 0x67e   : > { %v9185_v33 = vadd.f32 %v5985_v41, %v3326_v5 }
 0x67f   : > { %6113 = vst [vmem:[%s11282_s10 + $0x88] sm:$0xff] %v9184_v11 }
 0x680   : > { %6112 = vst [vmem:[%s11282_s10 + $0x80] sm:$0xff] %v9185_v33  ;;  %v8541_v60 = vpop.f32.mrb[18].mxu1 }
 0x681   : > { %v9186_v7 = vadd.f32 %v8541_v60, %v3329_v15  ;;  %v5995_v12 = vpop.f32.mrb[19].mxu1 }
 0x682   : > { %v9187_v37 = vadd.f32 %v5995_v12, %v3328_v49 }
 0x683   : > { %6115 = vst [vmem:[%s11282_s10 + $0x98] sm:$0xff] %v9186_v7 }
 0x684   : > { %6114 = vst [vmem:[%s11282_s10 + $0x90] sm:$0xff] %v9187_v37  ;;  %v8544_v32 = vpop.f32.mrb[20].mxu1 }
 0x685   : > { %v9188_v14 = vadd.f32 %v8544_v32, %v3331_v59  ;;  %v6005_v13 = vpop.f32.mrb[21].mxu1 }
 0x686   : > { %v9189_v63 = vadd.f32 %v6005_v13, %v3330_v21 }
 0x687   : > { %6117 = vst [vmem:[%s11282_s10 + $0xa8] sm:$0xff] %v9188_v14 }
 0x688   : > { %6116 = vst [vmem:[%s11282_s10 + $0xa0] sm:$0xff] %v9189_v63  ;;  %v8547_v62 = vpop.f32.mrb[22].mxu1 }
 0x689   : > { %v9190_v46 = vadd.f32 %v8547_v62, %v3333_v44  ;;  %v6015_v36 = vpop.f32.mrb[23].mxu1 }
 0x68a   : > { %v9191_v54 = vadd.f32 %v6015_v36, %v3332_v24 }
 0x68b   : > { %6119 = vst [vmem:[%s11282_s10 + $0xb8] sm:$0xff] %v9190_v46 }
 0x68c   : > { %6118 = vst [vmem:[%s11282_s10 + $0xb0] sm:$0xff] %v9191_v54  ;;  %v8550_v22 = vpop.f32.mrb[24].mxu1 }
 0x68d   : > { %v9192_v35 = vadd.f32 %v8550_v22, %v3335_v52  ;;  %v6025_v48 = vpop.f32.mrb[25].mxu1 }
 0x68e   : > { %v9193_v6 = vadd.f32 %v6025_v48, %v3334_v39 }
 0x68f   : > { %6121 = vst [vmem:[%s11282_s10 + $0xc8] sm:$0xff] %v9192_v35 }
 0x690   : > { %6120 = vst [vmem:[%s11282_s10 + $0xc0] sm:$0xff] %v9193_v6  ;;  %v8553_v0 = vpop.f32.mrb[26].mxu1 }
 0x691   : > { %v9194_v20 = vadd.f32 %v8553_v0, %v3337_v29  ;;  %v6035_v38 = vpop.f32.mrb[27].mxu1 }
 0x692   : > { %v9195_v31 = vadd.f32 %v6035_v38, %v3336_v26 }
 0x693   : > { %6123 = vst [vmem:[%s11282_s10 + $0xd8] sm:$0xff] %v9194_v20 }
 0x694   : > { %6122 = vst [vmem:[%s11282_s10 + $0xd0] sm:$0xff] %v9195_v31  ;;  %v8556_v10 = vpop.f32.mrb[28].mxu1 }
 0x695   : > { %v9196_v9 = vadd.f32 %v8556_v10, %v3339_v2  ;;  %v6045_v45 = vpop.f32.mrb[29].mxu1 }
 0x696   : > { %v9197_v53 = vadd.f32 %v6045_v45, %v3338_v51 }
 0x697   : > { %6125 = vst [vmem:[%s11282_s10 + $0xe8] sm:$0xff] %v9196_v9 }
 0x698   : > { %6124 = vst [vmem:[%s11282_s10 + $0xe0] sm:$0xff] %v9197_v53  ;;  %v8559_v17 = vpop.f32.mrb[30].mxu1 }
 0x699   : > { %v9198_v61 = vadd.f32 %v8559_v17, %v3341_v30  ;;  %v6055_v19 = vpop.f32.mrb[31].mxu1 }
 0x69a   : > { %v9199_v57 = vadd.f32 %v6055_v19, %v3340_v1 }
 0x69b   : > { %6127 = vst [vmem:[%s11282_s10 + $0xf8] sm:$0xff] %v9198_v61 }
 0x69c   : > { %6126 = vst [vmem:[%s11282_s10 + $0xf0] sm:$0xff] %v9199_v57 }
 0x69d   : > { %9919 = shalt.err (!%p9916_p1)
}
 0x69e   : > { %s9920_s12 = scalar_lea.hbm %s11347_s11, 4096  ;;  %s9924_s15 = scalar_lea.hbm %s11400_s5, 8192 }
 0x69f   : > { %p9921_p13 = scmp.ne.s32.totalorder %s11347_s11, %s9920_s12  ;;  %p9925_p4 = scmp.lt.u32.totalorder %s11347_s11, %s11400_s5 }
 0x6a0   : > { %p9926_p5 = scmp.lt.u32.totalorder %s9924_s15, %s9920_s12  ;;  %p9928_p11 = scmp.lt.u32.totalorder %s9920_s12, %s11347_s11 }
 0x6a1   : > { %p9922_p6 = pnand %p9921_p13, %p11594_p0 }
 0x6a2   : > { %p9927_p8 = por %p9926_p5, %p9925_p4 }
 0x6a3   : > { %p9923_p10 = pneg %p9922_p6 }
 0x6a4   : > { %p9929_p2 = por %p9928_p11, %p9927_p8 }
 0x6a6   : > { %p9930_p3 = pnand %p9929_p2, %p9923_p10 }
 0x6a8   : > { %9933 = shalt.err (!%p9930_p3)
}
 0x6a9   : > { %s9985_s28 = smov 128   ;;  %s9986_s9 = smov 8  }
 0x6aa   : > { %9722 = dma.vmem_to_hbm [thread:$0]  (%p11594_p0), %s11349_s13, 4096, %s11347_s11, %s6129_s22, %s9985_s28, %s9985_s28, %s9986_s9  }
 0x6ab PF: > { %s6157_s30 = sand.u32 1, %s9964_s18   ;;  %p11595_p7 = scmp.ne.s32.totalorder %s11465_s25, 0 }
 0x6ac   : > { %p11596_p9 = scmp.ge.s32.totalorder %s9976_s21, 2  ;;  %s6158_s17 = scalar_lea.sflag [#allocation6], %s6157_s30 }
 0x6ae   : > { %p9736_p12 = pnand %p11596_p9, %p11595_p7 }
 0x6b0   : > { %9959 = dma.done.wait (!%p9736_p12), %s6158_s17, 4096  }
 0x6b1   : > { %9961 = vsyncadd (!%p9736_p12), %s6158_s17, 4294963200  ;;  %p19_p1 = scmp.ge.s32.totalorder %s10133_s29, 4   ;;  %s11597_s18 = smov %s9968_s19 }
 0x6b2   : > { %s11598_s19 = smov %s9972_s20  ;;  %s11599_s20 = smov %s10149_s27 }
 0x6b3   : > { %s11600_s21 = smov %s10133_s29  ;;  %21 = sbr.rel (!%p19_p1) target bundleno = 6 (0x6), region = 113 }
 0x6ba   :  { %6163 = vsyncpa [#allocation5], 1 }
 0x6bb   :  { %6165 = vsyncpa [#allocation5 + $0x1], 1 }
 0x6bc   :  { %6166 = vsyncpa [#allocation8], 1 }
 0x6bd   :  { %6167 = vsyncpa [#allocation6], 1 }
 0x6be   :  { %6169 = vsyncpa [#allocation6 + $0x1], 1 }

</bundles_post_ra>
